<compile_context>
chip_gen: v6e
topology: v6e:2x2x1
jax: 0.10.0
libtpu: 0.0.40
codegen_flags: <defaults>
</compile_context>

<pallas_src>
import functools

import jax
import jax.numpy as jnp
from jax.experimental import pallas as pl
from jax.experimental.pallas import tpu as pltpu

_BN_EPS = 1e-5
_LANE = 128
_TM2_TARGET = 1024            # pass-2 (elementwise) row-tile target
_WEIGHT_1BUF_BYTES = 1 << 20  # single-buffer grid-invariant weights above this


def _round_up(x, m):
    return (x + m - 1) // m * m


def _tpu_config():
    """(vmem_limit_bytes, pass-1 row-tile target), generation-tuned.

    v5e/v6e have 128 MiB VMEM -> bigger budget + bigger pass-1 tiles;
    v7x has 64 MiB per TensorCore -> keep the conservative 48 MiB cap."""
    cap = 64 * 1024 * 1024
    try:
        cap = int(getattr(pltpu.get_tpu_info(), "vmem_capacity_bytes", cap))
    except Exception:
        pass
    if cap >= 128 * 1024 * 1024:
        return 96 * 1024 * 1024, 512
    return 48 * 1024 * 1024, 256


_VMEM_LIMIT_BYTES, _TM_TARGET = _tpu_config()


def _row_tiling(m):
    """Pass-1 row tile + padded row count.  Deterministic in m, so residual /
    1x1-consumer layouts line up across layers; keeps >= 2 row tiles whenever
    possible so both v7x TensorCores get work on small late-stage layers."""
    if m > _TM_TARGET:
        tm1 = _TM_TARGET
    elif m >= 32:
        tm1 = _round_up((m + 1) // 2, 16)   # >= 2 tiles
    else:
        tm1 = _round_up(max(m, 1), 16)
    return tm1, _round_up(m, tm1)


def _pass2_tile(tm1, m_pad):
    """Pass 2 is trivially elementwise -> much larger row tile (<= _TM2_TARGET),
    while keeping >= 2 grid steps for megacore when available."""
    mt1 = m_pad // tm1
    if mt1 <= 2:
        return tm1
    for j in range(mt1 // 2, 0, -1):
        if mt1 % j == 0 and tm1 * j <= _TM2_TARGET:
            return tm1 * j
    return tm1


def _mish(y):
    # mish(y) = y * tanh(softplus(y)), one transcendental:
    #   w = 1 + e^y ;  tanh(softplus(y)) = (w^2 - 1) / (w^2 + 1)
    # exp clamped / large-y bypassed (mish(y) -> y) so outputs stay finite.
    e = jnp.exp(jnp.minimum(y, 20.0))
    w = 1.0 + e
    w2 = w * w
    t = (w2 - 1.0) * pl.reciprocal(w2 + 1.0, approx=True)
    return jnp.where(y > 20.0, y, y * t)


# ----------------------------- Pallas kernels --------------------------------

def _matmul_stats_kernel(p_ref, w_ref, y_ref, sum_ref, sq_ref):
    # p_ref: [TM, K] bf16 patch tile; w_ref: [K, Cpad] bf16 (grid-resident).
    acc = jnp.dot(p_ref[...], w_ref[...], preferred_element_type=jnp.float32)
    y_ref[...] = acc.astype(y_ref.dtype)          # bf16 staging buffer
    # Per-tile partial BN statistics from the f32 accumulator (exact);
    # zero-padded rows contribute exactly 0 to both sums.
    sum_ref[...] = jnp.sum(acc, axis=0, keepdims=True)[None]
    sq_ref[...] = jnp.sum(acc * acc, axis=0, keepdims=True)[None]


def _apply_bn_mish(y_ref, s_ref, b_ref):
    y = y_ref[...].astype(jnp.float32) * s_ref[...] + b_ref[...]
    return _mish(y)


def _row_mask(x, m_rows, tm):
    # Keep padded rows exactly 0 so downstream padded consumers stay exact.
    rows = pl.program_id(0) * tm + jax.lax.broadcasted_iota(jnp.int32, x.shape, 0)
    return jnp.where(rows < m_rows, x, 0.0)


def _bn_mish_kernel(y_ref, s_ref, b_ref, o_ref, *, m_rows, tm, mask_rows):
    act = _apply_bn_mish(y_ref, s_ref, b_ref)
    if mask_rows:
        act = _row_mask(act, m_rows, tm)
    o_ref[...] = act.astype(o_ref.dtype)


def _bn_mish_res_kernel(y_ref, s_ref, b_ref, r_ref, o_ref, *, m_rows, tm, mask_rows):
    out = r_ref[...].astype(jnp.float32) + _apply_bn_mish(y_ref, s_ref, b_ref)
    if mask_rows:
        out = _row_mask(out, m_rows, tm)
    o_ref[...] = out.astype(o_ref.dtype)


# ------------------------------ layer wrapper --------------------------------

def _act_to_nhwc(act, dtype=jnp.bfloat16):
    """Materialize the logical NHWC view of an activation record."""
    if act["buf"] is None:
        return act["nhwc"].astype(dtype)
    n, h, w, c = act["shape"]
    return act["buf"][:n * h * w, :c].reshape(n, h, w, c).astype(dtype)


def _im2col(x_nhwc, ks, stride):
    """(kh, kw, cin)-ordered patches -> [N*Ho*Wo, ks*ks*C] (bf16)."""
    n, h, w, c = x_nhwc.shape
    pad = (ks - 1) // 2  # 'SAME' convention of the reference module
    xp = jnp.pad(x_nhwc.astype(jnp.bfloat16),
                 ((0, 0), (pad, pad), (pad, pad), (0, 0)))
    ho = (h + 2 * pad - ks) // stride + 1
    wo = (w + 2 * pad - ks) // stride + 1
    cols = []
    for kh in range(ks):
        for kw in range(ks):
            cols.append(
                xp[:, kh:kh + (ho - 1) * stride + 1:stride,
                      kw:kw + (wo - 1) * stride + 1:stride, :])
    patches = jnp.concatenate(cols, axis=-1)  # [N, Ho, Wo, ks*ks*C]
    return patches.reshape(n * ho * wo, ks * ks * c), (n, ho, wo)


def conv_bn_mish(act, w, gamma, beta, *, stride, ks, residual=None):
    """One ConvBnAct layer (conv + train-mode BN + Mish), two Pallas passes.

    Activation records: {"buf": [m_pad, c_pad] bf16 lane-dense (padding zeroed)
    or None, "nhwc": NHWC array (when buf is None), "shape": (n, h, w, c)}.
    """
    n, h, wd, cin = act["shape"]
    cout = w.shape[0]
    c_pad = _round_up(cout, _LANE)

    # ---- build matmul operands ----------------------------------------------
    if ks == 1 and stride == 1:
        # 1x1 fast path: consume the lane-dense padded buffer directly
        # (no slice / reshape / re-pad round trips through HBM).
        ho, wo = h, wd
        m = n * h * wd
        tm1, m_pad = _row_tiling(m)
        if act["buf"] is not None:
            patches = act["buf"]                       # [m_pad, k] bf16, zero-padded
            if patches.shape[0] != m_pad:              # defensive; equal by construction
                patches = jnp.pad(patches[:m], ((0, m_pad - m), (0, 0)))
            k = patches.shape[1]
        else:
            patches = _act_to_nhwc(act).reshape(m, cin)
            patches = jnp.pad(patches, ((0, m_pad - m), (0, 0)))
            k = cin
        w_mat = jnp.transpose(w.reshape(cout, cin), (1, 0))       # [cin, cout]
        if k != cin:                                              # zero rows for the
            w_mat = jnp.pad(w_mat, ((0, k - cin), (0, 0)))        # padded input lanes
    else:
        # TODO(synk): replace this HBM-materialized im2col with in-kernel implicit
        # im2col (halo'd NHWC row bands + ks*ks shifted dots) to cut the 3x3
        # layers' input-side HBM traffic ~ks^2 x.
        patches, (n, ho, wo) = _im2col(_act_to_nhwc(act), ks, stride)
        m, k = patches.shape
        tm1, m_pad = _row_tiling(m)
        patches = jnp.pad(patches, ((0, m_pad - m), (0, 0)))
        # torch conv weight [Cout, Cin, kh, kw] -> [kh*kw*Cin, Cout] (patch order)
        w_mat = jnp.transpose(w, (2, 3, 1, 0)).reshape(k, cout)

    mt = m_pad // tm1
    w_mat = jnp.pad(w_mat, ((0, 0), (0, c_pad - cout))).astype(jnp.bfloat16)

    cparams = pltpu.CompilerParams(
        dimension_semantics=("parallel",),
        vmem_limit_bytes=_VMEM_LIMIT_BYTES)

    # Grid-invariant weight block: single-buffer it once it is big enough to
    # matter (deep layers: K up to 4608, c_pad 1024 -> ~9 MiB bf16) so v7x's
    # 64 MiB VMEM does not hold two copies.
    if k * c_pad * 2 >= _WEIGHT_1BUF_BYTES:
        w_spec = pl.BlockSpec((k, c_pad), lambda i: (0, 0),
                              pipeline_mode=pl.Buffered(1))
    else:
        w_spec = pl.BlockSpec((k, c_pad), lambda i: (0, 0))

    # ---- pass 1: MXU matmul + per-tile partial BN sums (bf16 staging y) ------
    y, psum, psq = pl.pallas_call(
        _matmul_stats_kernel,
        grid=(mt,),
        in_specs=[pl.BlockSpec((tm1, k), lambda i: (i, 0)), w_spec],
        out_specs=(
            pl.BlockSpec((tm1, c_pad), lambda i: (i, 0)),
            pl.BlockSpec((1, 1, c_pad), lambda i: (i, 0, 0)),
            pl.BlockSpec((1, 1, c_pad), lambda i: (i, 0, 0)),
        ),
        out_shape=(
            jax.ShapeDtypeStruct((m_pad, c_pad), jnp.bfloat16),
            jax.ShapeDtypeStruct((mt, 1, c_pad), jnp.float32),
            jax.ShapeDtypeStruct((mt, 1, c_pad), jnp.float32),
        ),
        compiler_params=cparams,
    )(patches, w_mat)

    # ---- tiny global BN-stat reduction (f32, biased var, true row count m) ---
    # TODO(synk): switch to per-tile centered sums + Chan's combine if the
    # E[x^2]-E[x]^2 cancellation ever becomes visible at very large m.
    s = jnp.sum(psum[:, 0, :], axis=0)
    ss = jnp.sum(psq[:, 0, :], axis=0)
    mean = s / m
    var = jnp.maximum(ss / m - mean * mean, 0.0)
    g = jnp.pad(gamma.astype(jnp.float32), (0, c_pad - cout))
    b = jnp.pad(beta.astype(jnp.float32), (0, c_pad - cout))
    scale_vec = g * jax.lax.rsqrt(var + _BN_EPS)        # padded channels -> 0
    shift_vec = b - mean * scale_vec
    scale = scale_vec.reshape(1, c_pad)
    shift = shift_vec.reshape(1, c_pad)

    # ---- pass 2: BN affine + Mish (+ residual); bf16 lane-dense output -------
    tm2 = _pass2_tile(tm1, m_pad)
    mt2 = m_pad // tm2
    mask_rows = (m_pad != m)

    args = [y, scale, shift]
    in_specs = [
        pl.BlockSpec((tm2, c_pad), lambda i: (i, 0)),
        pl.BlockSpec((1, c_pad), lambda i: (0, 0)),
        pl.BlockSpec((1, c_pad), lambda i: (0, 0)),
    ]
    if residual is None:
        kernel = functools.partial(_bn_mish_kernel, m_rows=m, tm=tm2,
                                   mask_rows=mask_rows)
    else:
        rbuf = residual["buf"]
        rn, rh, rw, rc = residual["shape"]
        if rbuf is None or rbuf.shape != (m_pad, c_pad):  # defensive re-layout
            r2 = _act_to_nhwc(residual).reshape(rn * rh * rw, rc)
            rbuf = jnp.pad(r2, ((0, m_pad - rn * rh * rw), (0, c_pad - rc)))
        args.append(rbuf)
        in_specs.append(pl.BlockSpec((tm2, c_pad), lambda i: (i, 0)))
        kernel = functools.partial(_bn_mish_res_kernel, m_rows=m, tm=tm2,
                                   mask_rows=mask_rows)

    out = pl.pallas_call(
        kernel,
        grid=(mt2,),
        in_specs=in_specs,
        out_specs=pl.BlockSpec((tm2, c_pad), lambda i: (i, 0)),
        out_shape=jax.ShapeDtypeStruct((m_pad, c_pad), jnp.bfloat16),
        compiler_params=cparams,
    )(*args)

    return {"buf": out, "nhwc": None, "shape": (n, ho, wo, cout)}


# ----------------------- parameter construction ------------------------------

def _init_conv_params(key, cin, cout, ks):
    k1, k2, k3 = jax.random.split(key, 3)
    return {
        "w": 0.1 * jax.random.normal(k1, (cout, cin, ks, ks), jnp.float32),
        "gamma": 1.0 + 0.1 * jax.random.normal(k2, (cout,), jnp.float32),
        "beta": 0.1 * jax.random.normal(k3, (cout,), jnp.float32),
        "ks": ks,
    }


def build_darknet_params(key, blk_list, nout=32):
    """Mirrors Darknet.__init__: ConvBnAct(3, nout, 3) then res stacks."""
    layers = []
    key, sub = jax.random.split(key)
    layers.append(("conv", _init_conv_params(sub, 3, nout, 3), 1))
    for i, nb in enumerate(blk_list):
        nin = nout * 2 ** i
        key, sub = jax.random.split(key)
        # _make_res_stack: ConvBnAct(nin, nin*2, 3, s=2)
        layers.append(("conv", _init_conv_params(sub, nin, nin * 2, 3), 2))
        for _ in range(nb):
            key, s1 = jax.random.split(key)
            key, s2 = jax.random.split(key)
            # ResResidualBlock(nin*2): 1x1 (2nin->nin) then 3x3 (nin->2nin)
            layers.append(("res",
                           _init_conv_params(s1, nin * 2, nin, 1),
                           _init_conv_params(s2, nin, nin * 2, 3)))
    return layers


def darknet_forward(x_nchw, layers):
    n, c, h, w = x_nchw.shape
    act = {"buf": None,
           "nhwc": jnp.transpose(x_nchw, (0, 2, 3, 1)),   # NCHW -> NHWC
           "shape": (n, h, w, c)}
    for layer in layers:
        if layer[0] == "conv":
            _, p, stride = layer
            act = conv_bn_mish(act, p["w"], p["gamma"], p["beta"],
                               stride=stride, ks=p["ks"])
        else:  # ResResidualBlock: x + conv2(conv1(x)); residual/1x1 consume the
               # padded lane-dense buffer directly (no slice/re-pad copies).
            _, p1, p2 = layer
            hid = conv_bn_mish(act, p1["w"], p1["gamma"], p1["beta"],
                               stride=1, ks=p1["ks"])
            act = conv_bn_mish(hid, p2["w"], p2["gamma"], p2["beta"],
                               stride=1, ks=p2["ks"], residual=act)
    out_nhwc = _act_to_nhwc(act, dtype=jnp.float32)
    return jnp.transpose(out_nhwc, (0, 3, 1, 2))  # NHWC -> NCHW


if __name__ == "__main__":
    key = jax.random.PRNGKey(0)
    key, xkey = jax.random.split(key)

    # small config consistent with the module: Darknet(blk_list=[1, 1], nout=8)
    blk_list = [1, 1]
    nout = 8
    layers = build_darknet_params(key, blk_list, nout=nout)

    # input matches Conv2d(in_channels=3, ...): NCHW, batch=2, spatial=16
    x = jax.random.normal(xkey, (2, 3, 16, 16), jnp.float32)

    fwd = jax.jit(functools.partial(darknet_forward, layers=layers))
    out = fwd(x)
    jax.block_until_ready(out)

    # sanity: two stride-2 stages -> spatial /4, channels nout*2**len(blk_list)
    assert out.shape == (2, nout * 2 ** len(blk_list), 4, 4), out.shape
    assert jnp.all(jnp.isfinite(out))
    print("KERNEL_OK")
</pallas_src>

<mosaic_0001>
module attributes {stable_mosaic.version = 11 : i64} {
  func.func @_matmul_stats_kernel(%arg0: i32, %arg1: memref<256x27xbf16, #tpu.memory_space<vmem>>, %arg2: memref<27x128xbf16, #tpu.memory_space<vmem>>, %arg3: memref<256x128xbf16, #tpu.memory_space<vmem>>, %arg4: memref<1x1x128xf32, #tpu.memory_space<vmem>>, %arg5: memref<1x1x128xf32, #tpu.memory_space<vmem>>) attributes {dimension_semantics = [#tpu.dimension_semantics<parallel>], iteration_bounds = array<i64: 2>, scalar_prefetch = 0 : i64, scratch_operands = 0 : i64, tpu.core_type = #tpu.core_type<tc>, window_params = [{transform_indices = @transform_0, window_bounds = array<i64: 256, 27>}, {pipeline_mode = #tpu.pipeline_mode<synchronous>, transform_indices = @transform_1, window_bounds = array<i64: 27, 128>}, {transform_indices = @transform_2, window_bounds = array<i64: 256, 128>}, {transform_indices = @transform_3, window_bounds = array<i64: 1, 1, 128>}, {transform_indices = @transform_4, window_bounds = array<i64: 1, 1, 128>}]} {
    %c0 = arith.constant 0 : index
    %c0_0 = arith.constant 0 : index
    %0 = vector.load %arg1[%c0, %c0_0] : memref<256x27xbf16, #tpu.memory_space<vmem>>, vector<256x27xbf16>
    %c0_1 = arith.constant 0 : index
    %c0_2 = arith.constant 0 : index
    %1 = vector.load %arg2[%c0_1, %c0_2] : memref<27x128xbf16, #tpu.memory_space<vmem>>, vector<27x128xbf16>
    %cst = arith.constant dense<0.000000e+00> : vector<256x128xf32>
    %2 = tpu.matmul %0, %1, %cst {dimension_numbers = #tpu.dot_dimension_numbers<[1], [0], [0], [1], [0, 0, 1, 1], [], []>} : vector<256x27xbf16>, vector<27x128xbf16>, vector<256x128xf32> -> vector<256x128xf32>
    %3 = arith.truncf %2 : vector<256x128xf32> to vector<256x128xbf16>
    %c0_3 = arith.constant 0 : index
    %c0_4 = arith.constant 0 : index
    %4 = vector.load %arg3[%c0_3, %c0_4] : memref<256x128xbf16, #tpu.memory_space<vmem>>, vector<256x128xbf16>
    tpu.vector_store %arg3[%c0_3, %c0_4], %3 {strides = array<i32>} : memref<256x128xbf16, #tpu.memory_space<vmem>>, vector<256x128xbf16>,
    %cst_5 = arith.constant dense<0.000000e+00> : vector<128xf32>
    %5 = vector.multi_reduction <add>, %2, %cst_5 [0] : vector<256x128xf32> to vector<128xf32>
    %6 = vector.shape_cast %5 : vector<128xf32> to vector<1x128xf32>
    %7 = vector.shape_cast %6 : vector<1x128xf32> to vector<1x1x128xf32>
    %c0_6 = arith.constant 0 : index
    %c0_7 = arith.constant 0 : index
    %c0_8 = arith.constant 0 : index
    %8 = vector.load %arg4[%c0_6, %c0_7, %c0_8] : memref<1x1x128xf32, #tpu.memory_space<vmem>>, vector<1x1x128xf32>
    tpu.vector_store %arg4[%c0_6, %c0_7, %c0_8], %7 {strides = array<i32>} : memref<1x1x128xf32, #tpu.memory_space<vmem>>, vector<1x1x128xf32>,
    %9 = arith.mulf %2, %2 : vector<256x128xf32>
    %cst_9 = arith.constant dense<0.000000e+00> : vector<128xf32>
    %10 = vector.multi_reduction <add>, %9, %cst_9 [0] : vector<256x128xf32> to vector<128xf32>
    %11 = vector.shape_cast %10 : vector<128xf32> to vector<1x128xf32>
    %12 = vector.shape_cast %11 : vector<1x128xf32> to vector<1x1x128xf32>
    %c0_10 = arith.constant 0 : index
    %c0_11 = arith.constant 0 : index
    %c0_12 = arith.constant 0 : index
    %13 = vector.load %arg5[%c0_10, %c0_11, %c0_12] : memref<1x1x128xf32, #tpu.memory_space<vmem>>, vector<1x1x128xf32>
    tpu.vector_store %arg5[%c0_10, %c0_11, %c0_12], %12 {strides = array<i32>} : memref<1x1x128xf32, #tpu.memory_space<vmem>>, vector<1x1x128xf32>,
    return
  }
  func.func @transform_0(%arg0: i32) -> (i32, i32) {
    %c0_i32 = arith.constant 0 : i32
    %c0_i32_0 = arith.constant 0 : i32
    return %arg0, %c0_i32 : i32, i32
  }
  func.func @transform_1(%arg0: i32) -> (i32, i32) {
    %c0_i32 = arith.constant 0 : i32
    %c0_i32_0 = arith.constant 0 : i32
    %c0_i32_1 = arith.constant 0 : i32
    return %c0_i32, %c0_i32_0 : i32, i32
  }
  func.func @transform_2(%arg0: i32) -> (i32, i32) {
    %c0_i32 = arith.constant 0 : i32
    %c0_i32_0 = arith.constant 0 : i32
    return %arg0, %c0_i32 : i32, i32
  }
  func.func @transform_3(%arg0: i32) -> (i32, i32, i32) {
    %c0_i32 = arith.constant 0 : i32
    %c0_i32_0 = arith.constant 0 : i32
    %c0_i32_1 = arith.constant 0 : i32
    return %arg0, %c0_i32, %c0_i32_0 : i32, i32, i32
  }
  func.func @transform_4(%arg0: i32) -> (i32, i32, i32) {
    %c0_i32 = arith.constant 0 : i32
    %c0_i32_0 = arith.constant 0 : i32
    %c0_i32_1 = arith.constant 0 : i32
    return %arg0, %c0_i32, %c0_i32_0 : i32, i32, i32
  }
}

module attributes {stable_mosaic.version = 11 : i64} {
  func.func @_bn_mish_kernel(%arg0: i32, %arg1: memref<256x128xbf16, #tpu.memory_space<vmem>>, %arg2: memref<1x128xf32, #tpu.memory_space<vmem>>, %arg3: memref<1x128xf32, #tpu.memory_space<vmem>>, %arg4: memref<256x128xbf16, #tpu.memory_space<vmem>>) attributes {dimension_semantics = [#tpu.dimension_semantics<parallel>], iteration_bounds = array<i64: 2>, scalar_prefetch = 0 : i64, scratch_operands = 0 : i64, tpu.core_type = #tpu.core_type<tc>, window_params = [{transform_indices = @transform_0, window_bounds = array<i64: 256, 128>}, {pipeline_mode = #tpu.pipeline_mode<synchronous>, transform_indices = @transform_1, window_bounds = array<i64: 1, 128>}, {pipeline_mode = #tpu.pipeline_mode<synchronous>, transform_indices = @transform_2, window_bounds = array<i64: 1, 128>}, {transform_indices = @transform_3, window_bounds = array<i64: 256, 128>}]} {
    %c0 = arith.constant 0 : index
    %c0_0 = arith.constant 0 : index
    %0 = vector.load %arg1[%c0, %c0_0] : memref<256x128xbf16, #tpu.memory_space<vmem>>, vector<256x128xbf16>
    %1 = arith.extf %0 : vector<256x128xbf16> to vector<256x128xf32>
    %c0_1 = arith.constant 0 : index
    %c0_2 = arith.constant 0 : index
    %2 = vector.load %arg2[%c0_1, %c0_2] : memref<1x128xf32, #tpu.memory_space<vmem>>, vector<1x128xf32>
    %3 = vector.broadcast %2 : vector<1x128xf32> to vector<256x128xf32>
    %4 = arith.mulf %1, %3 : vector<256x128xf32>
    %c0_3 = arith.constant 0 : index
    %c0_4 = arith.constant 0 : index
    %5 = vector.load %arg3[%c0_3, %c0_4] : memref<1x128xf32, #tpu.memory_space<vmem>>, vector<1x128xf32>
    %6 = vector.broadcast %5 : vector<1x128xf32> to vector<256x128xf32>
    %7 = arith.addf %4, %6 : vector<256x128xf32>
    %cst = arith.constant 2.000000e+01 : f32
    %8 = vector.broadcast %cst : f32 to vector<256x128xf32>
    %9 = arith.minimumf %7, %8 : vector<256x128xf32>
    %10 = math.exp %9 : vector<256x128xf32>
    %cst_5 = arith.constant 1.000000e+00 : f32
    %11 = vector.broadcast %cst_5 : f32 to vector<256x128xf32>
    %12 = arith.addf %11, %10 : vector<256x128xf32>
    %13 = arith.mulf %12, %12 : vector<256x128xf32>
    %cst_6 = arith.constant 1.000000e+00 : f32
    %14 = vector.broadcast %cst_6 : f32 to vector<256x128xf32>
    %15 = arith.subf %13, %14 : vector<256x128xf32>
    %cst_7 = arith.constant 1.000000e+00 : f32
    %16 = vector.broadcast %cst_7 : f32 to vector<256x128xf32>
    %17 = arith.addf %13, %16 : vector<256x128xf32>
    %18 = tpu.reciprocal %17 {approx = true} : vector<256x128xf32> -> vector<256x128xf32>
    %19 = arith.mulf %15, %18 : vector<256x128xf32>
    %cst_8 = arith.constant 2.000000e+01 : f32
    %20 = vector.broadcast %cst_8 : f32 to vector<256x128xf32>
    %21 = arith.cmpf ogt, %7, %20 : vector<256x128xf32>
    %22 = arith.mulf %7, %19 : vector<256x128xf32>
    %23 = arith.select %21, %7, %22 : vector<256x128xi1>, vector<256x128xf32>
    %24 = arith.truncf %23 : vector<256x128xf32> to vector<256x128xbf16>
    %c0_9 = arith.constant 0 : index
    %c0_10 = arith.constant 0 : index
    %25 = vector.load %arg4[%c0_9, %c0_10] : memref<256x128xbf16, #tpu.memory_space<vmem>>, vector<256x128xbf16>
    tpu.vector_store %arg4[%c0_9, %c0_10], %24 {strides = array<i32>} : memref<256x128xbf16, #tpu.memory_space<vmem>>, vector<256x128xbf16>,
    return
  }
  func.func @transform_0(%arg0: i32) -> (i32, i32) {
    %c0_i32 = arith.constant 0 : i32
    %c0_i32_0 = arith.constant 0 : i32
    return %arg0, %c0_i32 : i32, i32
  }
  func.func @transform_1(%arg0: i32) -> (i32, i32) {
    %c0_i32 = arith.constant 0 : i32
    %c0_i32_0 = arith.constant 0 : i32
    %c0_i32_1 = arith.constant 0 : i32
    return %c0_i32, %c0_i32_0 : i32, i32
  }
  func.func @transform_2(%arg0: i32) -> (i32, i32) {
    %c0_i32 = arith.constant 0 : i32
    %c0_i32_0 = arith.constant 0 : i32
    %c0_i32_1 = arith.constant 0 : i32
    return %c0_i32, %c0_i32_0 : i32, i32
  }
  func.func @transform_3(%arg0: i32) -> (i32, i32) {
    %c0_i32 = arith.constant 0 : i32
    %c0_i32_0 = arith.constant 0 : i32
    return %arg0, %c0_i32 : i32, i32
  }
}

module attributes {stable_mosaic.version = 11 : i64} {
  func.func @_matmul_stats_kernel(%arg0: i32, %arg1: memref<64x72xbf16, #tpu.memory_space<vmem>>, %arg2: memref<72x128xbf16, #tpu.memory_space<vmem>>, %arg3: memref<64x128xbf16, #tpu.memory_space<vmem>>, %arg4: memref<1x1x128xf32, #tpu.memory_space<vmem>>, %arg5: memref<1x1x128xf32, #tpu.memory_space<vmem>>) attributes {dimension_semantics = [#tpu.dimension_semantics<parallel>], iteration_bounds = array<i64: 2>, scalar_prefetch = 0 : i64, scratch_operands = 0 : i64, tpu.core_type = #tpu.core_type<tc>, window_params = [{transform_indices = @transform_0, window_bounds = array<i64: 64, 72>}, {pipeline_mode = #tpu.pipeline_mode<synchronous>, transform_indices = @transform_1, window_bounds = array<i64: 72, 128>}, {transform_indices = @transform_2, window_bounds = array<i64: 64, 128>}, {transform_indices = @transform_3, window_bounds = array<i64: 1, 1, 128>}, {transform_indices = @transform_4, window_bounds = array<i64: 1, 1, 128>}]} {
    %c0 = arith.constant 0 : index
    %c0_0 = arith.constant 0 : index
    %0 = vector.load %arg1[%c0, %c0_0] : memref<64x72xbf16, #tpu.memory_space<vmem>>, vector<64x72xbf16>
    %c0_1 = arith.constant 0 : index
    %c0_2 = arith.constant 0 : index
    %1 = vector.load %arg2[%c0_1, %c0_2] : memref<72x128xbf16, #tpu.memory_space<vmem>>, vector<72x128xbf16>
    %cst = arith.constant dense<0.000000e+00> : vector<64x128xf32>
    %2 = tpu.matmul %0, %1, %cst {dimension_numbers = #tpu.dot_dimension_numbers<[1], [0], [0], [1], [0, 0, 1, 1], [], []>} : vector<64x72xbf16>, vector<72x128xbf16>, vector<64x128xf32> -> vector<64x128xf32>
    %3 = arith.truncf %2 : vector<64x128xf32> to vector<64x128xbf16>
    %c0_3 = arith.constant 0 : index
    %c0_4 = arith.constant 0 : index
    %4 = vector.load %arg3[%c0_3, %c0_4] : memref<64x128xbf16, #tpu.memory_space<vmem>>, vector<64x128xbf16>
    tpu.vector_store %arg3[%c0_3, %c0_4], %3 {strides = array<i32>} : memref<64x128xbf16, #tpu.memory_space<vmem>>, vector<64x128xbf16>,
    %cst_5 = arith.constant dense<0.000000e+00> : vector<128xf32>
    %5 = vector.multi_reduction <add>, %2, %cst_5 [0] : vector<64x128xf32> to vector<128xf32>
    %6 = vector.shape_cast %5 : vector<128xf32> to vector<1x128xf32>
    %7 = vector.shape_cast %6 : vector<1x128xf32> to vector<1x1x128xf32>
    %c0_6 = arith.constant 0 : index
    %c0_7 = arith.constant 0 : index
    %c0_8 = arith.constant 0 : index
    %8 = vector.load %arg4[%c0_6, %c0_7, %c0_8] : memref<1x1x128xf32, #tpu.memory_space<vmem>>, vector<1x1x128xf32>
    tpu.vector_store %arg4[%c0_6, %c0_7, %c0_8], %7 {strides = array<i32>} : memref<1x1x128xf32, #tpu.memory_space<vmem>>, vector<1x1x128xf32>,
    %9 = arith.mulf %2, %2 : vector<64x128xf32>
    %cst_9 = arith.constant dense<0.000000e+00> : vector<128xf32>
    %10 = vector.multi_reduction <add>, %9, %cst_9 [0] : vector<64x128xf32> to vector<128xf32>
    %11 = vector.shape_cast %10 : vector<128xf32> to vector<1x128xf32>
    %12 = vector.shape_cast %11 : vector<1x128xf32> to vector<1x1x128xf32>
    %c0_10 = arith.constant 0 : index
    %c0_11 = arith.constant 0 : index
    %c0_12 = arith.constant 0 : index
    %13 = vector.load %arg5[%c0_10, %c0_11, %c0_12] : memref<1x1x128xf32, #tpu.memory_space<vmem>>, vector<1x1x128xf32>
    tpu.vector_store %arg5[%c0_10, %c0_11, %c0_12], %12 {strides = array<i32>} : memref<1x1x128xf32, #tpu.memory_space<vmem>>, vector<1x1x128xf32>,
    return
  }
  func.func @transform_0(%arg0: i32) -> (i32, i32) {
    %c0_i32 = arith.constant 0 : i32
    %c0_i32_0 = arith.constant 0 : i32
    return %arg0, %c0_i32 : i32, i32
  }
  func.func @transform_1(%arg0: i32) -> (i32, i32) {
    %c0_i32 = arith.constant 0 : i32
    %c0_i32_0 = arith.constant 0 : i32
    %c0_i32_1 = arith.constant 0 : i32
    return %c0_i32, %c0_i32_0 : i32, i32
  }
  func.func @transform_2(%arg0: i32) -> (i32, i32) {
    %c0_i32 = arith.constant 0 : i32
    %c0_i32_0 = arith.constant 0 : i32
    return %arg0, %c0_i32 : i32, i32
  }
  func.func @transform_3(%arg0: i32) -> (i32, i32, i32) {
    %c0_i32 = arith.constant 0 : i32
    %c0_i32_0 = arith.constant 0 : i32
    %c0_i32_1 = arith.constant 0 : i32
    return %arg0, %c0_i32, %c0_i32_0 : i32, i32, i32
  }
  func.func @transform_4(%arg0: i32) -> (i32, i32, i32) {
    %c0_i32 = arith.constant 0 : i32
    %c0_i32_0 = arith.constant 0 : i32
    %c0_i32_1 = arith.constant 0 : i32
    return %arg0, %c0_i32, %c0_i32_0 : i32, i32, i32
  }
}

module attributes {stable_mosaic.version = 11 : i64} {
  func.func @_bn_mish_kernel(%arg0: i32, %arg1: memref<64x128xbf16, #tpu.memory_space<vmem>>, %arg2: memref<1x128xf32, #tpu.memory_space<vmem>>, %arg3: memref<1x128xf32, #tpu.memory_space<vmem>>, %arg4: memref<64x128xbf16, #tpu.memory_space<vmem>>) attributes {dimension_semantics = [#tpu.dimension_semantics<parallel>], iteration_bounds = array<i64: 2>, scalar_prefetch = 0 : i64, scratch_operands = 0 : i64, tpu.core_type = #tpu.core_type<tc>, window_params = [{transform_indices = @transform_0, window_bounds = array<i64: 64, 128>}, {pipeline_mode = #tpu.pipeline_mode<synchronous>, transform_indices = @transform_1, window_bounds = array<i64: 1, 128>}, {pipeline_mode = #tpu.pipeline_mode<synchronous>, transform_indices = @transform_2, window_bounds = array<i64: 1, 128>}, {transform_indices = @transform_3, window_bounds = array<i64: 64, 128>}]} {
    %c0 = arith.constant 0 : index
    %c0_0 = arith.constant 0 : index
    %0 = vector.load %arg1[%c0, %c0_0] : memref<64x128xbf16, #tpu.memory_space<vmem>>, vector<64x128xbf16>
    %1 = arith.extf %0 : vector<64x128xbf16> to vector<64x128xf32>
    %c0_1 = arith.constant 0 : index
    %c0_2 = arith.constant 0 : index
    %2 = vector.load %arg2[%c0_1, %c0_2] : memref<1x128xf32, #tpu.memory_space<vmem>>, vector<1x128xf32>
    %3 = vector.broadcast %2 : vector<1x128xf32> to vector<64x128xf32>
    %4 = arith.mulf %1, %3 : vector<64x128xf32>
    %c0_3 = arith.constant 0 : index
    %c0_4 = arith.constant 0 : index
    %5 = vector.load %arg3[%c0_3, %c0_4] : memref<1x128xf32, #tpu.memory_space<vmem>>, vector<1x128xf32>
    %6 = vector.broadcast %5 : vector<1x128xf32> to vector<64x128xf32>
    %7 = arith.addf %4, %6 : vector<64x128xf32>
    %cst = arith.constant 2.000000e+01 : f32
    %8 = vector.broadcast %cst : f32 to vector<64x128xf32>
    %9 = arith.minimumf %7, %8 : vector<64x128xf32>
    %10 = math.exp %9 : vector<64x128xf32>
    %cst_5 = arith.constant 1.000000e+00 : f32
    %11 = vector.broadcast %cst_5 : f32 to vector<64x128xf32>
    %12 = arith.addf %11, %10 : vector<64x128xf32>
    %13 = arith.mulf %12, %12 : vector<64x128xf32>
    %cst_6 = arith.constant 1.000000e+00 : f32
    %14 = vector.broadcast %cst_6 : f32 to vector<64x128xf32>
    %15 = arith.subf %13, %14 : vector<64x128xf32>
    %cst_7 = arith.constant 1.000000e+00 : f32
    %16 = vector.broadcast %cst_7 : f32 to vector<64x128xf32>
    %17 = arith.addf %13, %16 : vector<64x128xf32>
    %18 = tpu.reciprocal %17 {approx = true} : vector<64x128xf32> -> vector<64x128xf32>
    %19 = arith.mulf %15, %18 : vector<64x128xf32>
    %cst_8 = arith.constant 2.000000e+01 : f32
    %20 = vector.broadcast %cst_8 : f32 to vector<64x128xf32>
    %21 = arith.cmpf ogt, %7, %20 : vector<64x128xf32>
    %22 = arith.mulf %7, %19 : vector<64x128xf32>
    %23 = arith.select %21, %7, %22 : vector<64x128xi1>, vector<64x128xf32>
    %24 = arith.truncf %23 : vector<64x128xf32> to vector<64x128xbf16>
    %c0_9 = arith.constant 0 : index
    %c0_10 = arith.constant 0 : index
    %25 = vector.load %arg4[%c0_9, %c0_10] : memref<64x128xbf16, #tpu.memory_space<vmem>>, vector<64x128xbf16>
    tpu.vector_store %arg4[%c0_9, %c0_10], %24 {strides = array<i32>} : memref<64x128xbf16, #tpu.memory_space<vmem>>, vector<64x128xbf16>,
    return
  }
  func.func @transform_0(%arg0: i32) -> (i32, i32) {
    %c0_i32 = arith.constant 0 : i32
    %c0_i32_0 = arith.constant 0 : i32
    return %arg0, %c0_i32 : i32, i32
  }
  func.func @transform_1(%arg0: i32) -> (i32, i32) {
    %c0_i32 = arith.constant 0 : i32
    %c0_i32_0 = arith.constant 0 : i32
    %c0_i32_1 = arith.constant 0 : i32
    return %c0_i32, %c0_i32_0 : i32, i32
  }
  func.func @transform_2(%arg0: i32) -> (i32, i32) {
    %c0_i32 = arith.constant 0 : i32
    %c0_i32_0 = arith.constant 0 : i32
    %c0_i32_1 = arith.constant 0 : i32
    return %c0_i32, %c0_i32_0 : i32, i32
  }
  func.func @transform_3(%arg0: i32) -> (i32, i32) {
    %c0_i32 = arith.constant 0 : i32
    %c0_i32_0 = arith.constant 0 : i32
    return %arg0, %c0_i32 : i32, i32
  }
}

module attributes {stable_mosaic.version = 11 : i64} {
  func.func @_matmul_stats_kernel(%arg0: i32, %arg1: memref<64x128xbf16, #tpu.memory_space<vmem>>, %arg2: memref<128x128xbf16, #tpu.memory_space<vmem>>, %arg3: memref<64x128xbf16, #tpu.memory_space<vmem>>, %arg4: memref<1x1x128xf32, #tpu.memory_space<vmem>>, %arg5: memref<1x1x128xf32, #tpu.memory_space<vmem>>) attributes {dimension_semantics = [#tpu.dimension_semantics<parallel>], iteration_bounds = array<i64: 2>, scalar_prefetch = 0 : i64, scratch_operands = 0 : i64, tpu.core_type = #tpu.core_type<tc>, window_params = [{transform_indices = @transform_0, window_bounds = array<i64: 64, 128>}, {pipeline_mode = #tpu.pipeline_mode<synchronous>, transform_indices = @transform_1, window_bounds = array<i64: 128, 128>}, {transform_indices = @transform_2, window_bounds = array<i64: 64, 128>}, {transform_indices = @transform_3, window_bounds = array<i64: 1, 1, 128>}, {transform_indices = @transform_4, window_bounds = array<i64: 1, 1, 128>}]} {
    %c0 = arith.constant 0 : index
    %c0_0 = arith.constant 0 : index
    %0 = vector.load %arg1[%c0, %c0_0] : memref<64x128xbf16, #tpu.memory_space<vmem>>, vector<64x128xbf16>
    %c0_1 = arith.constant 0 : index
    %c0_2 = arith.constant 0 : index
    %1 = vector.load %arg2[%c0_1, %c0_2] : memref<128x128xbf16, #tpu.memory_space<vmem>>, vector<128x128xbf16>
    %cst = arith.constant dense<0.000000e+00> : vector<64x128xf32>
    %2 = tpu.matmul %0, %1, %cst {dimension_numbers = #tpu.dot_dimension_numbers<[1], [0], [0], [1], [0, 0, 1, 1], [], []>} : vector<64x128xbf16>, vector<128x128xbf16>, vector<64x128xf32> -> vector<64x128xf32>
    %3 = arith.truncf %2 : vector<64x128xf32> to vector<64x128xbf16>
    %c0_3 = arith.constant 0 : index
    %c0_4 = arith.constant 0 : index
    %4 = vector.load %arg3[%c0_3, %c0_4] : memref<64x128xbf16, #tpu.memory_space<vmem>>, vector<64x128xbf16>
    tpu.vector_store %arg3[%c0_3, %c0_4], %3 {strides = array<i32>} : memref<64x128xbf16, #tpu.memory_space<vmem>>, vector<64x128xbf16>,
    %cst_5 = arith.constant dense<0.000000e+00> : vector<128xf32>
    %5 = vector.multi_reduction <add>, %2, %cst_5 [0] : vector<64x128xf32> to vector<128xf32>
    %6 = vector.shape_cast %5 : vector<128xf32> to vector<1x128xf32>
    %7 = vector.shape_cast %6 : vector<1x128xf32> to vector<1x1x128xf32>
    %c0_6 = arith.constant 0 : index
    %c0_7 = arith.constant 0 : index
    %c0_8 = arith.constant 0 : index
    %8 = vector.load %arg4[%c0_6, %c0_7, %c0_8] : memref<1x1x128xf32, #tpu.memory_space<vmem>>, vector<1x1x128xf32>
    tpu.vector_store %arg4[%c0_6, %c0_7, %c0_8], %7 {strides = array<i32>} : memref<1x1x128xf32, #tpu.memory_space<vmem>>, vector<1x1x128xf32>,
    %9 = arith.mulf %2, %2 : vector<64x128xf32>
    %cst_9 = arith.constant dense<0.000000e+00> : vector<128xf32>
    %10 = vector.multi_reduction <add>, %9, %cst_9 [0] : vector<64x128xf32> to vector<128xf32>
    %11 = vector.shape_cast %10 : vector<128xf32> to vector<1x128xf32>
    %12 = vector.shape_cast %11 : vector<1x128xf32> to vector<1x1x128xf32>
    %c0_10 = arith.constant 0 : index
    %c0_11 = arith.constant 0 : index
    %c0_12 = arith.constant 0 : index
    %13 = vector.load %arg5[%c0_10, %c0_11, %c0_12] : memref<1x1x128xf32, #tpu.memory_space<vmem>>, vector<1x1x128xf32>
    tpu.vector_store %arg5[%c0_10, %c0_11, %c0_12], %12 {strides = array<i32>} : memref<1x1x128xf32, #tpu.memory_space<vmem>>, vector<1x1x128xf32>,
    return
  }
  func.func @transform_0(%arg0: i32) -> (i32, i32) {
    %c0_i32 = arith.constant 0 : i32
    %c0_i32_0 = arith.constant 0 : i32
    return %arg0, %c0_i32 : i32, i32
  }
  func.func @transform_1(%arg0: i32) -> (i32, i32) {
    %c0_i32 = arith.constant 0 : i32
    %c0_i32_0 = arith.constant 0 : i32
    %c0_i32_1 = arith.constant 0 : i32
    return %c0_i32, %c0_i32_0 : i32, i32
  }
  func.func @transform_2(%arg0: i32) -> (i32, i32) {
    %c0_i32 = arith.constant 0 : i32
    %c0_i32_0 = arith.constant 0 : i32
    return %arg0, %c0_i32 : i32, i32
  }
  func.func @transform_3(%arg0: i32) -> (i32, i32, i32) {
    %c0_i32 = arith.constant 0 : i32
    %c0_i32_0 = arith.constant 0 : i32
    %c0_i32_1 = arith.constant 0 : i32
    return %arg0, %c0_i32, %c0_i32_0 : i32, i32, i32
  }
  func.func @transform_4(%arg0: i32) -> (i32, i32, i32) {
    %c0_i32 = arith.constant 0 : i32
    %c0_i32_0 = arith.constant 0 : i32
    %c0_i32_1 = arith.constant 0 : i32
    return %arg0, %c0_i32, %c0_i32_0 : i32, i32, i32
  }
}

module attributes {stable_mosaic.version = 11 : i64} {
  func.func @_bn_mish_res_kernel(%arg0: i32, %arg1: memref<64x128xbf16, #tpu.memory_space<vmem>>, %arg2: memref<1x128xf32, #tpu.memory_space<vmem>>, %arg3: memref<1x128xf32, #tpu.memory_space<vmem>>, %arg4: memref<64x128xbf16, #tpu.memory_space<vmem>>, %arg5: memref<64x128xbf16, #tpu.memory_space<vmem>>) attributes {dimension_semantics = [#tpu.dimension_semantics<parallel>], iteration_bounds = array<i64: 2>, scalar_prefetch = 0 : i64, scratch_operands = 0 : i64, tpu.core_type = #tpu.core_type<tc>, window_params = [{transform_indices = @transform_0, window_bounds = array<i64: 64, 128>}, {pipeline_mode = #tpu.pipeline_mode<synchronous>, transform_indices = @transform_1, window_bounds = array<i64: 1, 128>}, {pipeline_mode = #tpu.pipeline_mode<synchronous>, transform_indices = @transform_2, window_bounds = array<i64: 1, 128>}, {transform_indices = @transform_3, window_bounds = array<i64: 64, 128>}, {transform_indices = @transform_4, window_bounds = array<i64: 64, 128>}]} {
    %c0 = arith.constant 0 : index
    %c0_0 = arith.constant 0 : index
    %0 = vector.load %arg4[%c0, %c0_0] : memref<64x128xbf16, #tpu.memory_space<vmem>>, vector<64x128xbf16>
    %1 = arith.extf %0 : vector<64x128xbf16> to vector<64x128xf32>
    %c0_1 = arith.constant 0 : index
    %c0_2 = arith.constant 0 : index
    %2 = vector.load %arg1[%c0_1, %c0_2] : memref<64x128xbf16, #tpu.memory_space<vmem>>, vector<64x128xbf16>
    %3 = arith.extf %2 : vector<64x128xbf16> to vector<64x128xf32>
    %c0_3 = arith.constant 0 : index
    %c0_4 = arith.constant 0 : index
    %4 = vector.load %arg2[%c0_3, %c0_4] : memref<1x128xf32, #tpu.memory_space<vmem>>, vector<1x128xf32>
    %5 = vector.broadcast %4 : vector<1x128xf32> to vector<64x128xf32>
    %6 = arith.mulf %3, %5 : vector<64x128xf32>
    %c0_5 = arith.constant 0 : index
    %c0_6 = arith.constant 0 : index
    %7 = vector.load %arg3[%c0_5, %c0_6] : memref<1x128xf32, #tpu.memory_space<vmem>>, vector<1x128xf32>
    %8 = vector.broadcast %7 : vector<1x128xf32> to vector<64x128xf32>
    %9 = arith.addf %6, %8 : vector<64x128xf32>
    %cst = arith.constant 2.000000e+01 : f32
    %10 = vector.broadcast %cst : f32 to vector<64x128xf32>
    %11 = arith.minimumf %9, %10 : vector<64x128xf32>
    %12 = math.exp %11 : vector<64x128xf32>
    %cst_7 = arith.constant 1.000000e+00 : f32
    %13 = vector.broadcast %cst_7 : f32 to vector<64x128xf32>
    %14 = arith.addf %13, %12 : vector<64x128xf32>
    %15 = arith.mulf %14, %14 : vector<64x128xf32>
    %cst_8 = arith.constant 1.000000e+00 : f32
    %16 = vector.broadcast %cst_8 : f32 to vector<64x128xf32>
    %17 = arith.subf %15, %16 : vector<64x128xf32>
    %cst_9 = arith.constant 1.000000e+00 : f32
    %18 = vector.broadcast %cst_9 : f32 to vector<64x128xf32>
    %19 = arith.addf %15, %18 : vector<64x128xf32>
    %20 = tpu.reciprocal %19 {approx = true} : vector<64x128xf32> -> vector<64x128xf32>
    %21 = arith.mulf %17, %20 : vector<64x128xf32>
    %cst_10 = arith.constant 2.000000e+01 : f32
    %22 = vector.broadcast %cst_10 : f32 to vector<64x128xf32>
    %23 = arith.cmpf ogt, %9, %22 : vector<64x128xf32>
    %24 = arith.mulf %9, %21 : vector<64x128xf32>
    %25 = arith.select %23, %9, %24 : vector<64x128xi1>, vector<64x128xf32>
    %26 = arith.addf %1, %25 : vector<64x128xf32>
    %27 = arith.truncf %26 : vector<64x128xf32> to vector<64x128xbf16>
    %c0_11 = arith.constant 0 : index
    %c0_12 = arith.constant 0 : index
    %28 = vector.load %arg5[%c0_11, %c0_12] : memref<64x128xbf16, #tpu.memory_space<vmem>>, vector<64x128xbf16>
    tpu.vector_store %arg5[%c0_11, %c0_12], %27 {strides = array<i32>} : memref<64x128xbf16, #tpu.memory_space<vmem>>, vector<64x128xbf16>,
    return
  }
  func.func @transform_0(%arg0: i32) -> (i32, i32) {
    %c0_i32 = arith.constant 0 : i32
    %c0_i32_0 = arith.constant 0 : i32
    return %arg0, %c0_i32 : i32, i32
  }
  func.func @transform_1(%arg0: i32) -> (i32, i32) {
    %c0_i32 = arith.constant 0 : i32
    %c0_i32_0 = arith.constant 0 : i32
    %c0_i32_1 = arith.constant 0 : i32
    return %c0_i32, %c0_i32_0 : i32, i32
  }
  func.func @transform_2(%arg0: i32) -> (i32, i32) {
    %c0_i32 = arith.constant 0 : i32
    %c0_i32_0 = arith.constant 0 : i32
    %c0_i32_1 = arith.constant 0 : i32
    return %c0_i32, %c0_i32_0 : i32, i32
  }
  func.func @transform_3(%arg0: i32) -> (i32, i32) {
    %c0_i32 = arith.constant 0 : i32
    %c0_i32_0 = arith.constant 0 : i32
    return %arg0, %c0_i32 : i32, i32
  }
  func.func @transform_4(%arg0: i32) -> (i32, i32) {
    %c0_i32 = arith.constant 0 : i32
    %c0_i32_0 = arith.constant 0 : i32
    return %arg0, %c0_i32 : i32, i32
  }
}

module attributes {stable_mosaic.version = 11 : i64} {
  func.func @_matmul_stats_kernel(%arg0: i32, %arg1: memref<16x144xbf16, #tpu.memory_space<vmem>>, %arg2: memref<144x128xbf16, #tpu.memory_space<vmem>>, %arg3: memref<16x128xbf16, #tpu.memory_space<vmem>>, %arg4: memref<1x1x128xf32, #tpu.memory_space<vmem>>, %arg5: memref<1x1x128xf32, #tpu.memory_space<vmem>>) attributes {dimension_semantics = [#tpu.dimension_semantics<parallel>], iteration_bounds = array<i64: 2>, scalar_prefetch = 0 : i64, scratch_operands = 0 : i64, tpu.core_type = #tpu.core_type<tc>, window_params = [{transform_indices = @transform_0, window_bounds = array<i64: 16, 144>}, {pipeline_mode = #tpu.pipeline_mode<synchronous>, transform_indices = @transform_1, window_bounds = array<i64: 144, 128>}, {transform_indices = @transform_2, window_bounds = array<i64: 16, 128>}, {transform_indices = @transform_3, window_bounds = array<i64: 1, 1, 128>}, {transform_indices = @transform_4, window_bounds = array<i64: 1, 1, 128>}]} {
    %c0 = arith.constant 0 : index
    %c0_0 = arith.constant 0 : index
    %0 = vector.load %arg1[%c0, %c0_0] : memref<16x144xbf16, #tpu.memory_space<vmem>>, vector<16x144xbf16>
    %c0_1 = arith.constant 0 : index
    %c0_2 = arith.constant 0 : index
    %1 = vector.load %arg2[%c0_1, %c0_2] : memref<144x128xbf16, #tpu.memory_space<vmem>>, vector<144x128xbf16>
    %cst = arith.constant dense<0.000000e+00> : vector<16x128xf32>
    %2 = tpu.matmul %0, %1, %cst {dimension_numbers = #tpu.dot_dimension_numbers<[1], [0], [0], [1], [0, 0, 1, 1], [], []>} : vector<16x144xbf16>, vector<144x128xbf16>, vector<16x128xf32> -> vector<16x128xf32>
    %3 = arith.truncf %2 : vector<16x128xf32> to vector<16x128xbf16>
    %c0_3 = arith.constant 0 : index
    %c0_4 = arith.constant 0 : index
    %4 = vector.load %arg3[%c0_3, %c0_4] : memref<16x128xbf16, #tpu.memory_space<vmem>>, vector<16x128xbf16>
    tpu.vector_store %arg3[%c0_3, %c0_4], %3 {strides = array<i32>} : memref<16x128xbf16, #tpu.memory_space<vmem>>, vector<16x128xbf16>,
    %cst_5 = arith.constant dense<0.000000e+00> : vector<128xf32>
    %5 = vector.multi_reduction <add>, %2, %cst_5 [0] : vector<16x128xf32> to vector<128xf32>
    %6 = vector.shape_cast %5 : vector<128xf32> to vector<1x128xf32>
    %7 = vector.shape_cast %6 : vector<1x128xf32> to vector<1x1x128xf32>
    %c0_6 = arith.constant 0 : index
    %c0_7 = arith.constant 0 : index
    %c0_8 = arith.constant 0 : index
    %8 = vector.load %arg4[%c0_6, %c0_7, %c0_8] : memref<1x1x128xf32, #tpu.memory_space<vmem>>, vector<1x1x128xf32>
    tpu.vector_store %arg4[%c0_6, %c0_7, %c0_8], %7 {strides = array<i32>} : memref<1x1x128xf32, #tpu.memory_space<vmem>>, vector<1x1x128xf32>,
    %9 = arith.mulf %2, %2 : vector<16x128xf32>
    %cst_9 = arith.constant dense<0.000000e+00> : vector<128xf32>
    %10 = vector.multi_reduction <add>, %9, %cst_9 [0] : vector<16x128xf32> to vector<128xf32>
    %11 = vector.shape_cast %10 : vector<128xf32> to vector<1x128xf32>
    %12 = vector.shape_cast %11 : vector<1x128xf32> to vector<1x1x128xf32>
    %c0_10 = arith.constant 0 : index
    %c0_11 = arith.constant 0 : index
    %c0_12 = arith.constant 0 : index
    %13 = vector.load %arg5[%c0_10, %c0_11, %c0_12] : memref<1x1x128xf32, #tpu.memory_space<vmem>>, vector<1x1x128xf32>
    tpu.vector_store %arg5[%c0_10, %c0_11, %c0_12], %12 {strides = array<i32>} : memref<1x1x128xf32, #tpu.memory_space<vmem>>, vector<1x1x128xf32>,
    return
  }
  func.func @transform_0(%arg0: i32) -> (i32, i32) {
    %c0_i32 = arith.constant 0 : i32
    %c0_i32_0 = arith.constant 0 : i32
    return %arg0, %c0_i32 : i32, i32
  }
  func.func @transform_1(%arg0: i32) -> (i32, i32) {
    %c0_i32 = arith.constant 0 : i32
    %c0_i32_0 = arith.constant 0 : i32
    %c0_i32_1 = arith.constant 0 : i32
    return %c0_i32, %c0_i32_0 : i32, i32
  }
  func.func @transform_2(%arg0: i32) -> (i32, i32) {
    %c0_i32 = arith.constant 0 : i32
    %c0_i32_0 = arith.constant 0 : i32
    return %arg0, %c0_i32 : i32, i32
  }
  func.func @transform_3(%arg0: i32) -> (i32, i32, i32) {
    %c0_i32 = arith.constant 0 : i32
    %c0_i32_0 = arith.constant 0 : i32
    %c0_i32_1 = arith.constant 0 : i32
    return %arg0, %c0_i32, %c0_i32_0 : i32, i32, i32
  }
  func.func @transform_4(%arg0: i32) -> (i32, i32, i32) {
    %c0_i32 = arith.constant 0 : i32
    %c0_i32_0 = arith.constant 0 : i32
    %c0_i32_1 = arith.constant 0 : i32
    return %arg0, %c0_i32, %c0_i32_0 : i32, i32, i32
  }
}

module attributes {stable_mosaic.version = 11 : i64} {
  func.func @_bn_mish_kernel(%arg0: i32, %arg1: memref<16x128xbf16, #tpu.memory_space<vmem>>, %arg2: memref<1x128xf32, #tpu.memory_space<vmem>>, %arg3: memref<1x128xf32, #tpu.memory_space<vmem>>, %arg4: memref<16x128xbf16, #tpu.memory_space<vmem>>) attributes {dimension_semantics = [#tpu.dimension_semantics<parallel>], iteration_bounds = array<i64: 2>, scalar_prefetch = 0 : i64, scratch_operands = 0 : i64, tpu.core_type = #tpu.core_type<tc>, window_params = [{transform_indices = @transform_0, window_bounds = array<i64: 16, 128>}, {pipeline_mode = #tpu.pipeline_mode<synchronous>, transform_indices = @transform_1, window_bounds = array<i64: 1, 128>}, {pipeline_mode = #tpu.pipeline_mode<synchronous>, transform_indices = @transform_2, window_bounds = array<i64: 1, 128>}, {transform_indices = @transform_3, window_bounds = array<i64: 16, 128>}]} {
    %c0 = arith.constant 0 : index
    %c0_0 = arith.constant 0 : index
    %0 = vector.load %arg1[%c0, %c0_0] : memref<16x128xbf16, #tpu.memory_space<vmem>>, vector<16x128xbf16>
    %1 = arith.extf %0 : vector<16x128xbf16> to vector<16x128xf32>
    %c0_1 = arith.constant 0 : index
    %c0_2 = arith.constant 0 : index
    %2 = vector.load %arg2[%c0_1, %c0_2] : memref<1x128xf32, #tpu.memory_space<vmem>>, vector<1x128xf32>
    %3 = vector.broadcast %2 : vector<1x128xf32> to vector<16x128xf32>
    %4 = arith.mulf %1, %3 : vector<16x128xf32>
    %c0_3 = arith.constant 0 : index
    %c0_4 = arith.constant 0 : index
    %5 = vector.load %arg3[%c0_3, %c0_4] : memref<1x128xf32, #tpu.memory_space<vmem>>, vector<1x128xf32>
    %6 = vector.broadcast %5 : vector<1x128xf32> to vector<16x128xf32>
    %7 = arith.addf %4, %6 : vector<16x128xf32>
    %cst = arith.constant 2.000000e+01 : f32
    %8 = vector.broadcast %cst : f32 to vector<16x128xf32>
    %9 = arith.minimumf %7, %8 : vector<16x128xf32>
    %10 = math.exp %9 : vector<16x128xf32>
    %cst_5 = arith.constant 1.000000e+00 : f32
    %11 = vector.broadcast %cst_5 : f32 to vector<16x128xf32>
    %12 = arith.addf %11, %10 : vector<16x128xf32>
    %13 = arith.mulf %12, %12 : vector<16x128xf32>
    %cst_6 = arith.constant 1.000000e+00 : f32
    %14 = vector.broadcast %cst_6 : f32 to vector<16x128xf32>
    %15 = arith.subf %13, %14 : vector<16x128xf32>
    %cst_7 = arith.constant 1.000000e+00 : f32
    %16 = vector.broadcast %cst_7 : f32 to vector<16x128xf32>
    %17 = arith.addf %13, %16 : vector<16x128xf32>
    %18 = tpu.reciprocal %17 {approx = true} : vector<16x128xf32> -> vector<16x128xf32>
    %19 = arith.mulf %15, %18 : vector<16x128xf32>
    %cst_8 = arith.constant 2.000000e+01 : f32
    %20 = vector.broadcast %cst_8 : f32 to vector<16x128xf32>
    %21 = arith.cmpf ogt, %7, %20 : vector<16x128xf32>
    %22 = arith.mulf %7, %19 : vector<16x128xf32>
    %23 = arith.select %21, %7, %22 : vector<16x128xi1>, vector<16x128xf32>
    %24 = arith.truncf %23 : vector<16x128xf32> to vector<16x128xbf16>
    %c0_9 = arith.constant 0 : index
    %c0_10 = arith.constant 0 : index
    %25 = vector.load %arg4[%c0_9, %c0_10] : memref<16x128xbf16, #tpu.memory_space<vmem>>, vector<16x128xbf16>
    tpu.vector_store %arg4[%c0_9, %c0_10], %24 {strides = array<i32>} : memref<16x128xbf16, #tpu.memory_space<vmem>>, vector<16x128xbf16>,
    return
  }
  func.func @transform_0(%arg0: i32) -> (i32, i32) {
    %c0_i32 = arith.constant 0 : i32
    %c0_i32_0 = arith.constant 0 : i32
    return %arg0, %c0_i32 : i32, i32
  }
  func.func @transform_1(%arg0: i32) -> (i32, i32) {
    %c0_i32 = arith.constant 0 : i32
    %c0_i32_0 = arith.constant 0 : i32
    %c0_i32_1 = arith.constant 0 : i32
    return %c0_i32, %c0_i32_0 : i32, i32
  }
  func.func @transform_2(%arg0: i32) -> (i32, i32) {
    %c0_i32 = arith.constant 0 : i32
    %c0_i32_0 = arith.constant 0 : i32
    %c0_i32_1 = arith.constant 0 : i32
    return %c0_i32, %c0_i32_0 : i32, i32
  }
  func.func @transform_3(%arg0: i32) -> (i32, i32) {
    %c0_i32 = arith.constant 0 : i32
    %c0_i32_0 = arith.constant 0 : i32
    return %arg0, %c0_i32 : i32, i32
  }
}

module attributes {stable_mosaic.version = 11 : i64} {
  func.func @_matmul_stats_kernel(%arg0: i32, %arg1: memref<16x128xbf16, #tpu.memory_space<vmem>>, %arg2: memref<128x128xbf16, #tpu.memory_space<vmem>>, %arg3: memref<16x128xbf16, #tpu.memory_space<vmem>>, %arg4: memref<1x1x128xf32, #tpu.memory_space<vmem>>, %arg5: memref<1x1x128xf32, #tpu.memory_space<vmem>>) attributes {dimension_semantics = [#tpu.dimension_semantics<parallel>], iteration_bounds = array<i64: 2>, scalar_prefetch = 0 : i64, scratch_operands = 0 : i64, tpu.core_type = #tpu.core_type<tc>, window_params = [{transform_indices = @transform_0, window_bounds = array<i64: 16, 128>}, {pipeline_mode = #tpu.pipeline_mode<synchronous>, transform_indices = @transform_1, window_bounds = array<i64: 128, 128>}, {transform_indices = @transform_2, window_bounds = array<i64: 16, 128>}, {transform_indices = @transform_3, window_bounds = array<i64: 1, 1, 128>}, {transform_indices = @transform_4, window_bounds = array<i64: 1, 1, 128>}]} {
    %c0 = arith.constant 0 : index
    %c0_0 = arith.constant 0 : index
    %0 = vector.load %arg1[%c0, %c0_0] : memref<16x128xbf16, #tpu.memory_space<vmem>>, vector<16x128xbf16>
    %c0_1 = arith.constant 0 : index
    %c0_2 = arith.constant 0 : index
    %1 = vector.load %arg2[%c0_1, %c0_2] : memref<128x128xbf16, #tpu.memory_space<vmem>>, vector<128x128xbf16>
    %cst = arith.constant dense<0.000000e+00> : vector<16x128xf32>
    %2 = tpu.matmul %0, %1, %cst {dimension_numbers = #tpu.dot_dimension_numbers<[1], [0], [0], [1], [0, 0, 1, 1], [], []>} : vector<16x128xbf16>, vector<128x128xbf16>, vector<16x128xf32> -> vector<16x128xf32>
    %3 = arith.truncf %2 : vector<16x128xf32> to vector<16x128xbf16>
    %c0_3 = arith.constant 0 : index
    %c0_4 = arith.constant 0 : index
    %4 = vector.load %arg3[%c0_3, %c0_4] : memref<16x128xbf16, #tpu.memory_space<vmem>>, vector<16x128xbf16>
    tpu.vector_store %arg3[%c0_3, %c0_4], %3 {strides = array<i32>} : memref<16x128xbf16, #tpu.memory_space<vmem>>, vector<16x128xbf16>,
    %cst_5 = arith.constant dense<0.000000e+00> : vector<128xf32>
    %5 = vector.multi_reduction <add>, %2, %cst_5 [0] : vector<16x128xf32> to vector<128xf32>
    %6 = vector.shape_cast %5 : vector<128xf32> to vector<1x128xf32>
    %7 = vector.shape_cast %6 : vector<1x128xf32> to vector<1x1x128xf32>
    %c0_6 = arith.constant 0 : index
    %c0_7 = arith.constant 0 : index
    %c0_8 = arith.constant 0 : index
    %8 = vector.load %arg4[%c0_6, %c0_7, %c0_8] : memref<1x1x128xf32, #tpu.memory_space<vmem>>, vector<1x1x128xf32>
    tpu.vector_store %arg4[%c0_6, %c0_7, %c0_8], %7 {strides = array<i32>} : memref<1x1x128xf32, #tpu.memory_space<vmem>>, vector<1x1x128xf32>,
    %9 = arith.mulf %2, %2 : vector<16x128xf32>
    %cst_9 = arith.constant dense<0.000000e+00> : vector<128xf32>
    %10 = vector.multi_reduction <add>, %9, %cst_9 [0] : vector<16x128xf32> to vector<128xf32>
    %11 = vector.shape_cast %10 : vector<128xf32> to vector<1x128xf32>
    %12 = vector.shape_cast %11 : vector<1x128xf32> to vector<1x1x128xf32>
    %c0_10 = arith.constant 0 : index
    %c0_11 = arith.constant 0 : index
    %c0_12 = arith.constant 0 : index
    %13 = vector.load %arg5[%c0_10, %c0_11, %c0_12] : memref<1x1x128xf32, #tpu.memory_space<vmem>>, vector<1x1x128xf32>
    tpu.vector_store %arg5[%c0_10, %c0_11, %c0_12], %12 {strides = array<i32>} : memref<1x1x128xf32, #tpu.memory_space<vmem>>, vector<1x1x128xf32>,
    return
  }
  func.func @transform_0(%arg0: i32) -> (i32, i32) {
    %c0_i32 = arith.constant 0 : i32
    %c0_i32_0 = arith.constant 0 : i32
    return %arg0, %c0_i32 : i32, i32
  }
  func.func @transform_1(%arg0: i32) -> (i32, i32) {
    %c0_i32 = arith.constant 0 : i32
    %c0_i32_0 = arith.constant 0 : i32
    %c0_i32_1 = arith.constant 0 : i32
    return %c0_i32, %c0_i32_0 : i32, i32
  }
  func.func @transform_2(%arg0: i32) -> (i32, i32) {
    %c0_i32 = arith.constant 0 : i32
    %c0_i32_0 = arith.constant 0 : i32
    return %arg0, %c0_i32 : i32, i32
  }
  func.func @transform_3(%arg0: i32) -> (i32, i32, i32) {
    %c0_i32 = arith.constant 0 : i32
    %c0_i32_0 = arith.constant 0 : i32
    %c0_i32_1 = arith.constant 0 : i32
    return %arg0, %c0_i32, %c0_i32_0 : i32, i32, i32
  }
  func.func @transform_4(%arg0: i32) -> (i32, i32, i32) {
    %c0_i32 = arith.constant 0 : i32
    %c0_i32_0 = arith.constant 0 : i32
    %c0_i32_1 = arith.constant 0 : i32
    return %arg0, %c0_i32, %c0_i32_0 : i32, i32, i32
  }
}

module attributes {stable_mosaic.version = 11 : i64} {
  func.func @_bn_mish_res_kernel(%arg0: i32, %arg1: memref<16x128xbf16, #tpu.memory_space<vmem>>, %arg2: memref<1x128xf32, #tpu.memory_space<vmem>>, %arg3: memref<1x128xf32, #tpu.memory_space<vmem>>, %arg4: memref<16x128xbf16, #tpu.memory_space<vmem>>, %arg5: memref<16x128xbf16, #tpu.memory_space<vmem>>) attributes {dimension_semantics = [#tpu.dimension_semantics<parallel>], iteration_bounds = array<i64: 2>, scalar_prefetch = 0 : i64, scratch_operands = 0 : i64, tpu.core_type = #tpu.core_type<tc>, window_params = [{transform_indices = @transform_0, window_bounds = array<i64: 16, 128>}, {pipeline_mode = #tpu.pipeline_mode<synchronous>, transform_indices = @transform_1, window_bounds = array<i64: 1, 128>}, {pipeline_mode = #tpu.pipeline_mode<synchronous>, transform_indices = @transform_2, window_bounds = array<i64: 1, 128>}, {transform_indices = @transform_3, window_bounds = array<i64: 16, 128>}, {transform_indices = @transform_4, window_bounds = array<i64: 16, 128>}]} {
    %c0 = arith.constant 0 : index
    %c0_0 = arith.constant 0 : index
    %0 = vector.load %arg4[%c0, %c0_0] : memref<16x128xbf16, #tpu.memory_space<vmem>>, vector<16x128xbf16>
    %1 = arith.extf %0 : vector<16x128xbf16> to vector<16x128xf32>
    %c0_1 = arith.constant 0 : index
    %c0_2 = arith.constant 0 : index
    %2 = vector.load %arg1[%c0_1, %c0_2] : memref<16x128xbf16, #tpu.memory_space<vmem>>, vector<16x128xbf16>
    %3 = arith.extf %2 : vector<16x128xbf16> to vector<16x128xf32>
    %c0_3 = arith.constant 0 : index
    %c0_4 = arith.constant 0 : index
    %4 = vector.load %arg2[%c0_3, %c0_4] : memref<1x128xf32, #tpu.memory_space<vmem>>, vector<1x128xf32>
    %5 = vector.broadcast %4 : vector<1x128xf32> to vector<16x128xf32>
    %6 = arith.mulf %3, %5 : vector<16x128xf32>
    %c0_5 = arith.constant 0 : index
    %c0_6 = arith.constant 0 : index
    %7 = vector.load %arg3[%c0_5, %c0_6] : memref<1x128xf32, #tpu.memory_space<vmem>>, vector<1x128xf32>
    %8 = vector.broadcast %7 : vector<1x128xf32> to vector<16x128xf32>
    %9 = arith.addf %6, %8 : vector<16x128xf32>
    %cst = arith.constant 2.000000e+01 : f32
    %10 = vector.broadcast %cst : f32 to vector<16x128xf32>
    %11 = arith.minimumf %9, %10 : vector<16x128xf32>
    %12 = math.exp %11 : vector<16x128xf32>
    %cst_7 = arith.constant 1.000000e+00 : f32
    %13 = vector.broadcast %cst_7 : f32 to vector<16x128xf32>
    %14 = arith.addf %13, %12 : vector<16x128xf32>
    %15 = arith.mulf %14, %14 : vector<16x128xf32>
    %cst_8 = arith.constant 1.000000e+00 : f32
    %16 = vector.broadcast %cst_8 : f32 to vector<16x128xf32>
    %17 = arith.subf %15, %16 : vector<16x128xf32>
    %cst_9 = arith.constant 1.000000e+00 : f32
    %18 = vector.broadcast %cst_9 : f32 to vector<16x128xf32>
    %19 = arith.addf %15, %18 : vector<16x128xf32>
    %20 = tpu.reciprocal %19 {approx = true} : vector<16x128xf32> -> vector<16x128xf32>
    %21 = arith.mulf %17, %20 : vector<16x128xf32>
    %cst_10 = arith.constant 2.000000e+01 : f32
    %22 = vector.broadcast %cst_10 : f32 to vector<16x128xf32>
    %23 = arith.cmpf ogt, %9, %22 : vector<16x128xf32>
    %24 = arith.mulf %9, %21 : vector<16x128xf32>
    %25 = arith.select %23, %9, %24 : vector<16x128xi1>, vector<16x128xf32>
    %26 = arith.addf %1, %25 : vector<16x128xf32>
    %27 = arith.truncf %26 : vector<16x128xf32> to vector<16x128xbf16>
    %c0_11 = arith.constant 0 : index
    %c0_12 = arith.constant 0 : index
    %28 = vector.load %arg5[%c0_11, %c0_12] : memref<16x128xbf16, #tpu.memory_space<vmem>>, vector<16x128xbf16>
    tpu.vector_store %arg5[%c0_11, %c0_12], %27 {strides = array<i32>} : memref<16x128xbf16, #tpu.memory_space<vmem>>, vector<16x128xbf16>,
    return
  }
  func.func @transform_0(%arg0: i32) -> (i32, i32) {
    %c0_i32 = arith.constant 0 : i32
    %c0_i32_0 = arith.constant 0 : i32
    return %arg0, %c0_i32 : i32, i32
  }
  func.func @transform_1(%arg0: i32) -> (i32, i32) {
    %c0_i32 = arith.constant 0 : i32
    %c0_i32_0 = arith.constant 0 : i32
    %c0_i32_1 = arith.constant 0 : i32
    return %c0_i32, %c0_i32_0 : i32, i32
  }
  func.func @transform_2(%arg0: i32) -> (i32, i32) {
    %c0_i32 = arith.constant 0 : i32
    %c0_i32_0 = arith.constant 0 : i32
    %c0_i32_1 = arith.constant 0 : i32
    return %c0_i32, %c0_i32_0 : i32, i32
  }
  func.func @transform_3(%arg0: i32) -> (i32, i32) {
    %c0_i32 = arith.constant 0 : i32
    %c0_i32_0 = arith.constant 0 : i32
    return %arg0, %c0_i32 : i32, i32
  }
  func.func @transform_4(%arg0: i32) -> (i32, i32) {
    %c0_i32 = arith.constant 0 : i32
    %c0_i32_0 = arith.constant 0 : i32
    return %arg0, %c0_i32 : i32, i32
  }
}

</mosaic_0001>

<bundles_post_ra>
// kernel: darknet_forward.15
= control target key start
LH: loop header
LB: loop body
LE: loop exit
PB: predicated region body
PF: predicated region fallthrough
CT: control target
= control target key end

     0   :  { %s1363_s12 = smov 0   ;;  %s1770_s0 = inlined_call_operand.vmem [shape: bf16[512,128], index: 0, kind: input, shape index: {}]   ;;  %s1771_s1 = inlined_call_operand.vmem [shape: f32[1,128], index: 1, kind: input, shape index: {}]   ;;  %s1772_s2 = inlined_call_operand.vmem [shape: f32[1,128], index: 2, kind: input, shape index: {}]   ;;  %s1773_s3 = inlined_call_operand.vmem [shape: bf16[512,128], index: 3, kind: output, shape index: {}]  }
   0x1 LB: > { %s916_s13 = sadd.s32 4294967295, %s1341_s12   ;;  %p920_p0 = scmp.ge.s32.totalorder %s1341_s12, 1  ;;  %s1341_s12 = sphi %s1363_s12, %s13_s12  }
   0x2   : > { %p138_p1 = scmp.lt.s32.totalorder %s1341_s12, 3 }
   0x4   : > { %p139_p2 = pnand %p920_p0, %p138_p1 }
   0x5   : > { %s921_s14 = sshll.u32 (!%p139_p2), %s916_s13, 5 }
   0x6   : > { %142 = sbr.rel (%p139_p2) target bundleno = 163 (0xa3), region = 32  ;;  %p163_p3 = scmp.lt.s32.totalorder (!%p139_p2), %s921_s14, 63 }
   0xb   : > { %s1775_s14 = smov (!%p163_p3, %s921_s14), 63  ;;  %v1384_v0 = vld [vmem:[%s1771_s1] ss:$0 sm:$0xff] }
   0xc   : > { %s922_s15 = sshll.u32 %s1775_s14, 2  ;;  %v1393_v9 = vld [vmem:[%s1772_s2] ss:$0 sm:$0xff] }
   0xd   : > { %s1379_s18 = scalar_lea.vmem %s1770_s0, %s922_s15  ;;  %s1532_s25 = scalar_lea.vmem %s1773_s3, %s922_s15 }
   0xe   : > { %v1026_v1 = vld [vmem:[%s1379_s18] sm:$0xff]   ;;  %v1169_v2 = vld [vmem:[%s1379_s18 + $0x8] sm:$0xff]   ;;  %v1170_v3 = vld [vmem:[%s1379_s18 + $0x10] sm:$0xff]  }
   0xf   : > { %v1027_v4 = vunpack.c.l.bf16 %v1026_v1  ;;  %v1028_v5 = vunpack.c.h.bf16 %v1026_v1  ;;  %v1031_v6 = vunpack.c.l.bf16 %v1169_v2  ;;  %v1032_v7 = vunpack.c.h.bf16 %v1169_v2  ;;  %v1171_v8 = vld [vmem:[%s1379_s18 + $0x18] sm:$0xff]   ;;  %v1172_v40 = vld [vmem:[%s1379_s18 + $0x20] sm:$0xff]   ;;  %v1173_v43 = vld [vmem:[%s1379_s18 + $0x28] sm:$0xff]  }
  0x10   : > { %v1035_v10 = vunpack.c.l.bf16 %v1170_v3  ;;  %v1036_v11 = vunpack.c.h.bf16 %v1170_v3  ;;  %v1039_v12 = vunpack.c.l.bf16 %v1171_v8  ;;  %v1040_v13 = vunpack.c.h.bf16 %v1171_v8  ;;  %v1174_v46 = vld [vmem:[%s1379_s18 + $0x30] sm:$0xff]  }
  0x11   : > { %v245_v14 = vmul.f32 %v1027_v4, %v1384_v0  ;;  %v246_v15 = vmul.f32 %v1028_v5, %v1384_v0  ;;  %v247_v16 = vmul.f32 %v1031_v6, %v1384_v0  ;;  %v248_v17 = vmul.f32 %v1032_v7, %v1384_v0  ;;  %v1175_v4 = vld [vmem:[%s1379_s18 + $0x38] sm:$0xff]  }
  0x12   : > { %v249_v18 = vmul.f32 %v1035_v10, %v1384_v0  ;;  %v250_v19 = vmul.f32 %v1036_v11, %v1384_v0  ;;  %v251_v20 = vmul.f32 %v1039_v12, %v1384_v0  ;;  %v252_v21 = vmul.f32 %v1040_v13, %v1384_v0 }
  0x13   : > { %v1404_v22 = vadd.f32 %v1393_v9, %v245_v14  ;;  %v1407_v23 = vadd.f32 %v1393_v9, %v246_v15  ;;  %v1410_v24 = vadd.f32 %v1393_v9, %v247_v16  ;;  %v1413_v25 = vadd.f32 %v1393_v9, %v248_v17 }
  0x14   : > { %v1416_v26 = vadd.f32 %v1393_v9, %v249_v18  ;;  %v1419_v27 = vadd.f32 %v1393_v9, %v250_v19  ;;  %v1424_v30 = vadd.f32 %v1393_v9, %v251_v20  ;;  %v1429_v33 = vadd.f32 %v1393_v9, %v252_v21 }
  0x15   : > { %v316_v28 = vmin.f32 %v1404_v22, 20.0  ;;  %v317_v29 = vmin.f32 %v1407_v23, 20.0  ;;  %v318_v31 = vmin.f32 %v1410_v24, 20.0  ;;  %v319_v32 = vmin.f32 %v1413_v25, 20.0 }
  0x16   : > { %v320_v36 = vmin.f32 %v1416_v26, 20.0  ;;  %v321_v37 = vmin.f32 %v1419_v27, 20.0  ;;  %v322_v42 = vmin.f32 %v1424_v30, 20.0  ;;  %v323_v45 = vmin.f32 %v1429_v33, 20.0 }
  0x17   : > { %v348_v34 = vmul.f32 1.442695, %v316_v28  ;;  %v350_v35 = vmul.f32 1.442695, %v317_v29  ;;  %v352_v38 = vmul.f32 1.442695, %v318_v31  ;;  %v1043_v48 = vunpack.c.l.bf16 %v1172_v40 }
  0x18   : > { %v354_v39 = vmul.f32 1.442695, %v319_v32  ;;  %v356_v41 = vmul.f32 1.442695, %v320_v36  ;;  %v358_v44 = vmul.f32 1.442695, %v321_v37  ;;  %v1044_v49 = vunpack.c.h.bf16 %v1172_v40 }
  0x19   : > { %1207 = vpow2.f32 %v348_v34  ;;  %v360_v47 = vmul.f32 1.442695, %v322_v42  ;;  %v362_v50 = vmul.f32 1.442695, %v323_v45  ;;  %v1047_v51 = vunpack.c.l.bf16 %v1173_v43 }
  0x1a   : > { %1209 = vpow2.f32 %v350_v35  ;;  %v1048_v52 = vunpack.c.h.bf16 %v1173_v43  ;;  %v253_v53 = vmul.f32 %v1043_v48, %v1384_v0  ;;  %v254_v54 = vmul.f32 %v1044_v49, %v1384_v0 }
  0x1b   : > { %1211 = vpow2.f32 %v352_v38  ;;  %v1051_v55 = vunpack.c.l.bf16 %v1174_v46  ;;  %v255_v56 = vmul.f32 %v1047_v51, %v1384_v0  ;;  %v1052_v58 = vunpack.c.h.bf16 %v1174_v46 }
  0x1c   : > { %1213 = vpow2.f32 %v354_v39  ;;  %v256_v57 = vmul.f32 %v1048_v52, %v1384_v0  ;;  %v1443_v59 = vadd.f32 %v1393_v9, %v253_v53  ;;  %v1446_v60 = vadd.f32 %v1393_v9, %v254_v54 }
  0x1d   : > { %1215 = vpow2.f32 %v356_v41  ;;  %v257_v61 = vmul.f32 %v1051_v55, %v1384_v0  ;;  %v1450_v62 = vadd.f32 %v1393_v9, %v255_v56  ;;  %v258_v1 = vmul.f32 %v1052_v58, %v1384_v0 }
  0x1e   : > { %1217 = vpow2.f32 %v358_v44  ;;  %v1453_v63 = vadd.f32 %v1393_v9, %v256_v57  ;;  %v324_v2 = vmin.f32 %v1443_v59, 20.0  ;;  %v325_v3 = vmin.f32 %v1446_v60, 20.0 }
  0x1f   : > { %1219 = vpow2.f32 %v360_v47  ;;  %v326_v5 = vmin.f32 %v1450_v62, 20.0  ;;  %v1462_v10 = vadd.f32 %v1393_v9, %v257_v61  ;;  %v1465_v11 = vadd.f32 %v1393_v9, %v258_v1 }
  0x20   : > { %1221 = vpow2.f32 %v362_v50  ;;  %v327_v6 = vmin.f32 %v1453_v63, 20.0  ;;  %v364_v7 = vmul.f32 1.442695, %v324_v2  ;;  %v366_v8 = vmul.f32 1.442695, %v325_v3  ;;  %v1475_v50 = vld [vmem:[%s1379_s18 + $0x40] sm:$0xff]  }
  0x21   : > { %v368_v12 = vmul.f32 1.442695, %v326_v5  ;;  %v1055_v14 = vunpack.c.l.bf16 %v1175_v4  ;;  %v328_v15 = vmin.f32 %v1462_v10, 20.0  ;;  %v329_v16 = vmin.f32 %v1465_v11, 20.0 }
  0x22   : > { %v370_v13 = vmul.f32 1.442695, %v327_v6  ;;  %1223 = vpow2.f32 %v364_v7  ;;  %v1056_v18 = vunpack.c.h.bf16 %v1175_v4  ;;  %v1059_v1 = vunpack.c.l.bf16 %v1475_v50 }
  0x23   : > { %1225 = vpow2.f32 %v366_v8  ;;  %v259_v19 = vmul.f32 %v1055_v14, %v1384_v0  ;;  %v372_v28 = vmul.f32 1.442695, %v328_v15  ;;  %v374_v29 = vmul.f32 1.442695, %v329_v16 }
  0x24   : > { %1227 = vpow2.f32 %v368_v12  ;;  %v260_v41 = vmul.f32 %v1056_v18, %v1384_v0  ;;  %vm604_vm0 = vcmp.gt.f32.partialorder %v1404_v22, 20.0  ;;  %vm605_vm1 = vcmp.gt.f32.partialorder %v1407_v23, 20.0 }
  0x25   : > { %1229 = vpow2.f32 %v370_v13  ;;  %v1471_v37 = vadd.f32 %v1393_v9, %v259_v19  ;;  %vm606_vm2 = vcmp.gt.f32.partialorder %v1410_v24, 20.0  ;;  %vm607_vm3 = vcmp.gt.f32.partialorder %v1413_v25, 20.0 }
  0x26   : > { %v1208_v17 = vpop.eup %1207  ;;  %1231 = vpow2.f32 %v372_v28  ;;  %v1479_v57 = vadd.f32 %v1393_v9, %v260_v41  ;;  %vm608_vm4 = vcmp.gt.f32.partialorder %v1416_v26, 20.0  ;;  %vm609_vm5 = vcmp.gt.f32.partialorder %v1419_v27, 20.0 }
  0x27   : > { %v1210_v20 = vpop.eup %1209  ;;  %v412_v21 = vadd.f32 1.0, %v1208_v17  ;;  %1233 = vpow2.f32 %v374_v29  ;;  %v330_v54 = vmin.f32 %v1471_v37, 20.0  ;;  %vm610_vm6 = vcmp.gt.f32.partialorder %v1424_v30, 20.0 }
  0x28   : > { %v1212_v31 = vpop.eup %1211  ;;  %v413_v32 = vadd.f32 1.0, %v1210_v20  ;;  %v331_v18 = vmin.f32 %v1479_v57, 20.0  ;;  %vm611_vm7 = vcmp.gt.f32.partialorder %v1429_v33, 20.0  ;;  %vm612_vm8 = vcmp.gt.f32.partialorder %v1443_v59, 20.0 }
  0x29   : > { %v1214_v34 = vpop.eup %1213  ;;  %v444_v35 = vmul.f32 %v412_v21, %v412_v21  ;;  %v414_v36 = vadd.f32 1.0, %v1212_v31  ;;  %v376_v7 = vmul.f32 1.442695, %v330_v54  ;;  %vm613_vm9 = vcmp.gt.f32.partialorder %v1446_v60, 20.0 }
  0x2a   : > { %v1216_v38 = vpop.eup %1215  ;;  %v445_v39 = vmul.f32 %v413_v32, %v413_v32  ;;  %v415_v40 = vadd.f32 1.0, %v1214_v34  ;;  %vm614_vm10 = vcmp.gt.f32.partialorder %v1450_v62, 20.0  ;;  %vm615_vm11 = vcmp.gt.f32.partialorder %v1453_v63, 20.0 }
  0x2b   : > { %v1218_v42 = vpop.eup %1217  ;;  %v508_v43 = vadd.f32 1.0, %v444_v35  ;;  %v446_v44 = vmul.f32 %v414_v36, %v414_v36  ;;  %v416_v45 = vadd.f32 1.0, %v1216_v38  ;;  %v927_v2 = vadd.f32 -1.0, %v444_v35 }
  0x2c   : > { %v1220_v46 = vpop.eup %1219  ;;  %v509_v47 = vadd.f32 1.0, %v445_v39  ;;  %v447_v48 = vmul.f32 %v415_v40, %v415_v40  ;;  %v417_v49 = vadd.f32 1.0, %v1218_v42  ;;  %v928_v5 = vadd.f32 -1.0, %v445_v39 }
  0x2d   : > { %v1222_v51 = vpop.eup %1221  ;;  %1235 = vrcp.f32 %v508_v43  ;;  %v510_v52 = vadd.f32 1.0, %v446_v44  ;;  %v448_v53 = vmul.f32 %v416_v45, %v416_v45  ;;  %v418_v61 = vadd.f32 1.0, %v1220_v46 }
  0x2e   : > { %1237 = vrcp.f32 %v509_v47  ;;  %v511_v55 = vadd.f32 1.0, %v447_v48  ;;  %v449_v56 = vmul.f32 %v417_v49, %v417_v49  ;;  %v419_v4 = vadd.f32 1.0, %v1222_v51 }
  0x2f   : > { %1239 = vrcp.f32 %v510_v52  ;;  %v512_v58 = vadd.f32 1.0, %v448_v53  ;;  %v450_v6 = vmul.f32 %v418_v61, %v418_v61  ;;  %v1224_v8 = vpop.eup %1223  ;;  %v929_v12 = vadd.f32 -1.0, %v446_v44 }
  0x30   : > { %1241 = vrcp.f32 %v511_v55  ;;  %v513_v3 = vadd.f32 1.0, %v449_v56  ;;  %v1482_v13 = vadd.f32 -1.0, %v447_v48  ;;  %v451_v14 = vmul.f32 %v419_v4, %v419_v4  ;;  %v1226_v15 = vpop.eup %1225 }
  0x31   : > { %1243 = vrcp.f32 %v512_v58  ;;  %v514_v16 = vadd.f32 1.0, %v450_v6  ;;  %v420_v17 = vadd.f32 1.0, %v1224_v8  ;;  %v1228_v19 = vpop.eup %1227  ;;  %v931_v20 = vadd.f32 -1.0, %v448_v53 }
  0x32   : > { %1245 = vrcp.f32 %v513_v3  ;;  %v1486_v21 = vadd.f32 -1.0, %v449_v56  ;;  %v515_v28 = vadd.f32 1.0, %v451_v14  ;;  %v421_v29 = vadd.f32 1.0, %v1226_v15  ;;  %v1230_v31 = vpop.eup %1229 }
  0x33   : > { %1247 = vpow2.f32 %v376_v7  ;;  %v1489_v32 = vadd.f32 -1.0, %v450_v6  ;;  %v452_v34 = vmul.f32 %v420_v17, %v420_v17  ;;  %v422_v35 = vadd.f32 1.0, %v1228_v19  ;;  %v1232_v36 = vpop.eup %1231 }
  0x34   : > { %1249 = vrcp.f32 %v514_v16  ;;  %v1492_v38 = vadd.f32 -1.0, %v451_v14  ;;  %v453_v39 = vmul.f32 %v421_v29, %v421_v29  ;;  %v423_v40 = vadd.f32 1.0, %v1230_v31  ;;  %v1234_v41 = vpop.eup %1233 }
  0x35   : > { %1251 = vrcp.f32 %v515_v28  ;;  %v516_v42 = vadd.f32 1.0, %v452_v34  ;;  %v454_v43 = vmul.f32 %v422_v35, %v422_v35  ;;  %v424_v44 = vadd.f32 1.0, %v1232_v36 }
  0x36   : > { %v378_v45 = vmul.f32 1.442695, %v331_v18  ;;  %v517_v46 = vadd.f32 1.0, %v453_v39  ;;  %v1496_v47 = vmul.f32 %v423_v40, %v423_v40  ;;  %v425_v48 = vadd.f32 1.0, %v1234_v41 }
  0x37   : > { %v1060_v49 = vunpack.c.h.bf16 %v1475_v50  ;;  %1253 = vrcp.f32 %v516_v42  ;;  %v518_v51 = vadd.f32 1.0, %v454_v43  ;;  %v1500_v52 = vmul.f32 %v424_v44, %v424_v44 }
  0x38   : > { %v261_v53 = vmul.f32 %v1059_v1, %v1384_v0  ;;  %v1503_v55 = vadd.f32 -1.0, %v452_v34  ;;  %1255 = vrcp.f32 %v517_v46  ;;  %v519_v56 = vadd.f32 1.0, %v1496_v47 }
  0x39   : > { %v1506_v58 = vmul.f32 %v425_v48, %v425_v48  ;;  %v1508_v4 = vadd.f32 -1.0, %v453_v39  ;;  %1257 = vrcp.f32 %v518_v51  ;;  %v520_v50 = vadd.f32 1.0, %v1500_v52 }
  0x3a   : > { %v1236_v54 = vpop.eup %1235  ;;  %v1512_v1 = vadd.f32 -1.0, %v454_v43  ;;  %1259 = vrcp.f32 %v519_v56  ;;  %v1521_v19 = vadd.f32 %v1393_v9, %v261_v53  ;;  %vm616_vm12 = vcmp.gt.f32.partialorder %v1462_v10, 20.0  ;;  %v1177_v56 = vld [vmem:[%s1379_s18 + $0x48] sm:$0xff]  }
  0x3b   : > { %v1238_v61 = vpop.eup %1237  ;;  %v572_v3 = vmul.f32 %v1236_v54, %v927_v2  ;;  %v521_v8 = vadd.f32 1.0, %v1506_v58  ;;  %1261 = vrcp.f32 %v520_v50  ;;  %v262_v2 = vmul.f32 %v1060_v49, %v1384_v0 }
  0x3c   : > { %v1240_v6 = vpop.eup %1239  ;;  %v573_v7 = vmul.f32 %v1238_v61, %v928_v5  ;;  %v332_v43 = vmin.f32 %v1521_v19, 20.0  ;;  %v938_v61 = vadd.f32 -1.0, %v1496_v47  ;;  %vm617_vm13 = vcmp.gt.f32.partialorder %v1465_v11, 20.0 }
  0x3d   : > { %v1242_v14 = vpop.eup %1241  ;;  %v636_v15 = vmul.f32 %v572_v3, %v1404_v22  ;;  %v574_v16 = vmul.f32 %v1240_v6, %v929_v12  ;;  %1263 = vrcp.f32 %v521_v8  ;;  %v939_v50 = vadd.f32 -1.0, %v1500_v52 }
  0x3e   : > { %v1244_v17 = vpop.eup %1243  ;;  %v637_v5 = vmul.f32 %v573_v7, %v1407_v23  ;;  %v575_v18 = vmul.f32 %v1242_v14, %v1482_v13  ;;  %1265 = vpow2.f32 %v378_v45  ;;  %v380_v53 = vmul.f32 1.442695, %v332_v43 }
  0x3f   : > { %v1246_v28 = vpop.eup %1245  ;;  %v668_v29 = vsel %vm604_vm0, %v1404_v22, %v636_v15  ;;  %v638_v12 = vmul.f32 %v574_v16, %v1410_v24  ;;  %v576_v31 = vmul.f32 %v1244_v17, %v931_v20  ;;  %v1541_v20 = vadd.f32 %v1393_v9, %v262_v2  ;;  %v1178_v15 = vld [vmem:[%s1379_s18 + $0x50] sm:$0xff]  }
  0x40   : > { %v1248_v34 = vpop.eup %1247  ;;  %v669_v13 = vsel %vm605_vm1, %v1407_v23, %v637_v5  ;;  %v639_v35 = vmul.f32 %v575_v18, %v1413_v25  ;;  %v577_v22 = vmul.f32 %v1246_v28, %v1486_v21  ;;  %v940_v6 = vadd.f32 -1.0, %v1506_v58 }
  0x41   : > { %v1092_v36 = vpack.c.bf16 %v669_v13, %v668_v29  ;;  %v670_v39 = vsel %vm606_vm2, %v1410_v24, %v638_v12  ;;  %v640_v40 = vmul.f32 %v576_v31, %v1416_v26  ;;  %v426_v23 = vadd.f32 1.0, %v1248_v34  ;;  %v1250_v41 = vpop.eup %1249 }
  0x42   : > { %v671_v21 = vsel %vm607_vm3, %v1413_v25, %v639_v35  ;;  %v641_v42 = vmul.f32 %v577_v22, %v1419_v27  ;;  %v333_v24 = vmin.f32 %v1541_v20, 20.0  ;;  %v1252_v44 = vpop.eup %1251  ;;  %v578_v48 = vmul.f32 %v1250_v41, %v1489_v32 }
  0x43   : > { %1093 = vst [vmem:[%s1532_s25] sm:$0xff] %v1092_v36   ;;  %v1097_v45 = vpack.c.bf16 %v671_v21, %v670_v39  ;;  %v672_v46 = vsel %vm608_vm4, %v1416_v26, %v640_v40  ;;  %v1561_v25 = vmul.f32 %v426_v23, %v426_v23  ;;  %v579_v51 = vmul.f32 %v1252_v44, %v1492_v38 }
  0x44   : > { %v673_v49 = vsel %vm609_vm5, %v1419_v27, %v641_v42  ;;  %v382_v54 = vmul.f32 1.442695, %v333_v24  ;;  %v642_v32 = vmul.f32 %v578_v48, %v1424_v30  ;;  %v1254_v27 = vpop.eup %1253  ;;  %1267 = vpow2.f32 %v380_v53  ;;  %v1179_v48 = vld [vmem:[%s1379_s18 + $0x58] sm:$0xff]   ;;  %v1180_v53 = vld [vmem:[%s1379_s18 + $0x60] sm:$0xff]  }
  0x45   : > { %1184 = vst [vmem:[%s1532_s25 + $0x8] sm:$0xff] %v1097_v45   ;;  %v1102_v26 = vpack.c.bf16 %v673_v49, %v672_v46  ;;  %v522_v3 = vadd.f32 1.0, %v1561_v25  ;;  %v643_v38 = vmul.f32 %v579_v51, %v1429_v33  ;;  %v1256_v7 = vpop.eup %1255  ;;  %v580_v47 = vmul.f32 %v1254_v27, %v1503_v55 }
  0x46   : > { %v674_v8 = vsel %vm610_vm6, %v1424_v30, %v642_v32  ;;  %v1063_v14 = vunpack.c.l.bf16 %v1177_v56  ;;  %v1258_v16 = vpop.eup %1257  ;;  %v581_v58 = vmul.f32 %v1256_v7, %v1508_v4  ;;  %v1064_v2 = vunpack.c.h.bf16 %v1177_v56 }
  0x47   : > { %1185 = vst [vmem:[%s1532_s25 + $0x10] sm:$0xff] %v1102_v26   ;;  %1269 = vrcp.f32 %v522_v3  ;;  %v675_v52 = vsel %vm611_vm7, %v1429_v33, %v643_v38  ;;  %v1260_v17 = vpop.eup %1259  ;;  %v644_v18 = vmul.f32 %v580_v47, %v1443_v59  ;;  %v582_v30 = vmul.f32 %v1258_v16, %v1512_v1 }
  0x48   : > { %1271 = vpow2.f32 %v382_v54  ;;  %v1107_v5 = vpack.c.bf16 %v675_v52, %v674_v8  ;;  %v263_v55 = vmul.f32 %v1063_v14, %v1384_v0  ;;  %v1262_v28 = vpop.eup %1261  ;;  %v645_v29 = vmul.f32 %v581_v58, %v1446_v60 }
  0x49   : > { %v583_v12 = vmul.f32 %v1260_v17, %v938_v61  ;;  %v264_v31 = vmul.f32 %v1064_v2, %v1384_v0  ;;  %v1067_v34 = vunpack.c.l.bf16 %v1178_v15  ;;  %v676_v4 = vsel %vm612_vm8, %v1443_v59, %v644_v18 }
  0x4a   : > { %v1264_v33 = vpop.eup %1263  ;;  %1186 = vst [vmem:[%s1532_s25 + $0x18] sm:$0xff] %v1107_v5   ;;  %v646_v13 = vmul.f32 %v582_v30, %v1450_v62  ;;  %v584_v35 = vmul.f32 %v1262_v28, %v939_v50  ;;  %v1598_v1 = vadd.f32 %v1393_v9, %v263_v55  ;;  %v677_v36 = vsel %vm613_vm9, %v1446_v60, %v645_v29 }
  0x4b   : > { %v1266_v22 = vpop.eup %1265  ;;  %v647_v39 = vmul.f32 %v583_v12, %v1453_v63  ;;  %v585_v40 = vmul.f32 %v1264_v33, %v940_v6  ;;  %v1605_v23 = vadd.f32 %v1393_v9, %v264_v31  ;;  %v1112_v59 = vpack.c.bf16 %v677_v36, %v676_v4 }
  0x4c   : > { %v678_v41 = vsel %vm614_vm10, %v1450_v62, %v646_v13  ;;  %v648_v21 = vmul.f32 %v584_v35, %v1462_v10  ;;  %v427_v42 = vadd.f32 1.0, %v1266_v22  ;;  %v334_v24 = vmin.f32 %v1598_v1, 20.0 }
  0x4d   : > { %v679_v60 = vsel %vm615_vm11, %v1453_v63, %v647_v39  ;;  %v649_v43 = vmul.f32 %v585_v40, %v1465_v11  ;;  %v335_v44 = vmin.f32 %v1605_v23, 20.0  ;;  %1187 = vst [vmem:[%s1532_s25 + $0x20] sm:$0xff] %v1112_v59   ;;  %v1068_v26 = vunpack.c.h.bf16 %v1178_v15  ;;  %v1182_v40 = vld [vmem:[%s1379_s18 + $0x70] sm:$0xff]  }
  0x4e   : > { %v1117_v45 = vpack.c.bf16 %v679_v60, %v678_v41  ;;  %v680_v62 = vsel %vm616_vm12, %v1462_v10, %v648_v21  ;;  %v459_v46 = vmul.f32 %v427_v42, %v427_v42  ;;  %v384_v63 = vmul.f32 1.442695, %v334_v24 }
  0x4f   : > { %v681_v49 = vsel %vm617_vm13, %v1465_v11, %v649_v43  ;;  %v386_v51 = vmul.f32 1.442695, %v335_v44  ;;  %v265_v32 = vmul.f32 %v1067_v34, %v1384_v0  ;;  %v1071_v61 = vunpack.c.l.bf16 %v1179_v48  ;;  %v1181_v34 = vld [vmem:[%s1379_s18 + $0x68] sm:$0xff]  }
  0x50   : > { %1188 = vst [vmem:[%s1532_s25 + $0x28] sm:$0xff] %v1117_v45   ;;  %v1122_v54 = vpack.c.bf16 %v681_v49, %v680_v62  ;;  %v523_v56 = vadd.f32 1.0, %v459_v46  ;;  %1273 = vpow2.f32 %v384_v63  ;;  %v1072_v3 = vunpack.c.h.bf16 %v1179_v48 }
  0x51   : > { %v1268_v10 = vpop.eup %1267  ;;  %v941_v27 = vadd.f32 -1.0, %v1561_v25  ;;  %v266_v38 = vmul.f32 %v1068_v26, %v1384_v0  ;;  %v1075_v11 = vunpack.c.l.bf16 %v1180_v53  ;;  %v1632_v7 = vadd.f32 %v1393_v9, %v265_v32 }
  0x52   : > { %1189 = vst [vmem:[%s1532_s25 + $0x30] sm:$0xff] %v1122_v54   ;;  %1275 = vrcp.f32 %v523_v56  ;;  %v428_v6 = vadd.f32 1.0, %v1268_v10  ;;  %v267_v8 = vmul.f32 %v1071_v61, %v1384_v0  ;;  %v268_v15 = vmul.f32 %v1072_v3, %v1384_v0 }
  0x53   : > { %1277 = vpow2.f32 %v386_v51  ;;  %v1636_v14 = vadd.f32 %v1393_v9, %v266_v38  ;;  %v336_v52 = vmin.f32 %v1632_v7, 20.0  ;;  %v1076_v5 = vunpack.c.h.bf16 %v1180_v53 }
  0x54   : > { %v1270_v50 = vpop.eup %1269  ;;  %v460_v16 = vmul.f32 %v428_v6, %v428_v6  ;;  %v1642_v17 = vadd.f32 %v1393_v9, %v267_v8  ;;  %v269_v28 = vmul.f32 %v1075_v11, %v1384_v0  ;;  %v1646_v12 = vadd.f32 %v1393_v9, %v268_v15 }
  0x55   : > { %v1272_v47 = vpop.eup %1271  ;;  %v586_v58 = vmul.f32 %v1270_v50, %v941_v27  ;;  %v337_v2 = vmin.f32 %v1636_v14, 20.0  ;;  %v388_v55 = vmul.f32 1.442695, %v336_v52  ;;  %vm618_vm14 = vcmp.gt.f32.partialorder %v1471_v37, 20.0 }
  0x56   : > { %v429_v25 = vadd.f32 1.0, %v1272_v47  ;;  %v524_v30 = vadd.f32 1.0, %v460_v16  ;;  %v338_v31 = vmin.f32 %v1642_v17, 20.0  ;;  %v339_v13 = vmin.f32 %v1646_v12, 20.0 }
  0x57   : > { %v390_v29 = vmul.f32 1.442695, %v337_v2  ;;  %v650_v4 = vmul.f32 %v586_v58, %v1471_v37  ;;  %v270_v22 = vmul.f32 %v1076_v5, %v1384_v0  ;;  %v1655_v36 = vadd.f32 %v1393_v9, %v269_v28 }
  0x58   : > { %v461_v18 = vmul.f32 %v429_v25, %v429_v25  ;;  %1279 = vrcp.f32 %v524_v30  ;;  %v392_v35 = vmul.f32 1.442695, %v338_v31  ;;  %v1079_v39 = vunpack.c.l.bf16 %v1181_v34  ;;  %v1183_v25 = vld [vmem:[%s1379_s18 + $0x78] sm:$0xff]  }
  0x59   : > { %1281 = vpow2.f32 %v388_v55  ;;  %v942_v59 = vadd.f32 -1.0, %v459_v46  ;;  %v394_v41 = vmul.f32 1.442695, %v339_v13  ;;  %v1080_v21 = vunpack.c.h.bf16 %v1181_v34 }
  0x5a   : > { %v525_v33 = vadd.f32 1.0, %v461_v18  ;;  %vm619_vm15 = vcmp.gt.f32.partialorder %v1479_v57, 20.0  ;;  %v1660_v42 = vadd.f32 %v1393_v9, %v270_v22  ;;  %v340_v60 = vmin.f32 %v1655_v36, 20.0 }
  0x5b   : > { %v271_v24 = vmul.f32 %v1079_v39, %v1384_v0  ;;  %v272_v44 = vmul.f32 %v1080_v21, %v1384_v0  ;;  %v1083_v45 = vunpack.c.l.bf16 %v1182_v40  ;;  %v682_v46 = vsel %vm618_vm14, %v1471_v37, %v650_v4 }
  0x5c   : > { %1283 = vrcp.f32 %v525_v33  ;;  %v341_v49 = vmin.f32 %v1660_v42, 20.0  ;;  %v396_v63 = vmul.f32 1.442695, %v340_v60  ;;  %v1084_v26 = vunpack.c.h.bf16 %v1182_v40 }
  0x5d   : > { %1285 = vpow2.f32 %v390_v29  ;;  %v1274_v43 = vpop.eup %1273  ;;  %v1670_v54 = vadd.f32 %v1393_v9, %v271_v24  ;;  %v1673_v56 = vadd.f32 %v1393_v9, %v272_v44  ;;  %v273_v38 = vmul.f32 %v1083_v45, %v1384_v0 }
  0x5e   : > { %1287 = vpow2.f32 %v392_v35  ;;  %v430_v48 = vadd.f32 1.0, %v1274_v43  ;;  %v398_v3 = vmul.f32 1.442695, %v341_v49  ;;  %v943_v11 = vadd.f32 -1.0, %v460_v16 }
  0x5f   : > { %1289 = vpow2.f32 %v394_v41  ;;  %v1276_v62 = vpop.eup %1275  ;;  %v342_v10 = vmin.f32 %v1670_v54, 20.0  ;;  %v343_v27 = vmin.f32 %v1673_v56, 20.0  ;;  %v944_v58 = vadd.f32 -1.0, %v461_v18 }
  0x60   : > { %v1278_v51 = vpop.eup %1277  ;;  %v587_v53 = vmul.f32 %v1276_v62, %v942_v59  ;;  %v462_v61 = vmul.f32 %v430_v48, %v430_v48  ;;  %1291 = vpow2.f32 %v396_v63  ;;  %v274_v30 = vmul.f32 %v1084_v26, %v1384_v0 }
  0x61   : > { %v431_v32 = vadd.f32 1.0, %v1278_v51  ;;  %1293 = vpow2.f32 %v398_v3  ;;  %v400_v47 = vmul.f32 1.442695, %v342_v10  ;;  %v402_v15 = vmul.f32 1.442695, %v343_v27 }
  0x62   : > { %v651_v37 = vmul.f32 %v587_v53, %v1479_v57  ;;  %v526_v6 = vadd.f32 1.0, %v462_v61  ;;  %v1685_v16 = vadd.f32 %v1393_v9, %v273_v38  ;;  %vm620_vm0 = vcmp.gt.f32.partialorder %v1521_v19, 20.0 }
  0x63   : > { %v463_v50 = vmul.f32 %v431_v32, %v431_v32  ;;  %v1690_v18 = vadd.f32 %v1393_v9, %v274_v30  ;;  %vm621_vm1 = vcmp.gt.f32.partialorder %v1541_v20, 20.0  ;;  %v1088_v24 = vunpack.c.h.bf16 %v1183_v25 }
  0x64   : > { %v683_v8 = vsel %vm619_vm15, %v1479_v57, %v651_v37  ;;  %1295 = vrcp.f32 %v526_v6  ;;  %v1087_v57 = vunpack.c.l.bf16 %v1183_v25  ;;  %v344_v34 = vmin.f32 %v1685_v16, 20.0 }
  0x65   : > { %v1127_v52 = vpack.c.bf16 %v683_v8, %v682_v46  ;;  %v527_v2 = vadd.f32 1.0, %v463_v50  ;;  %v1280_v5 = vpop.eup %1279  ;;  %1297 = vpow2.f32 %v400_v47  ;;  %v345_v40 = vmin.f32 %v1690_v18, 20.0 }
  0x66   : > { %v1282_v55 = vpop.eup %1281  ;;  %v588_v28 = vmul.f32 %v1280_v5, %v943_v11  ;;  %v404_v59 = vmul.f32 1.442695, %v344_v34  ;;  %v275_v46 = vmul.f32 %v1087_v57, %v1384_v0  ;;  %v276_v27 = vmul.f32 %v1088_v24, %v1384_v0 }
  0x67   : > { %1190 = vst [vmem:[%s1532_s25 + $0x38] sm:$0xff] %v1127_v52   ;;  %1299 = vrcp.f32 %v527_v2  ;;  %v432_v31 = vadd.f32 1.0, %v1282_v55  ;;  %v406_v26 = vmul.f32 1.442695, %v345_v40  ;;  %vm622_vm2 = vcmp.gt.f32.partialorder %v1598_v1, 20.0 }
  0x68   : > { %1301 = vpow2.f32 %v402_v15  ;;  %v652_v13 = vmul.f32 %v588_v28, %v1521_v19  ;;  %v1707_v38 = vadd.f32 %v1393_v9, %v275_v46  ;;  %vm623_vm3 = vcmp.gt.f32.partialorder %v1605_v23, 20.0 }
  0x69   : > { %v1284_v29 = vpop.eup %1283  ;;  %v464_v39 = vmul.f32 %v432_v31, %v432_v31  ;;  %1303 = vpow2.f32 %v404_v59  ;;  %vm624_vm4 = vcmp.gt.f32.partialorder %v1632_v7, 20.0  ;;  %vm625_vm5 = vcmp.gt.f32.partialorder %v1636_v14, 20.0 }
  0x6a   : > { %v1286_v33 = vpop.eup %1285  ;;  %v589_v4 = vmul.f32 %v1284_v29, %v944_v58  ;;  %v684_v60 = vsel %vm620_vm0, %v1521_v19, %v652_v13  ;;  %v945_v19 = vadd.f32 -1.0, %v462_v61  ;;  %v1710_v61 = vadd.f32 %v1393_v9, %v276_v27 }
  0x6b   : > { %v1288_v35 = vpop.eup %1287  ;;  %v433_v22 = vadd.f32 1.0, %v1286_v33  ;;  %v528_v45 = vadd.f32 1.0, %v464_v39  ;;  %v346_v15 = vmin.f32 %v1707_v38, 20.0  ;;  %v947_v13 = vadd.f32 -1.0, %v464_v39 }
  0x6c   : > { %v1290_v41 = vpop.eup %1289  ;;  %v653_v21 = vmul.f32 %v589_v4, %v1541_v20  ;;  %v434_v43 = vadd.f32 1.0, %v1288_v35  ;;  %v347_v5 = vmin.f32 %v1710_v61, 20.0  ;;  %vm626_vm6 = vcmp.gt.f32.partialorder %v1642_v17, 20.0 }
  0x6d   : > { %v465_v44 = vmul.f32 %v433_v22, %v433_v22  ;;  %v435_v62 = vadd.f32 1.0, %v1290_v41  ;;  %v1292_v63 = vpop.eup %1291  ;;  %1305 = vrcp.f32 %v528_v45  ;;  %v408_v31 = vmul.f32 1.442695, %v346_v15 }
  0x6e   : > { %v685_v48 = vsel %vm621_vm1, %v1541_v20, %v653_v21  ;;  %v466_v49 = vmul.f32 %v434_v43, %v434_v43  ;;  %v436_v37 = vadd.f32 1.0, %v1292_v63  ;;  %v1294_v10 = vpop.eup %1293  ;;  %v946_v20 = vadd.f32 -1.0, %v463_v50 }
  0x6f   : > { %v1132_v51 = vpack.c.bf16 %v685_v48, %v684_v60  ;;  %v529_v53 = vadd.f32 1.0, %v465_v44  ;;  %v467_v32 = vmul.f32 %v435_v62, %v435_v62  ;;  %v437_v6 = vadd.f32 1.0, %v1294_v10 }
  0x70   : > { %v530_v3 = vadd.f32 1.0, %v466_v49  ;;  %v468_v47 = vmul.f32 %v436_v37, %v436_v37  ;;  %v410_v4 = vmul.f32 1.442695, %v347_v5  ;;  %v948_v21 = vadd.f32 -1.0, %v465_v44 }
  0x71   : > { %1191 = vst [vmem:[%s1532_s25 + $0x40] sm:$0xff] %v1132_v51   ;;  %1307 = vrcp.f32 %v529_v53  ;;  %v531_v11 = vadd.f32 1.0, %v467_v32  ;;  %v1296_v8 = vpop.eup %1295  ;;  %v469_v58 = vmul.f32 %v437_v6, %v437_v6  ;;  %v949_v24 = vadd.f32 -1.0, %v466_v49 }
  0x72   : > { %1309 = vrcp.f32 %v530_v3  ;;  %v1298_v25 = vpop.eup %1297  ;;  %v590_v52 = vmul.f32 %v1296_v8, %v945_v19  ;;  %v532_v2 = vadd.f32 1.0, %v468_v47  ;;  %v950_v39 = vadd.f32 -1.0, %v467_v32 }
  0x73   : > { %1311 = vpow2.f32 %v406_v26  ;;  %v438_v50 = vadd.f32 1.0, %v1298_v25  ;;  %v533_v28 = vadd.f32 1.0, %v469_v58  ;;  %v951_v3 = vadd.f32 -1.0, %v468_v47 }
  0x74   : > { %1313 = vrcp.f32 %v531_v11  ;;  %v1300_v0 = vpop.eup %1299  ;;  %v654_v9 = vmul.f32 %v590_v52, %v1598_v1  ;;  %v952_v27 = vadd.f32 -1.0, %v469_v58  ;;  %vm627_vm7 = vcmp.gt.f32.partialorder %v1646_v12, 20.0 }
  0x75   : > { %v1302_v30 = vpop.eup %1301  ;;  %v591_v55 = vmul.f32 %v1300_v0, %v946_v20  ;;  %1315 = vrcp.f32 %v532_v2  ;;  %v470_v29 = vmul.f32 %v438_v50, %v438_v50  ;;  %vm628_vm8 = vcmp.gt.f32.partialorder %v1655_v36, 20.0 }
  0x76   : > { %v439_v57 = vadd.f32 1.0, %v1302_v30  ;;  %v686_v33 = vsel %vm622_vm2, %v1598_v1, %v654_v9  ;;  %1317 = vrcp.f32 %v533_v28  ;;  %v1304_v59 = vpop.eup %1303  ;;  %vm629_vm9 = vcmp.gt.f32.partialorder %v1660_v42, 20.0 }
  0x77   : > { %v655_v34 = vmul.f32 %v591_v55, %v1605_v23  ;;  %v534_v22 = vadd.f32 1.0, %v470_v29  ;;  %1319 = vpow2.f32 %v408_v31  ;;  %v440_v45 = vadd.f32 1.0, %v1304_v59 }
  0x78   : > { %v471_v35 = vmul.f32 %v439_v57, %v439_v57  ;;  %1321 = vpow2.f32 %v410_v4  ;;  %v953_v52 = vadd.f32 -1.0, %v470_v29  ;;  %vm630_vm10 = vcmp.gt.f32.partialorder %v1670_v54, 20.0 }
  0x79   : > { %v687_v40 = vsel %vm623_vm3, %v1605_v23, %v655_v34  ;;  %1323 = vrcp.f32 %v534_v22  ;;  %v472_v46 = vmul.f32 %v440_v45, %v440_v45  ;;  %vm631_vm11 = vcmp.gt.f32.partialorder %v1673_v56, 20.0 }
  0x7a   : > { %v1137_v41 = vpack.c.bf16 %v687_v40, %v686_v33  ;;  %v535_v60 = vadd.f32 1.0, %v471_v35  ;;  %v1306_v43 = vpop.eup %1305  ;;  %v954_v50 = vadd.f32 -1.0, %v471_v35  ;;  %vm632_vm12 = vcmp.gt.f32.partialorder %v1685_v16, 20.0 }
  0x7b   : > { %v592_v1 = vmul.f32 %v1306_v43, %v947_v13  ;;  %v536_v49 = vadd.f32 1.0, %v472_v46  ;;  %v955_v40 = vadd.f32 -1.0, %v472_v46  ;;  %vm633_vm13 = vcmp.gt.f32.partialorder %v1690_v18, 20.0 }
  0x7c   : > { %1192 = vst [vmem:[%s1532_s25 + $0x48] sm:$0xff] %v1137_v41   ;;  %1325 = vrcp.f32 %v535_v60  ;;  %vm634_vm14 = vcmp.gt.f32.partialorder %v1707_v38, 20.0  ;;  %vm635_vm15 = vcmp.gt.f32.partialorder %v1710_v61, 20.0 }
  0x7d   : > { %v656_v23 = vmul.f32 %v592_v1, %v1632_v7  ;;  %1327 = vrcp.f32 %v536_v49 }
  0x7e   : > { %v1308_v62 = vpop.eup %1307 }
  0x7f   : > { %v1310_v48 = vpop.eup %1309  ;;  %v593_v63 = vmul.f32 %v1308_v62, %v948_v21  ;;  %v688_v19 = vsel %vm624_vm4, %v1632_v7, %v656_v23 }
  0x80   : > { %v1312_v51 = vpop.eup %1311  ;;  %v594_v44 = vmul.f32 %v1310_v48, %v949_v24 }
  0x81   : > { %v1314_v53 = vpop.eup %1313  ;;  %v657_v26 = vmul.f32 %v593_v63, %v1636_v14  ;;  %v441_v37 = vadd.f32 1.0, %v1312_v51 }
  0x82   : > { %v595_v32 = vmul.f32 %v1314_v53, %v950_v39  ;;  %v658_v10 = vmul.f32 %v594_v44, %v1642_v17  ;;  %v1316_v6 = vpop.eup %1315 }
  0x83   : > { %v689_v20 = vsel %vm625_vm5, %v1636_v14, %v657_v26  ;;  %v473_v11 = vmul.f32 %v441_v37, %v441_v37  ;;  %v1318_v47 = vpop.eup %1317  ;;  %v596_v25 = vmul.f32 %v1316_v6, %v951_v3 }
  0x84   : > { %v1142_v8 = vpack.c.bf16 %v689_v20, %v688_v19  ;;  %v659_v15 = vmul.f32 %v595_v32, %v1646_v12  ;;  %v690_v7 = vsel %vm626_vm6, %v1642_v17, %v658_v10  ;;  %v1320_v0 = vpop.eup %1319  ;;  %v597_v2 = vmul.f32 %v1318_v47, %v952_v27 }
  0x85   : > { %v537_v58 = vadd.f32 1.0, %v473_v11  ;;  %v1322_v5 = vpop.eup %1321  ;;  %v660_v55 = vmul.f32 %v596_v25, %v1655_v36  ;;  %v442_v17 = vadd.f32 1.0, %v1320_v0  ;;  %v956_v45 = vadd.f32 -1.0, %v473_v11 }
  0x86   : > { %1193 = vst [vmem:[%s1532_s25 + $0x50] sm:$0xff] %v1142_v8   ;;  %v691_v14 = vsel %vm627_vm7, %v1646_v12, %v659_v15  ;;  %v1324_v9 = vpop.eup %1323  ;;  %v661_v28 = vmul.f32 %v597_v2, %v1660_v42  ;;  %v443_v57 = vadd.f32 1.0, %v1322_v5 }
  0x87   : > { %v1147_v30 = vpack.c.bf16 %v691_v14, %v690_v7  ;;  %1329 = vrcp.f32 %v537_v58  ;;  %v692_v12 = vsel %vm628_vm8, %v1655_v36, %v660_v55  ;;  %v598_v29 = vmul.f32 %v1324_v9, %v953_v52 }
  0x88   : > { %v474_v31 = vmul.f32 %v442_v17, %v442_v17  ;;  %v693_v33 = vsel %vm629_vm9, %v1660_v42, %v661_v28  ;;  %v475_v4 = vmul.f32 %v443_v57, %v443_v57 }
  0x89   : > { %1194 = vst [vmem:[%s1532_s25 + $0x58] sm:$0xff] %v1147_v30   ;;  %v1326_v34 = vpop.eup %1325  ;;  %v1152_v13 = vpack.c.bf16 %v693_v33, %v692_v12  ;;  %v662_v22 = vmul.f32 %v598_v29, %v1670_v54 }
  0x8a   : > { %v599_v35 = vmul.f32 %v1326_v34, %v954_v50  ;;  %v538_v59 = vadd.f32 1.0, %v474_v31  ;;  %v539_v41 = vadd.f32 1.0, %v475_v4  ;;  %v1328_v42 = vpop.eup %1327  ;;  %v957_v48 = vadd.f32 -1.0, %v474_v31 }
  0x8b   : > { %1195 = vst [vmem:[%s1532_s25 + $0x60] sm:$0xff] %v1152_v13   ;;  %v694_v21 = vsel %vm630_vm10, %v1670_v54, %v662_v22  ;;  %v600_v24 = vmul.f32 %v1328_v42, %v955_v40  ;;  %v958_v63 = vadd.f32 -1.0, %v475_v4 }
  0x8c   : > { %v663_v36 = vmul.f32 %v599_v35, %v1673_v56  ;;  %1331 = vrcp.f32 %v538_v59 }
  0x8d   : > { %1333 = vrcp.f32 %v539_v41  ;;  %v664_v1 = vmul.f32 %v600_v24, %v1685_v16 }
  0x8e   : > { %v695_v60 = vsel %vm631_vm11, %v1673_v56, %v663_v36 }
  0x8f   : > { %v1157_v43 = vpack.c.bf16 %v695_v60, %v694_v21  ;;  %v696_v46 = vsel %vm632_vm12, %v1685_v16, %v664_v1 }
  0x91   : > { %1196 = vst [vmem:[%s1532_s25 + $0x68] sm:$0xff] %v1157_v43  }
  0x94   : > { %v1330_v62 = vpop.eup %1329 }
  0x95   : > { %v601_v39 = vmul.f32 %v1330_v62, %v956_v45 }
  0x97   : > { %v665_v54 = vmul.f32 %v601_v39, %v1690_v18 }
  0x99   : > { %v697_v56 = vsel %vm633_vm13, %v1690_v18, %v665_v54  ;;  %v1332_v51 = vpop.eup %1331 }
  0x9a   : > { %v1162_v23 = vpack.c.bf16 %v697_v56, %v696_v46  ;;  %v1334_v44 = vpop.eup %1333  ;;  %v602_v49 = vmul.f32 %v1332_v51, %v957_v48 }
  0x9b   : > { %v603_v53 = vmul.f32 %v1334_v44, %v958_v63 }
  0x9c   : > { %1197 = vst [vmem:[%s1532_s25 + $0x70] sm:$0xff] %v1162_v23   ;;  %v666_v26 = vmul.f32 %v602_v49, %v1707_v38 }
  0x9d   : > { %v667_v19 = vmul.f32 %v603_v53, %v1710_v61 }
  0x9e   : > { %v698_v16 = vsel %vm634_vm14, %v1707_v38, %v666_v26 }
  0x9f   : > { %v699_v3 = vsel %vm635_vm15, %v1710_v61, %v667_v19 }
  0xa0   : > { %v1167_v18 = vpack.c.bf16 %v699_v3, %v698_v16 }
  0xa2   : > { %1198 = vst [vmem:[%s1532_s25 + $0x78] sm:$0xff] %v1167_v18  }
  0xa3 PF: > { %s13_s12 = sadd.s32 1, %s1341_s12  }
  0xa4   : > { %p10_p4 = scmp.ge.s32.totalorder %s13_s12, 4  }
  0xa6   :  { %12 = sbr.rel (!%p10_p4) target bundleno = 1 (0x1), region = 62 }

// kernel: darknet_forward.14
= control target key start
LH: loop header
LB: loop body
LE: loop exit
PB: predicated region body
PF: predicated region fallthrough
CT: control target
= control target key end

     0   :  { %s1260_s15 = smov 0   ;;  %s1425_s0 = inlined_call_operand.vmem [shape: bf16[512,27], index: 0, kind: input, shape index: {}]   ;;  %s1426_s1 = inlined_call_operand.vmem [shape: bf16[27,128], index: 1, kind: input, shape index: {}]   ;;  %s1427_s2 = inlined_call_operand.vmem [shape: bf16[512,128], index: 2, kind: output, shape index: {0}]   ;;  %s1428_s3 = inlined_call_operand.vmem [shape: f32[2,1,128], index: 3, kind: output, shape index: {1}]   ;;  %s1429_s4 = inlined_call_operand.vmem [shape: f32[2,1,128], index: 4, kind: output, shape index: {2}]  }
   0x1 LB: > { %s1266_s16 = sadd.s32 4294967295, %s1232_s15   ;;  %p941_p0 = scmp.ge.s32.totalorder %s1232_s15, 1  ;;  %s1232_s15 = sphi %s1260_s15, %s15_s15  }
   0x2   : > { %p168_p1 = scmp.lt.s32.totalorder %s1232_s15, 3 }
   0x4   : > { %p169_p2 = pnand %p941_p0, %p168_p1 }
   0x5   : > { %s942_s19 = sshll.u32 (!%p169_p2), %s1266_s16, 5  ;;  %p212_p4 = scmp.lt.s32.totalorder (!%p169_p2), %s1266_s16, 1 }
   0x6   : > { %172 = sbr.rel (%p169_p2) target bundleno = 300 (0x12c), region = 28  ;;  %p201_p3 = scmp.lt.s32.totalorder (!%p169_p2), %s942_s19, 63 }
   0xb   : > { %v1208_v0 = vld [vmem:[%s1426_s1 + $0x8] sm:$0x3f]   ;;  %vm395_vm0 = vcmask 1044480   ;;  %vm396_vm1 = vcmask 1045504   ;;  %v1234_v1 = vmov 65535   ;;  %v1209_v5 = vld [vmem:[%s1426_s1] sm:$0xff]  }
   0xc   : > { %v397_v2 = vsel %vm395_vm0, 4294967295, %v1234_v1  ;;  %s1431_s19 = smov (!%p201_p3, %s942_s19), 63  ;;  %vm346_vm2 = vcmask 220160   ;;  %s1433_s16 = smov (!%p212_p4, %s1266_s16), 1 }
   0xd   : > { %v398_v3 = vsel %vm396_vm1, %v397_v2, 0  ;;  %s943_s22 = sshll.u32 %s1431_s19, 2  ;;  %s214_s5 = scalar_lea.vmem %s1428_s3, %s1433_s16 }
   0xe   : > { %v400_v4 = vand.u32 %v1208_v0, %v398_v3  ;;  %s1285_s25 = scalar_lea.vmem %s1425_s0, %s943_s22  ;;  %s1324_s28 = scalar_lea.vmem %s1427_s2, %s943_s22 }
   0xf   : > { %v1210_v6 = vld [vmem:[%s1285_s25] sm:$0xff]   ;;  %v1211_v7 = vld [vmem:[%s1285_s25 + $0x8] sm:$0xff]   ;;  %v1212_v8 = vld [vmem:[%s1285_s25 + $0x10] sm:$0xff]   ;;  %s217_s8 = scalar_lea.vmem %s1429_s4, %s1433_s16 }
  0x10   : > { %1159 = vmatprep.subr.bf16.mxu0 %v400_v4  ;;  %1195 = vmatprep.subr.bf16.mxu1 %v400_v4  ;;  %v1213_v9 = vld [vmem:[%s1285_s25 + $0x18] sm:$0xff]   ;;  %v1214_v10 = vld [vmem:[%s1285_s25 + $0x20] sm:$0xff]   ;;  %v1219_v12 = vld [vmem:[%s1285_s25 + $0x48] sm:$0xff]  }
  0x11   : > { %1160 = vmatpush3.bf16.msra.mxu0 %v400_v4  ;;  %1197 = vmatpush3.bf16.msra.mxu1 %v400_v4  ;;  %v1218_v11 = vld [vmem:[%s1285_s25 + $0x40] sm:$0xff]   ;;  %v1220_v13 = vld [vmem:[%s1285_s25 + $0x50] sm:$0xff]   ;;  %v1221_v14 = vld [vmem:[%s1285_s25 + $0x58] sm:$0xff]  }
  0x12   : > { %1161 = vmatprep.subr.bf16.mxu0 %v1209_v5  ;;  %1196 = vmatprep.subr.bf16.mxu1 %v1209_v5  ;;  %v1222_v15 = vld [vmem:[%s1285_s25 + $0x60] sm:$0xff]   ;;  %v1215_v16 = vld [vmem:[%s1285_s25 + $0x28] sm:$0xff]   ;;  %v1216_v17 = vld [vmem:[%s1285_s25 + $0x30] sm:$0xff]  }
  0x13   : > { %1163 = vmatprep.mubr.msk.bf16.mxu0 %vm346_vm2, %v1210_v6  ;;  %1179 = vmatprep.mubr.msk.bf16.mxu1 %vm346_vm2, %v1218_v11  ;;  %v1223_v18 = vld [vmem:[%s1285_s25 + $0x68] sm:$0xff]   ;;  %v1224_v19 = vld [vmem:[%s1285_s25 + $0x70] sm:$0xff]   ;;  %v1217_v20 = vld [vmem:[%s1285_s25 + $0x38] sm:$0xff]  }
  0x14   : > { %v1225_v21 = vld [vmem:[%s1285_s25 + $0x78] sm:$0xff]  }
  0x15   : > { %1162 = vmatpush3.bf16.msra.mxu0 %v1209_v5  ;;  %1198 = vmatpush3.bf16.msra.mxu1 %v1209_v5 }
  0x18   : > { %1164 = vmatmul.mubr.msk.bf16.vlgmr.msra.gmra.mxu0 %vm346_vm2, %v1211_v7  ;;  %1180 = vmatmul.mubr.msk.bf16.vlgmr.msra.gmra.mxu1 %vm346_vm2, %v1219_v12 }
  0x19   : > { %1167 = vmatprep.mubr.msk.bf16.mxu0 %vm346_vm2, %v1212_v8  ;;  %1183 = vmatprep.mubr.msk.bf16.mxu1 %vm346_vm2, %v1220_v13 }
  0x20   : > { %1168 = vmatmul.mubr.msk.bf16.gmra.mxu0 %vm346_vm2, %v1213_v9  ;;  %1184 = vmatmul.mubr.msk.bf16.gmra.mxu1 %vm346_vm2, %v1221_v14 }
  0x21   : > { %1171 = vmatprep.mubr.msk.bf16.mxu0 %vm346_vm2, %v1214_v10  ;;  %1187 = vmatprep.mubr.msk.bf16.mxu1 %vm346_vm2, %v1222_v15 }
  0x28   : > { %1172 = vmatmul.mubr.msk.bf16.gmra.mxu0 %vm346_vm2, %v1215_v16  ;;  %1188 = vmatmul.mubr.msk.bf16.gmra.mxu1 %vm346_vm2, %v1223_v18 }
  0x29   : > { %1175 = vmatprep.mubr.msk.bf16.mxu0 %vm346_vm2, %v1216_v17  ;;  %1191 = vmatprep.mubr.msk.bf16.mxu1 %vm346_vm2, %v1224_v19 }
  0x30   : > { %1176 = vmatmul.mubr.msk.bf16.gmra.mxu0 %vm346_vm2, %v1217_v20  ;;  %1192 = vmatmul.mubr.msk.bf16.gmra.mxu1 %vm346_vm2, %v1225_v21 }
  0xd8   : > { %v1165_v22 = vpop.f32.mrf.mxu0  ;;  %v1326_v27 = vpop.f32.mrf.mxu1 }
  0xd9   : > { %v763_v34 = vmul.f32 %v1165_v22, %v1165_v22 }
  0xda   : > { %v436_v23 = vpop.f32.mrf.mxu0  ;;  %v1329_v33 = vpop.f32.mrf.mxu1 }
  0xdb   : > { %v761_v28 = vmul.f32 %v436_v23, %v436_v23 }
  0xdc   : > { %v1166_v24 = vpop.f32.mrf.mxu0  ;;  %v1332_v38 = vpop.f32.mrf.mxu1 }
  0xdd   : > { %v1054_v25 = vpack.c.bf16 %v1166_v24, %v1165_v22  ;;  %v764_v39 = vmul.f32 %v1166_v24, %v1166_v24  ;;  %v1094_v42 = vpack.c.bf16 %v1332_v38, %v1326_v27 }
  0xde   : > { %v439_v26 = vpop.f32.mrf.mxu0  ;;  %v1336_v44 = vpop.f32.mrf.mxu1 }
  0xdf   : > { %1126 = vst [vmem:[%s1324_s28 + $0x8] sm:$0xff] %v1054_v25   ;;  %v1049_v29 = vpack.c.bf16 %v439_v26, %v436_v23  ;;  %v723_v30 = vadd.f32 %v439_v26, %v436_v23  ;;  %v762_v31 = vmul.f32 %v439_v26, %v439_v26  ;;  %1134 = vst [vmem:[%s1324_s28 + $0x48] sm:$0xff] %v1094_v42  }
  0xe0   : > { %v1169_v32 = vpop.f32.mrf.mxu0  ;;  %v1089_v50 = vpack.c.bf16 %v1336_v44, %v1329_v33  ;;  %v1341_v51 = vpop.f32.mrf.mxu1 }
  0xe1   : > { %1050 = vst [vmem:[%s1324_s28] sm:$0xff] %v1049_v29   ;;  %v724_v35 = vadd.f32 %v1165_v22, %v723_v30  ;;  %v793_v36 = vadd.f32 %v762_v31, %v761_v28  ;;  %v767_v58 = vmul.f32 %v1169_v32, %v1169_v32 }
  0xe2   : > { %v452_v37 = vpop.f32.mrf.mxu0  ;;  %1133 = vst [vmem:[%s1324_s28 + $0x40] sm:$0xff] %v1089_v50   ;;  %v1345_v57 = vpop.f32.mrf.mxu1 }
  0xe3   : > { %v794_v40 = vadd.f32 %v793_v36, %v763_v34  ;;  %v725_v41 = vadd.f32 %v1166_v24, %v724_v35  ;;  %v765_v46 = vmul.f32 %v452_v37, %v452_v37 }
  0xe4   : > { %v1170_v43 = vpop.f32.mrf.mxu0  ;;  %v1348_v62 = vpop.f32.mrf.mxu1 }
  0xe5   : > { %v726_v45 = vadd.f32 %v725_v41, %v452_v37  ;;  %v795_v47 = vadd.f32 %v794_v40, %v764_v39  ;;  %v1064_v48 = vpack.c.bf16 %v1170_v43, %v1169_v32  ;;  %v768_v63 = vmul.f32 %v1170_v43, %v1170_v43 }
  0xe6   : > { %v455_v49 = vpop.f32.mrf.mxu0  ;;  %v1104_v2 = vpack.c.bf16 %v1348_v62, %v1341_v51  ;;  %v1352_v4 = vpop.f32.mrf.mxu1 }
  0xe7   : > { %v796_v52 = vadd.f32 %v795_v47, %v765_v46  ;;  %1128 = vst [vmem:[%s1324_s28 + $0x18] sm:$0xff] %v1064_v48   ;;  %v1059_v53 = vpack.c.bf16 %v455_v49, %v452_v37  ;;  %v727_v54 = vadd.f32 %v726_v45, %v455_v49  ;;  %v766_v55 = vmul.f32 %v455_v49, %v455_v49 }
  0xe8   : > { %v1173_v56 = vpop.f32.mrf.mxu0  ;;  %1136 = vst [vmem:[%s1324_s28 + $0x58] sm:$0xff] %v1104_v2   ;;  %v1099_v10 = vpack.c.bf16 %v1352_v4, %v1345_v57  ;;  %v1357_v11 = vpop.f32.mrf.mxu1 }
  0xe9   : > { %1127 = vst [vmem:[%s1324_s28 + $0x10] sm:$0xff] %v1059_v53   ;;  %v728_v59 = vadd.f32 %v1169_v32, %v727_v54  ;;  %v797_v60 = vadd.f32 %v796_v52, %v766_v55  ;;  %v771_v18 = vmul.f32 %v1173_v56, %v1173_v56  ;;  %v777_v55 = vmul.f32 %v1329_v33, %v1329_v33 }
  0xea   : > { %v468_v61 = vpop.f32.mrf.mxu0  ;;  %1135 = vst [vmem:[%s1324_s28 + $0x50] sm:$0xff] %v1099_v10   ;;  %v1361_v17 = vpop.f32.mrf.mxu1  ;;  %v782_v10 = vmul.f32 %v1352_v4, %v1352_v4 }
  0xeb   : > { %v798_v0 = vadd.f32 %v797_v60, %v767_v58  ;;  %v729_v1 = vadd.f32 %v1170_v43, %v728_v59  ;;  %v769_v6 = vmul.f32 %v468_v61, %v468_v61 }
  0xec   : > { %v1174_v3 = vpop.f32.mrf.mxu0  ;;  %v1364_v22 = vpop.f32.mrf.mxu1 }
  0xed   : > { %v730_v5 = vadd.f32 %v729_v1, %v468_v61  ;;  %v799_v7 = vadd.f32 %v798_v0, %v768_v63  ;;  %v1074_v8 = vpack.c.bf16 %v1174_v3, %v1173_v56  ;;  %v772_v23 = vmul.f32 %v1174_v3, %v1174_v3 }
  0xee   : > { %v471_v9 = vpop.f32.mrf.mxu0  ;;  %v1114_v26 = vpack.c.bf16 %v1364_v22, %v1357_v11  ;;  %v535_v29 = vpop.f32.mrf.mxu1  ;;  %v779_v0 = vmul.f32 %v1326_v27, %v1326_v27 }
  0xef   : > { %v800_v12 = vadd.f32 %v799_v7, %v769_v6  ;;  %1130 = vst [vmem:[%s1324_s28 + $0x28] sm:$0xff] %v1074_v8   ;;  %v1069_v13 = vpack.c.bf16 %v471_v9, %v468_v61  ;;  %v731_v14 = vadd.f32 %v730_v5, %v471_v9  ;;  %v770_v15 = vmul.f32 %v471_v9, %v471_v9 }
  0xf0   : > { %v1177_v16 = vpop.f32.mrf.mxu0  ;;  %1138 = vst [vmem:[%s1324_s28 + $0x68] sm:$0xff] %v1114_v26   ;;  %v1109_v36 = vpack.c.bf16 %v535_v29, %v1361_v17  ;;  %v1370_v37 = vpop.f32.mrf.mxu1  ;;  %v778_v61 = vmul.f32 %v1336_v44, %v1336_v44  ;;  %v781_v7 = vmul.f32 %v1345_v57, %v1345_v57 }
  0xf1   : > { %1129 = vst [vmem:[%s1324_s28 + $0x20] sm:$0xff] %v1069_v13   ;;  %v732_v19 = vadd.f32 %v1173_v56, %v731_v14  ;;  %v801_v20 = vadd.f32 %v800_v12, %v770_v15  ;;  %v775_v45 = vmul.f32 %v1177_v16, %v1177_v16 }
  0xf2   : > { %v484_v21 = vpop.f32.mrf.mxu0  ;;  %1137 = vst [vmem:[%s1324_s28 + $0x60] sm:$0xff] %v1109_v36   ;;  %v548_v43 = vpop.f32.mrf.mxu1 }
  0xf3   : > { %v802_v24 = vadd.f32 %v801_v20, %v771_v18  ;;  %v733_v25 = vadd.f32 %v1174_v3, %v732_v19  ;;  %v773_v31 = vmul.f32 %v484_v21, %v484_v21  ;;  %v780_v3 = vmul.f32 %v1332_v38, %v1332_v38 }
  0xf4   : > { %v1178_v28 = vpop.f32.mrf.mxu0  ;;  %v1194_v48 = vpop.f32.mrf.mxu1  ;;  %v786_v20 = vmul.f32 %v535_v29, %v535_v29 }
  0xf5   : > { %v734_v30 = vadd.f32 %v733_v25, %v484_v21  ;;  %v803_v32 = vadd.f32 %v802_v24, %v772_v23  ;;  %v1084_v34 = vpack.c.bf16 %v1178_v28, %v1177_v16  ;;  %v776_v49 = vmul.f32 %v1178_v28, %v1178_v28 }
  0xf6   : > { %v487_v35 = vpop.f32.mrf.mxu0  ;;  %v1124_v53 = vpack.c.bf16 %v1194_v48, %v1370_v37  ;;  %v551_v54 = vpop.f32.mrf.mxu1  ;;  %v788_v24 = vmul.f32 %v1364_v22, %v1364_v22 }
  0xf7   : > { %v804_v39 = vadd.f32 %v803_v32, %v773_v31  ;;  %1132 = vst [vmem:[%s1324_s28 + $0x38] sm:$0xff] %v1084_v34   ;;  %v1079_v40 = vpack.c.bf16 %v487_v35, %v484_v21  ;;  %v735_v41 = vadd.f32 %v734_v30, %v487_v35  ;;  %v774_v42 = vmul.f32 %v487_v35, %v487_v35 }
  0xf8   : > { %1140 = vst [vmem:[%s1324_s28 + $0x78] sm:$0xff] %v1124_v53   ;;  %v1119_v59 = vpack.c.bf16 %v551_v54, %v548_v43  ;;  %v787_v21 = vmul.f32 %v1357_v11, %v1357_v11  ;;  %v791_v32 = vmul.f32 %v1370_v37, %v1370_v37  ;;  %v792_v35 = vmul.f32 %v1194_v48, %v1194_v48 }
  0xf9   : > { %1131 = vst [vmem:[%s1324_s28 + $0x30] sm:$0xff] %v1079_v40   ;;  %v736_v46 = vadd.f32 %v1177_v16, %v735_v41  ;;  %v805_v47 = vadd.f32 %v804_v39, %v774_v42  ;;  %v785_v16 = vmul.f32 %v1361_v17, %v1361_v17 }
  0xfa   : > { %1139 = vst [vmem:[%s1324_s28 + $0x70] sm:$0xff] %v1119_v59  }
  0xfb   : > { %v737_v50 = vadd.f32 %v1178_v28, %v736_v46  ;;  %v806_v52 = vadd.f32 %v805_v47, %v775_v45  ;;  %v789_v28 = vmul.f32 %v548_v43, %v548_v43 }
  0xfd   : > { %v807_v56 = vadd.f32 %v806_v52, %v776_v49  ;;  %v738_v58 = vadd.f32 %v737_v50, %v1329_v33 }
  0xff   : > { %v739_v60 = vadd.f32 %v738_v58, %v1336_v44  ;;  %v808_v63 = vadd.f32 %v807_v56, %v777_v55 }
 0x101   : > { %v740_v1 = vadd.f32 %v1326_v27, %v739_v60  ;;  %v809_v2 = vadd.f32 %v808_v63, %v778_v61  ;;  %v783_v27 = vmul.f32 %v1341_v51, %v1341_v51 }
 0x103   : > { %v810_v5 = vadd.f32 %v809_v2, %v779_v0  ;;  %v741_v33 = vadd.f32 %v1332_v38, %v740_v1  ;;  %v784_v38 = vmul.f32 %v1348_v62, %v1348_v62 }
 0x105   : > { %v742_v6 = vadd.f32 %v741_v33, %v1345_v57  ;;  %v811_v44 = vadd.f32 %v810_v5, %v780_v3 }
 0x107   : > { %v812_v8 = vadd.f32 %v811_v44, %v781_v7  ;;  %v743_v9 = vadd.f32 %v742_v6, %v1352_v4 }
 0x109   : > { %v744_v12 = vadd.f32 %v1341_v51, %v743_v9  ;;  %v813_v13 = vadd.f32 %v812_v8, %v782_v10 }
 0x10b   : > { %v814_v14 = vadd.f32 %v813_v13, %v783_v27  ;;  %v745_v15 = vadd.f32 %v1348_v62, %v744_v12 }
 0x10d   : > { %v746_v57 = vadd.f32 %v745_v15, %v1361_v17  ;;  %v815_v18 = vadd.f32 %v814_v14, %v784_v38 }
 0x10f   : > { %v816_v19 = vadd.f32 %v815_v18, %v785_v16  ;;  %v747_v4 = vadd.f32 %v746_v57, %v535_v29  ;;  %v790_v29 = vmul.f32 %v551_v54, %v551_v54 }
 0x111   : > { %v748_v51 = vadd.f32 %v1357_v11, %v747_v4  ;;  %v817_v23 = vadd.f32 %v816_v19, %v786_v20 }
 0x113   : > { %v818_v25 = vadd.f32 %v817_v23, %v787_v21  ;;  %v749_v62 = vadd.f32 %v1364_v22, %v748_v51 }
 0x115   : > { %v750_v26 = vadd.f32 %v749_v62, %v548_v43  ;;  %v819_v17 = vadd.f32 %v818_v25, %v788_v24 }
 0x117   : > { %v820_v30 = vadd.f32 %v819_v17, %v789_v28  ;;  %v751_v31 = vadd.f32 %v750_v26, %v551_v54 }
 0x119   : > { %v752_v11 = vadd.f32 %v1370_v37, %v751_v31  ;;  %v821_v34 = vadd.f32 %v820_v30, %v790_v29 }
 0x11b   : > { %v753_v36 = vadd.f32 %v1194_v48, %v752_v11  ;;  %v822_v39 = vadd.f32 %v821_v34, %v791_v32 }
 0x11d   : > { %v754_v40 = vrot.slane %v753_v36, 4  ;;  %v823_v41 = vadd.f32 %v822_v39, %v792_v35 }
 0x11f   : > { %v755_v22 = vadd.f32 %v754_v40, %v753_v36  ;;  %v824_v42 = vrot.slane %v823_v41, 4 }
 0x121   : > { %v756_v43 = vrot.slane %v755_v22, 2  ;;  %v825_v45 = vadd.f32 %v824_v42, %v823_v41 }
 0x123   : > { %v757_v46 = vadd.f32 %v756_v43, %v755_v22  ;;  %v826_v47 = vrot.slane %v825_v45, 2 }
 0x125   : > { %v758_v49 = vrot.slane %v757_v46, 1  ;;  %v827_v50 = vadd.f32 %v826_v47, %v825_v45 }
 0x127   : > { %v759_v37 = vadd.f32 %v758_v49, %v757_v46  ;;  %v828_v52 = vrot.slane %v827_v50, 1 }
 0x129   : > { %760 = vst [vmem:[%s214_s5] sm:$0x1] %v759_v37  ;;  %v829_v48 = vadd.f32 %v828_v52, %v827_v50 }
 0x12b   : > { %830 = vst [vmem:[%s217_s8] sm:$0x1] %v829_v48 }
 0x12c PF: > { %s15_s15 = sadd.s32 1, %s1232_s15  }
 0x12d   : > { %p12_p5 = scmp.ge.s32.totalorder %s15_s15, 4  }
 0x12f   :  { %14 = sbr.rel (!%p12_p5) target bundleno = 1 (0x1), region = 82 }

// kernel: darknet_forward.16
= control target key start
LH: loop header
LB: loop body
LE: loop exit
PB: predicated region body
PF: predicated region fallthrough
CT: control target
= control target key end

     0   :  { %s699_s15 = smov 0   ;;  %s749_s0 = inlined_call_operand.vmem [shape: bf16[128,72], index: 0, kind: input, shape index: {}]   ;;  %s750_s1 = inlined_call_operand.vmem [shape: bf16[72,128], index: 1, kind: input, shape index: {}]   ;;  %s751_s2 = inlined_call_operand.vmem [shape: bf16[128,128], index: 2, kind: output, shape index: {0}]   ;;  %s752_s3 = inlined_call_operand.vmem [shape: f32[2,1,128], index: 3, kind: output, shape index: {1}]   ;;  %s753_s4 = inlined_call_operand.vmem [shape: f32[2,1,128], index: 4, kind: output, shape index: {2}]  }
   0x1 LB: > { %s705_s16 = sadd.s32 4294967295, %s672_s15   ;;  %p551_p0 = scmp.ge.s32.totalorder %s672_s15, 1  ;;  %s672_s15 = sphi %s699_s15, %s15_s15  }
   0x2   : > { %p168_p1 = scmp.lt.s32.totalorder %s672_s15, 3 }
   0x4   : > { %p169_p2 = pnand %p551_p0, %p168_p1 }
   0x5   : > { %s552_s21 = sshll.u32 (!%p169_p2), %s705_s16, 3  ;;  %p212_p4 = scmp.lt.s32.totalorder (!%p169_p2), %s705_s16, 1 }
   0x6   : > { %172 = sbr.rel (%p169_p2) target bundleno = 260 (0x104), region = 28  ;;  %p201_p3 = scmp.lt.s32.totalorder (!%p169_p2), %s552_s21, 15 }
   0xb   : > { %v657_v0 = vld [vmem:[%s750_s1 + $0x20] ss:$0 sps:$4 sm:$0xff]   ;;  %vm296_vm0 = vcmask 1043456   ;;  %v658_v1 = vld [vmem:[%s750_s1 + $0x18] sm:$0xff]   ;;  %v659_v3 = vld [vmem:[%s750_s1 + $0x10] sm:$0xff]   ;;  %s755_s21 = smov (!%p201_p3, %s552_s21), 15 }
   0xc   : > { %647 = vmatprep.subr.msk.bf16.mxu0 %vm296_vm0, %v657_v0  ;;  %v298_v2 = vsel %vm296_vm0, %v657_v0, 0  ;;  %648 = vmatprep.subr.msk.bf16.mxu1 %vm296_vm0, %v657_v0  ;;  %v660_v4 = vld [vmem:[%s750_s1 + $0x8] sm:$0xff]   ;;  %s553_s26 = sshll.u32 %s755_s21, 2  ;;  %vm283_vm1 = vcmask 588800   ;;  %v661_v6 = vld [vmem:[%s750_s1] sm:$0xff]   ;;  %s757_s16 = smov (!%p212_p4, %s705_s16), 1 }
   0xd   : > { %620 = vmatpush3.bf16.msra.mxu0 %v298_v2  ;;  %642 = vmatpush3.bf16.msra.mxu1 %v298_v2  ;;  %s204_s29 = scalar_lea.vmem %s749_s0, %s553_s26  ;;  %s210_s8 = scalar_lea.vmem %s751_s2, %s553_s26 }
   0xe   : > { %621 = vmatprep.subr.bf16.mxu0 %v658_v1  ;;  %638 = vmatprep.subr.bf16.mxu1 %v658_v1  ;;  %v662_v5 = vld [vmem:[%s204_s29] sm:$0xff]   ;;  %v664_v7 = vld [vmem:[%s204_s29 + $0x10] sm:$0xff]   ;;  %v663_v8 = vld [vmem:[%s204_s29 + $0x8] sm:$0xff]   ;;  %s214_s11 = scalar_lea.vmem %s752_s3, %s757_s16  ;;  %s217_s14 = scalar_lea.vmem %s753_s4, %s757_s16 }
   0xf   : > { %629 = vmatprep.mubr.msk.bf16.mxu0 %vm283_vm1, %v662_v5  ;;  %633 = vmatprep.mubr.msk.bf16.mxu1 %vm283_vm1, %v664_v7  ;;  %v665_v9 = vld [vmem:[%s204_s29 + $0x18] sm:$0xff]  }
  0x11   : > { %622 = vmatpush3.bf16.msra.mxu0 %v658_v1  ;;  %643 = vmatpush3.bf16.msra.mxu1 %v658_v1 }
  0x12   : > { %623 = vmatprep.subr.bf16.mxu0 %v659_v3  ;;  %639 = vmatprep.subr.bf16.mxu1 %v659_v3 }
  0x15   : > { %624 = vmatpush3.bf16.msra.mxu0 %v659_v3  ;;  %644 = vmatpush3.bf16.msra.mxu1 %v659_v3 }
  0x16   : > { %625 = vmatprep.subr.bf16.mxu0 %v660_v4  ;;  %640 = vmatprep.subr.bf16.mxu1 %v660_v4 }
  0x19   : > { %626 = vmatpush3.bf16.msra.mxu0 %v660_v4  ;;  %645 = vmatpush3.bf16.msra.mxu1 %v660_v4 }
  0x1a   : > { %627 = vmatprep.subr.bf16.mxu0 %v661_v6  ;;  %641 = vmatprep.subr.bf16.mxu1 %v661_v6 }
  0x1d   : > { %628 = vmatpush3.bf16.msra.mxu0 %v661_v6  ;;  %646 = vmatpush3.bf16.msra.mxu1 %v661_v6 }
  0x20   : > { %630 = vmatmul.mubr.msk.bf16.vlgmr.msra.gmra.mxu0 %vm283_vm1, %v663_v8  ;;  %634 = vmatmul.mubr.msk.bf16.vlgmr.msra.gmra.mxu1 %vm283_vm1, %v665_v9 }
  0xe0   : > { %v631_v10 = vpop.f32.mrf.mxu0  ;;  %v635_v11 = vpop.f32.mrf.mxu1 }
  0xe1   : > { %v421_v25 = vmul.f32 %v631_v10, %v631_v10  ;;  %v425_v37 = vmul.f32 %v635_v11, %v635_v11 }
  0xe2   : > { %v334_v12 = vpop.f32.mrf.mxu0  ;;  %v350_v13 = vpop.f32.mrf.mxu1 }
  0xe3   : > { %v419_v18 = vmul.f32 %v334_v12, %v334_v12  ;;  %v423_v31 = vmul.f32 %v350_v13, %v350_v13 }
  0xe4   : > { %v632_v14 = vpop.f32.mrf.mxu0  ;;  %v636_v15 = vpop.f32.mrf.mxu1 }
  0xe5   : > { %v595_v16 = vpack.c.bf16 %v632_v14, %v631_v10  ;;  %v605_v17 = vpack.c.bf16 %v636_v15, %v635_v11  ;;  %v422_v28 = vmul.f32 %v632_v14, %v632_v14  ;;  %v426_v40 = vmul.f32 %v636_v15, %v636_v15 }
  0xe6   : > { %v337_v19 = vpop.f32.mrf.mxu0  ;;  %v353_v20 = vpop.f32.mrf.mxu1 }
  0xe7   : > { %607 = vst [vmem:[%s210_s8 + $0x8] sm:$0xff] %v595_v16   ;;  %v590_v21 = vpack.c.bf16 %v337_v19, %v334_v12  ;;  %v405_v22 = vadd.f32 %v337_v19, %v334_v12  ;;  %v420_v23 = vmul.f32 %v337_v19, %v337_v19  ;;  %609 = vst [vmem:[%s210_s8 + $0x18] sm:$0xff] %v605_v17  }
  0xe8   : > { %v600_v24 = vpack.c.bf16 %v353_v20, %v350_v13  ;;  %v424_v35 = vmul.f32 %v353_v20, %v353_v20 }
  0xe9   : > { %591 = vst [vmem:[%s210_s8] sm:$0xff] %v590_v21   ;;  %v406_v26 = vadd.f32 %v631_v10, %v405_v22  ;;  %v427_v27 = vadd.f32 %v420_v23, %v419_v18 }
  0xea   : > { %608 = vst [vmem:[%s210_s8 + $0x10] sm:$0xff] %v600_v24  }
  0xeb   : > { %v428_v29 = vadd.f32 %v427_v27, %v421_v25  ;;  %v407_v30 = vadd.f32 %v632_v14, %v406_v26 }
  0xed   : > { %v408_v32 = vadd.f32 %v407_v30, %v350_v13  ;;  %v429_v33 = vadd.f32 %v428_v29, %v422_v28 }
  0xef   : > { %v409_v34 = vadd.f32 %v408_v32, %v353_v20  ;;  %v430_v36 = vadd.f32 %v429_v33, %v423_v31 }
  0xf1   : > { %v410_v38 = vadd.f32 %v635_v11, %v409_v34  ;;  %v431_v39 = vadd.f32 %v430_v36, %v424_v35 }
  0xf3   : > { %v411_v41 = vadd.f32 %v636_v15, %v410_v38  ;;  %v432_v42 = vadd.f32 %v431_v39, %v425_v37 }
  0xf5   : > { %v412_v43 = vrot.slane %v411_v41, 4  ;;  %v433_v44 = vadd.f32 %v432_v42, %v426_v40 }
  0xf7   : > { %v413_v45 = vadd.f32 %v412_v43, %v411_v41  ;;  %v434_v46 = vrot.slane %v433_v44, 4 }
  0xf9   : > { %v414_v47 = vrot.slane %v413_v45, 2  ;;  %v435_v48 = vadd.f32 %v434_v46, %v433_v44 }
  0xfb   : > { %v415_v49 = vadd.f32 %v414_v47, %v413_v45  ;;  %v436_v50 = vrot.slane %v435_v48, 2 }
  0xfd   : > { %v416_v51 = vrot.slane %v415_v49, 1  ;;  %v437_v52 = vadd.f32 %v436_v50, %v435_v48 }
  0xff   : > { %v417_v53 = vadd.f32 %v416_v51, %v415_v49  ;;  %v438_v54 = vrot.slane %v437_v52, 1 }
 0x101   : > { %418 = vst [vmem:[%s214_s11] sm:$0x1] %v417_v53  ;;  %v439_v55 = vadd.f32 %v438_v54, %v437_v52 }
 0x103   : > { %440 = vst [vmem:[%s217_s14] sm:$0x1] %v439_v55 }
 0x104 PF: > { %s15_s15 = sadd.s32 1, %s672_s15  }
 0x105   : > { %p12_p5 = scmp.ge.s32.totalorder %s15_s15, 4  }
 0x107   :  { %14 = sbr.rel (!%p12_p5) target bundleno = 1 (0x1), region = 82 }

// kernel: darknet_forward.17
= control target key start
LH: loop header
LB: loop body
LE: loop exit
PB: predicated region body
PF: predicated region fallthrough
CT: control target
= control target key end

     0   :  { %s559_s12 = smov 0   ;;  %s643_s0 = inlined_call_operand.vmem [shape: bf16[128,128], index: 0, kind: input, shape index: {}]   ;;  %s644_s1 = inlined_call_operand.vmem [shape: f32[1,128], index: 1, kind: input, shape index: {}]   ;;  %s645_s2 = inlined_call_operand.vmem [shape: f32[1,128], index: 2, kind: input, shape index: {}]   ;;  %s646_s3 = inlined_call_operand.vmem [shape: bf16[128,128], index: 3, kind: output, shape index: {}]  }
   0x1 LB: > { %s412_s13 = sadd.s32 4294967295, %s537_s12   ;;  %p416_p0 = scmp.ge.s32.totalorder %s537_s12, 1  ;;  %s537_s12 = sphi %s559_s12, %s13_s12  }
   0x2   : > { %p138_p1 = scmp.lt.s32.totalorder %s537_s12, 3 }
   0x4   : > { %p139_p2 = pnand %p416_p0, %p138_p1 }
   0x5   : > { %s417_s14 = sshll.u32 (!%p139_p2), %s412_s13, 3 }
   0x6   : > { %142 = sbr.rel (%p139_p2) target bundleno = 74 (0x4a), region = 32  ;;  %p163_p3 = scmp.lt.s32.totalorder (!%p139_p2), %s417_s14, 15 }
   0xb   : > { %s648_s14 = smov (!%p163_p3, %s417_s14), 15  ;;  %v421_v0 = vld [vmem:[%s644_s1] ss:$0 sm:$0xff] }
   0xc   : > { %s418_s15 = sshll.u32 %s648_s14, 2  ;;  %v422_v13 = vld [vmem:[%s645_s2] ss:$0 sm:$0xff] }
   0xd   : > { %s166_s18 = scalar_lea.vmem %s643_s0, %s418_s15  ;;  %s172_s25 = scalar_lea.vmem %s646_s3, %s418_s15 }
   0xe   : > { %v450_v1 = vld [vmem:[%s166_s18] sm:$0xff]   ;;  %v485_v2 = vld [vmem:[%s166_s18 + $0x8] sm:$0xff]   ;;  %v486_v3 = vld [vmem:[%s166_s18 + $0x10] sm:$0xff]  }
   0xf   : > { %v451_v4 = vunpack.c.l.bf16 %v450_v1  ;;  %v452_v5 = vunpack.c.h.bf16 %v450_v1  ;;  %v455_v6 = vunpack.c.l.bf16 %v485_v2  ;;  %v456_v7 = vunpack.c.h.bf16 %v485_v2  ;;  %v487_v8 = vld [vmem:[%s166_s18 + $0x18] sm:$0xff]  }
  0x10   : > { %v459_v9 = vunpack.c.l.bf16 %v486_v3  ;;  %v460_v10 = vunpack.c.h.bf16 %v486_v3  ;;  %v463_v11 = vunpack.c.l.bf16 %v487_v8  ;;  %v464_v12 = vunpack.c.h.bf16 %v487_v8 }
  0x11   : > { %v197_v14 = vmul.f32 %v451_v4, %v421_v0  ;;  %v198_v15 = vmul.f32 %v452_v5, %v421_v0  ;;  %v199_v16 = vmul.f32 %v455_v6, %v421_v0  ;;  %v200_v17 = vmul.f32 %v456_v7, %v421_v0 }
  0x12   : > { %v201_v18 = vmul.f32 %v459_v9, %v421_v0  ;;  %v202_v19 = vmul.f32 %v460_v10, %v421_v0  ;;  %v203_v20 = vmul.f32 %v463_v11, %v421_v0  ;;  %v204_v21 = vmul.f32 %v464_v12, %v421_v0 }
  0x13   : > { %v581_v22 = vadd.f32 %v422_v13, %v197_v14  ;;  %v583_v23 = vadd.f32 %v422_v13, %v198_v15  ;;  %v585_v24 = vadd.f32 %v422_v13, %v199_v16  ;;  %v587_v25 = vadd.f32 %v422_v13, %v200_v17 }
  0x14   : > { %v589_v26 = vadd.f32 %v422_v13, %v201_v18  ;;  %v591_v27 = vadd.f32 %v422_v13, %v202_v19  ;;  %v595_v30 = vadd.f32 %v422_v13, %v203_v20  ;;  %v599_v33 = vadd.f32 %v422_v13, %v204_v21 }
  0x15   : > { %v220_v28 = vmin.f32 %v581_v22, 20.0  ;;  %v221_v29 = vmin.f32 %v583_v23, 20.0  ;;  %v222_v31 = vmin.f32 %v585_v24, 20.0  ;;  %v223_v32 = vmin.f32 %v587_v25, 20.0 }
  0x16   : > { %v224_v36 = vmin.f32 %v589_v26, 20.0  ;;  %v225_v37 = vmin.f32 %v591_v27, 20.0  ;;  %v226_v41 = vmin.f32 %v595_v30, 20.0  ;;  %v227_v43 = vmin.f32 %v599_v33, 20.0 }
  0x17   : > { %v228_v34 = vmul.f32 1.442695, %v220_v28  ;;  %v230_v35 = vmul.f32 1.442695, %v221_v29  ;;  %v232_v38 = vmul.f32 1.442695, %v222_v31 }
  0x18   : > { %v234_v39 = vmul.f32 1.442695, %v223_v32  ;;  %v236_v40 = vmul.f32 1.442695, %v224_v36  ;;  %v238_v42 = vmul.f32 1.442695, %v225_v37 }
  0x19   : > { %499 = vpow2.f32 %v228_v34  ;;  %v240_v44 = vmul.f32 1.442695, %v226_v41  ;;  %v242_v45 = vmul.f32 1.442695, %v227_v43  ;;  %vm292_vm0 = vcmp.gt.f32.partialorder %v581_v22, 20.0 }
  0x1a   : > { %501 = vpow2.f32 %v230_v35  ;;  %vm293_vm1 = vcmp.gt.f32.partialorder %v583_v23, 20.0  ;;  %vm294_vm2 = vcmp.gt.f32.partialorder %v585_v24, 20.0  ;;  %vm295_vm3 = vcmp.gt.f32.partialorder %v587_v25, 20.0 }
  0x1b   : > { %503 = vpow2.f32 %v232_v38  ;;  %vm296_vm4 = vcmp.gt.f32.partialorder %v589_v26, 20.0  ;;  %vm297_vm5 = vcmp.gt.f32.partialorder %v591_v27, 20.0  ;;  %vm298_vm6 = vcmp.gt.f32.partialorder %v595_v30, 20.0 }
  0x1c   : > { %505 = vpow2.f32 %v234_v39  ;;  %vm299_vm7 = vcmp.gt.f32.partialorder %v599_v33, 20.0 }
  0x1d   : > { %507 = vpow2.f32 %v236_v40 }
  0x1e   : > { %509 = vpow2.f32 %v238_v42 }
  0x1f   : > { %511 = vpow2.f32 %v240_v44 }
  0x20   : > { %513 = vpow2.f32 %v242_v45 }
  0x26   : > { %v500_v46 = vpop.eup %499 }
  0x27   : > { %v502_v47 = vpop.eup %501  ;;  %v244_v48 = vadd.f32 1.0, %v500_v46 }
  0x28   : > { %v504_v49 = vpop.eup %503  ;;  %v245_v50 = vadd.f32 1.0, %v502_v47 }
  0x29   : > { %v506_v51 = vpop.eup %505  ;;  %v252_v52 = vmul.f32 %v244_v48, %v244_v48  ;;  %v246_v53 = vadd.f32 1.0, %v504_v49 }
  0x2a   : > { %v508_v54 = vpop.eup %507  ;;  %v253_v55 = vmul.f32 %v245_v50, %v245_v50  ;;  %v247_v56 = vadd.f32 1.0, %v506_v51 }
  0x2b   : > { %v510_v57 = vpop.eup %509  ;;  %v268_v58 = vadd.f32 1.0, %v252_v52  ;;  %v254_v59 = vmul.f32 %v246_v53, %v246_v53  ;;  %v248_v60 = vadd.f32 1.0, %v508_v54  ;;  %v423_v14 = vadd.f32 -1.0, %v252_v52 }
  0x2c   : > { %v512_v61 = vpop.eup %511  ;;  %v269_v62 = vadd.f32 1.0, %v253_v55  ;;  %v255_v63 = vmul.f32 %v247_v56, %v247_v56  ;;  %v249_v0 = vadd.f32 1.0, %v510_v57  ;;  %v424_v15 = vadd.f32 -1.0, %v253_v55 }
  0x2d   : > { %v514_v1 = vpop.eup %513  ;;  %515 = vrcp.f32 %v268_v58  ;;  %v270_v2 = vadd.f32 1.0, %v254_v59  ;;  %v256_v3 = vmul.f32 %v248_v60, %v248_v60  ;;  %v250_v7 = vadd.f32 1.0, %v512_v61 }
  0x2e   : > { %517 = vrcp.f32 %v269_v62  ;;  %v271_v4 = vadd.f32 1.0, %v255_v63  ;;  %v257_v5 = vmul.f32 %v249_v0, %v249_v0  ;;  %v251_v9 = vadd.f32 1.0, %v514_v1 }
  0x2f   : > { %519 = vrcp.f32 %v270_v2  ;;  %v272_v6 = vadd.f32 1.0, %v256_v3  ;;  %v258_v10 = vmul.f32 %v250_v7, %v250_v7  ;;  %v425_v16 = vadd.f32 -1.0, %v254_v59 }
  0x30   : > { %521 = vrcp.f32 %v271_v4  ;;  %v273_v8 = vadd.f32 1.0, %v257_v5  ;;  %v259_v11 = vmul.f32 %v251_v9, %v251_v9  ;;  %v426_v18 = vadd.f32 -1.0, %v255_v63 }
  0x31   : > { %523 = vrcp.f32 %v272_v6  ;;  %v274_v12 = vadd.f32 1.0, %v258_v10  ;;  %v427_v21 = vadd.f32 -1.0, %v256_v3  ;;  %v428_v31 = vadd.f32 -1.0, %v257_v5 }
  0x32   : > { %525 = vrcp.f32 %v273_v8  ;;  %v275_v13 = vadd.f32 1.0, %v259_v11  ;;  %v429_v43 = vadd.f32 -1.0, %v258_v10  ;;  %v430_v47 = vadd.f32 -1.0, %v259_v11 }
  0x33   : > { %527 = vrcp.f32 %v274_v12 }
  0x34   : > { %529 = vrcp.f32 %v275_v13 }
  0x3a   : > { %v516_v17 = vpop.eup %515 }
  0x3b   : > { %v518_v19 = vpop.eup %517  ;;  %v284_v20 = vmul.f32 %v516_v17, %v423_v14 }
  0x3c   : > { %v520_v28 = vpop.eup %519  ;;  %v285_v29 = vmul.f32 %v518_v19, %v424_v15 }
  0x3d   : > { %v522_v32 = vpop.eup %521  ;;  %v300_v34 = vmul.f32 %v284_v20, %v581_v22  ;;  %v286_v35 = vmul.f32 %v520_v28, %v425_v16 }
  0x3e   : > { %v524_v36 = vpop.eup %523  ;;  %v301_v37 = vmul.f32 %v285_v29, %v583_v23  ;;  %v287_v38 = vmul.f32 %v522_v32, %v426_v18 }
  0x3f   : > { %v526_v39 = vpop.eup %525  ;;  %v308_v40 = vsel %vm292_vm0, %v581_v22, %v300_v34  ;;  %v302_v41 = vmul.f32 %v286_v35, %v585_v24  ;;  %v288_v42 = vmul.f32 %v524_v36, %v427_v21 }
  0x40   : > { %v309_v44 = vsel %vm293_vm1, %v583_v23, %v301_v37  ;;  %v303_v45 = vmul.f32 %v287_v38, %v587_v25  ;;  %v289_v46 = vmul.f32 %v526_v39, %v428_v31  ;;  %v528_v50 = vpop.eup %527 }
  0x41   : > { %v468_v48 = vpack.c.bf16 %v309_v44, %v308_v40  ;;  %v310_v22 = vsel %vm294_vm2, %v585_v24, %v302_v41  ;;  %v304_v49 = vmul.f32 %v288_v42, %v589_v26  ;;  %v530_v52 = vpop.eup %529  ;;  %v290_v55 = vmul.f32 %v528_v50, %v429_v43 }
  0x42   : > { %v311_v51 = vsel %vm295_vm3, %v587_v25, %v303_v45  ;;  %v305_v23 = vmul.f32 %v289_v46, %v591_v27  ;;  %v291_v56 = vmul.f32 %v530_v52, %v430_v47 }
  0x43   : > { %469 = vst [vmem:[%s172_s25] sm:$0xff] %v468_v48   ;;  %v473_v53 = vpack.c.bf16 %v311_v51, %v310_v22  ;;  %v312_v54 = vsel %vm296_vm4, %v589_v26, %v304_v49  ;;  %v306_v25 = vmul.f32 %v290_v55, %v595_v30 }
  0x44   : > { %v313_v24 = vsel %vm297_vm5, %v591_v27, %v305_v23  ;;  %v307_v58 = vmul.f32 %v291_v56, %v599_v33 }
  0x45   : > { %488 = vst [vmem:[%s172_s25 + $0x8] sm:$0xff] %v473_v53   ;;  %v478_v57 = vpack.c.bf16 %v313_v24, %v312_v54  ;;  %v314_v59 = vsel %vm298_vm6, %v595_v30, %v306_v25 }
  0x46   : > { %v315_v60 = vsel %vm299_vm7, %v599_v33, %v307_v58 }
  0x47   : > { %489 = vst [vmem:[%s172_s25 + $0x10] sm:$0xff] %v478_v57   ;;  %v483_v26 = vpack.c.bf16 %v315_v60, %v314_v59 }
  0x49   : > { %490 = vst [vmem:[%s172_s25 + $0x18] sm:$0xff] %v483_v26  }
  0x4a PF: > { %s13_s12 = sadd.s32 1, %s537_s12  }
  0x4b   : > { %p10_p4 = scmp.ge.s32.totalorder %s13_s12, 4  }
  0x4d   :  { %12 = sbr.rel (!%p10_p4) target bundleno = 1 (0x1), region = 62 }

// kernel: darknet_forward.18
= control target key start
LH: loop header
LB: loop body
LE: loop exit
PB: predicated region body
PF: predicated region fallthrough
CT: control target
= control target key end

     0   :  { %s729_s15 = smov 0   ;;  %s794_s0 = inlined_call_operand.vmem [shape: bf16[128,128], index: 0, kind: input, shape index: {}]   ;;  %s795_s1 = inlined_call_operand.vmem [shape: bf16[128,128], index: 1, kind: input, shape index: {}]   ;;  %s796_s2 = inlined_call_operand.vmem [shape: bf16[128,128], index: 2, kind: output, shape index: {0}]   ;;  %s797_s3 = inlined_call_operand.vmem [shape: f32[2,1,128], index: 3, kind: output, shape index: {1}]   ;;  %s798_s4 = inlined_call_operand.vmem [shape: f32[2,1,128], index: 4, kind: output, shape index: {2}]  }
   0x1 LB: > { %s735_s16 = sadd.s32 4294967295, %s702_s15   ;;  %p566_p0 = scmp.ge.s32.totalorder %s702_s15, 1  ;;  %s702_s15 = sphi %s729_s15, %s15_s15  }
   0x2   : > { %p168_p1 = scmp.lt.s32.totalorder %s702_s15, 3 }
   0x4   : > { %p169_p2 = pnand %p566_p0, %p168_p1 }
   0x5   : > { %s567_s19 = sshll.u32 (!%p169_p2), %s735_s16, 3  ;;  %p212_p4 = scmp.lt.s32.totalorder (!%p169_p2), %s735_s16, 1 }
   0x6   : > { %172 = sbr.rel (%p169_p2) target bundleno = 272 (0x110), region = 28  ;;  %p201_p3 = scmp.lt.s32.totalorder (!%p169_p2), %s567_s19, 15 }
   0xb   : > { %v684_v0 = vld [vmem:[%s795_s1 + $0x38] sm:$0xff]   ;;  %v685_v1 = vld [vmem:[%s795_s1 + $0x30] sm:$0xff]   ;;  %s800_s19 = smov (!%p201_p3, %s567_s19), 15  ;;  %v686_v2 = vld [vmem:[%s795_s1 + $0x28] sm:$0xff]   ;;  %s802_s16 = smov (!%p212_p4, %s735_s16), 1 }
   0xc   : > { %636 = vmatprep.subr.bf16.mxu0 %v684_v0  ;;  %660 = vmatprep.subr.bf16.mxu1 %v684_v0  ;;  %s568_s24 = sshll.u32 %s800_s19, 2  ;;  %v687_v3 = vld [vmem:[%s795_s1 + $0x20] sm:$0xff]   ;;  %v688_v6 = vld [vmem:[%s795_s1 + $0x18] sm:$0xff]   ;;  %v689_v7 = vld [vmem:[%s795_s1 + $0x10] sm:$0xff]   ;;  %s214_s19 = scalar_lea.vmem %s797_s3, %s802_s16 }
   0xd   : > { %637 = vmatpush3.bf16.msra.mxu0 %v684_v0  ;;  %668 = vmatpush3.bf16.msra.mxu1 %v684_v0  ;;  %s757_s27 = scalar_lea.vmem %s794_s0, %s568_s24  ;;  %v690_v8 = vld [vmem:[%s795_s1 + $0x8] sm:$0xff]   ;;  %v691_v9 = vld [vmem:[%s795_s1] sm:$0xff]   ;;  %s210_s14 = scalar_lea.vmem %s796_s2, %s568_s24 }
   0xe   : > { %638 = vmatprep.subr.bf16.mxu0 %v685_v1  ;;  %661 = vmatprep.subr.bf16.mxu1 %v685_v1  ;;  %v692_v4 = vld [vmem:[%s757_s27] sm:$0xff]   ;;  %v694_v5 = vld [vmem:[%s757_s27 + $0x10] sm:$0xff]   ;;  %v693_v10 = vld [vmem:[%s757_s27 + $0x8] sm:$0xff]   ;;  %s217_s22 = scalar_lea.vmem %s798_s4, %s802_s16 }
   0xf   : > { %652 = vmatprep.mubr.bf16.mxu0 %v692_v4  ;;  %656 = vmatprep.mubr.bf16.mxu1 %v694_v5  ;;  %v695_v11 = vld [vmem:[%s757_s27 + $0x18] sm:$0xff]  }
  0x11   : > { %639 = vmatpush3.bf16.msra.mxu0 %v685_v1  ;;  %669 = vmatpush3.bf16.msra.mxu1 %v685_v1 }
  0x12   : > { %640 = vmatprep.subr.bf16.mxu0 %v686_v2  ;;  %662 = vmatprep.subr.bf16.mxu1 %v686_v2 }
  0x15   : > { %641 = vmatpush3.bf16.msra.mxu0 %v686_v2  ;;  %670 = vmatpush3.bf16.msra.mxu1 %v686_v2 }
  0x16   : > { %642 = vmatprep.subr.bf16.mxu0 %v687_v3  ;;  %663 = vmatprep.subr.bf16.mxu1 %v687_v3 }
  0x19   : > { %643 = vmatpush3.bf16.msra.mxu0 %v687_v3  ;;  %671 = vmatpush3.bf16.msra.mxu1 %v687_v3 }
  0x1a   : > { %644 = vmatprep.subr.bf16.mxu0 %v688_v6  ;;  %664 = vmatprep.subr.bf16.mxu1 %v688_v6 }
  0x1d   : > { %645 = vmatpush3.bf16.msra.mxu0 %v688_v6  ;;  %672 = vmatpush3.bf16.msra.mxu1 %v688_v6 }
  0x1e   : > { %646 = vmatprep.subr.bf16.mxu0 %v689_v7  ;;  %665 = vmatprep.subr.bf16.mxu1 %v689_v7 }
  0x21   : > { %647 = vmatpush3.bf16.msra.mxu0 %v689_v7  ;;  %673 = vmatpush3.bf16.msra.mxu1 %v689_v7 }
  0x22   : > { %648 = vmatprep.subr.bf16.mxu0 %v690_v8  ;;  %666 = vmatprep.subr.bf16.mxu1 %v690_v8 }
  0x25   : > { %649 = vmatpush3.bf16.msra.mxu0 %v690_v8  ;;  %674 = vmatpush3.bf16.msra.mxu1 %v690_v8 }
  0x26   : > { %650 = vmatprep.subr.bf16.mxu0 %v691_v9  ;;  %667 = vmatprep.subr.bf16.mxu1 %v691_v9 }
  0x29   : > { %651 = vmatpush3.bf16.msra.mxu0 %v691_v9  ;;  %675 = vmatpush3.bf16.msra.mxu1 %v691_v9 }
  0x2c   : > { %653 = vmatmul.mubr.bf16.vlgmr.msra.gmra.mxu0 %v693_v10  ;;  %657 = vmatmul.mubr.bf16.vlgmr.msra.gmra.mxu1 %v695_v11 }
  0xec   : > { %v654_v12 = vpop.f32.mrf.mxu0  ;;  %v658_v13 = vpop.f32.mrf.mxu1 }
  0xed   : > { %v436_v27 = vmul.f32 %v654_v12, %v654_v12  ;;  %v440_v39 = vmul.f32 %v658_v13, %v658_v13 }
  0xee   : > { %v349_v14 = vpop.f32.mrf.mxu0  ;;  %v365_v15 = vpop.f32.mrf.mxu1 }
  0xef   : > { %v434_v20 = vmul.f32 %v349_v14, %v349_v14  ;;  %v438_v33 = vmul.f32 %v365_v15, %v365_v15 }
  0xf0   : > { %v655_v16 = vpop.f32.mrf.mxu0  ;;  %v659_v17 = vpop.f32.mrf.mxu1 }
  0xf1   : > { %v609_v18 = vpack.c.bf16 %v655_v16, %v654_v12  ;;  %v619_v19 = vpack.c.bf16 %v659_v17, %v658_v13  ;;  %v437_v30 = vmul.f32 %v655_v16, %v655_v16  ;;  %v441_v42 = vmul.f32 %v659_v17, %v659_v17 }
  0xf2   : > { %v352_v21 = vpop.f32.mrf.mxu0  ;;  %v368_v22 = vpop.f32.mrf.mxu1 }
  0xf3   : > { %621 = vst [vmem:[%s210_s14 + $0x8] sm:$0xff] %v609_v18   ;;  %v604_v23 = vpack.c.bf16 %v352_v21, %v349_v14  ;;  %v420_v24 = vadd.f32 %v352_v21, %v349_v14  ;;  %v435_v25 = vmul.f32 %v352_v21, %v352_v21  ;;  %623 = vst [vmem:[%s210_s14 + $0x18] sm:$0xff] %v619_v19  }
  0xf4   : > { %v614_v26 = vpack.c.bf16 %v368_v22, %v365_v15  ;;  %v439_v37 = vmul.f32 %v368_v22, %v368_v22 }
  0xf5   : > { %605 = vst [vmem:[%s210_s14] sm:$0xff] %v604_v23   ;;  %v421_v28 = vadd.f32 %v654_v12, %v420_v24  ;;  %v442_v29 = vadd.f32 %v435_v25, %v434_v20 }
  0xf6   : > { %622 = vst [vmem:[%s210_s14 + $0x10] sm:$0xff] %v614_v26  }
  0xf7   : > { %v443_v31 = vadd.f32 %v442_v29, %v436_v27  ;;  %v422_v32 = vadd.f32 %v655_v16, %v421_v28 }
  0xf9   : > { %v423_v34 = vadd.f32 %v422_v32, %v365_v15  ;;  %v444_v35 = vadd.f32 %v443_v31, %v437_v30 }
  0xfb   : > { %v424_v36 = vadd.f32 %v423_v34, %v368_v22  ;;  %v445_v38 = vadd.f32 %v444_v35, %v438_v33 }
  0xfd   : > { %v425_v40 = vadd.f32 %v658_v13, %v424_v36  ;;  %v446_v41 = vadd.f32 %v445_v38, %v439_v37 }
  0xff   : > { %v426_v43 = vadd.f32 %v659_v17, %v425_v40  ;;  %v447_v44 = vadd.f32 %v446_v41, %v440_v39 }
 0x101   : > { %v427_v45 = vrot.slane %v426_v43, 4  ;;  %v448_v46 = vadd.f32 %v447_v44, %v441_v42 }
 0x103   : > { %v428_v47 = vadd.f32 %v427_v45, %v426_v43  ;;  %v449_v48 = vrot.slane %v448_v46, 4 }
 0x105   : > { %v429_v49 = vrot.slane %v428_v47, 2  ;;  %v450_v50 = vadd.f32 %v449_v48, %v448_v46 }
 0x107   : > { %v430_v51 = vadd.f32 %v429_v49, %v428_v47  ;;  %v451_v52 = vrot.slane %v450_v50, 2 }
 0x109   : > { %v431_v53 = vrot.slane %v430_v51, 1  ;;  %v452_v54 = vadd.f32 %v451_v52, %v450_v50 }
 0x10b   : > { %v432_v55 = vadd.f32 %v431_v53, %v430_v51  ;;  %v453_v56 = vrot.slane %v452_v54, 1 }
 0x10d   : > { %433 = vst [vmem:[%s214_s19] sm:$0x1] %v432_v55  ;;  %v454_v57 = vadd.f32 %v453_v56, %v452_v54 }
 0x10f   : > { %455 = vst [vmem:[%s217_s22] sm:$0x1] %v454_v57 }
 0x110 PF: > { %s15_s15 = sadd.s32 1, %s702_s15  }
 0x111   : > { %p12_p5 = scmp.ge.s32.totalorder %s15_s15, 4  }
 0x113   :  { %14 = sbr.rel (!%p12_p5) target bundleno = 1 (0x1), region = 82 }

// kernel: darknet_forward.21
= control target key start
LH: loop header
LB: loop body
LE: loop exit
PB: predicated region body
PF: predicated region fallthrough
CT: control target
= control target key end

     0   :  { %s670_s15 = smov 0   ;;  %s765_s0 = inlined_call_operand.vmem [shape: bf16[128,128], index: 0, kind: input, shape index: {}]   ;;  %s766_s1 = inlined_call_operand.vmem [shape: f32[1,128], index: 1, kind: input, shape index: {}]   ;;  %s767_s2 = inlined_call_operand.vmem [shape: f32[1,128], index: 2, kind: input, shape index: {}]   ;;  %s768_s3 = inlined_call_operand.vmem [shape: bf16[128,128], index: 3, kind: input, shape index: {}]   ;;  %s769_s4 = inlined_call_operand.vmem [shape: bf16[128,128], index: 4, kind: output, shape index: {}]  }
   0x1 LB: > { %s497_s16 = sadd.s32 4294967295, %s643_s15   ;;  %p501_p0 = scmp.ge.s32.totalorder %s643_s15, 1  ;;  %s643_s15 = sphi %s670_s15, %s14_s15  }
   0x2   : > { %p174_p1 = scmp.lt.s32.totalorder %s643_s15, 3 }
   0x4   : > { %p175_p2 = pnand %p501_p0, %p174_p1 }
   0x5   : > { %s502_s17 = sshll.u32 (!%p175_p2), %s497_s16, 3 }
   0x6   : > { %178 = sbr.rel (%p175_p2) target bundleno = 77 (0x4d), region = 36  ;;  %p206_p3 = scmp.lt.s32.totalorder (!%p175_p2), %s502_s17, 15 }
   0xb   : > { %s771_s17 = smov (!%p206_p3, %s502_s17), 15  ;;  %v508_v2 = vld [vmem:[%s766_s1] ss:$0 sm:$0xff] }
   0xc   : > { %s678_s18 = sshll.u32 %s771_s17, 2  ;;  %v509_v10 = vld [vmem:[%s767_s2] ss:$0 sm:$0xff] }
   0xd   : > { %s209_s21 = scalar_lea.vmem %s765_s0, %s678_s18  ;;  %s718_s28 = scalar_lea.vmem %s768_s3, %s678_s18 }
   0xe   : > { %v553_v0 = vld [vmem:[%s209_s21] sm:$0xff]   ;;  %v591_v1 = vld [vmem:[%s209_s21 + $0x8] sm:$0xff]   ;;  %v592_v5 = vld [vmem:[%s209_s21 + $0x10] sm:$0xff]   ;;  %s221_s5 = scalar_lea.vmem %s769_s4, %s678_s18 }
   0xf   : > { %v554_v3 = vunpack.c.l.bf16 %v553_v0  ;;  %v555_v4 = vunpack.c.h.bf16 %v553_v0  ;;  %v558_v6 = vunpack.c.l.bf16 %v591_v1  ;;  %v559_v7 = vunpack.c.h.bf16 %v591_v1  ;;  %v593_v15 = vld [vmem:[%s209_s21 + $0x18] sm:$0xff]  }
  0x10   : > { %v562_v8 = vunpack.c.l.bf16 %v592_v5  ;;  %v563_v9 = vunpack.c.h.bf16 %v592_v5  ;;  %v566_v24 = vunpack.c.l.bf16 %v593_v15  ;;  %v567_v25 = vunpack.c.h.bf16 %v593_v15 }
  0x11   : > { %v262_v11 = vmul.f32 %v554_v3, %v508_v2  ;;  %v263_v12 = vmul.f32 %v555_v4, %v508_v2  ;;  %v264_v13 = vmul.f32 %v558_v6, %v508_v2  ;;  %v265_v14 = vmul.f32 %v559_v7, %v508_v2 }
  0x12   : > { %v266_v20 = vmul.f32 %v562_v8, %v508_v2  ;;  %v267_v21 = vmul.f32 %v563_v9, %v508_v2  ;;  %v268_v36 = vmul.f32 %v566_v24, %v508_v2  ;;  %v269_v37 = vmul.f32 %v567_v25, %v508_v2 }
  0x13   : > { %v690_v16 = vadd.f32 %v509_v10, %v262_v11  ;;  %v692_v17 = vadd.f32 %v509_v10, %v263_v12  ;;  %v694_v18 = vadd.f32 %v509_v10, %v264_v13  ;;  %v696_v19 = vadd.f32 %v509_v10, %v265_v14  ;;  %v537_v14 = vld [vmem:[%s718_s28] sm:$0xff]  }
  0x14   : > { %v702_v30 = vadd.f32 %v509_v10, %v266_v20  ;;  %v704_v31 = vadd.f32 %v509_v10, %v267_v21  ;;  %v708_v40 = vadd.f32 %v509_v10, %v268_v36  ;;  %v710_v41 = vadd.f32 %v509_v10, %v269_v37  ;;  %v588_v20 = vld [vmem:[%s718_s28 + $0x8] sm:$0xff]  }
  0x15   : > { %v285_v22 = vmin.f32 %v690_v16, 20.0  ;;  %v286_v23 = vmin.f32 %v692_v17, 20.0  ;;  %v287_v26 = vmin.f32 %v694_v18, 20.0  ;;  %v288_v27 = vmin.f32 %v696_v19, 20.0 }
  0x16   : > { %v289_v34 = vmin.f32 %v702_v30, 20.0  ;;  %v290_v35 = vmin.f32 %v704_v31, 20.0  ;;  %v291_v42 = vmin.f32 %v708_v40, 20.0  ;;  %v292_v43 = vmin.f32 %v710_v41, 20.0 }
  0x17   : > { %v293_v28 = vmul.f32 1.442695, %v285_v22  ;;  %v295_v29 = vmul.f32 1.442695, %v286_v23  ;;  %v297_v32 = vmul.f32 1.442695, %v287_v26  ;;  %v538_v23 = vunpack.c.l.bf16 %v537_v14 }
  0x18   : > { %v299_v33 = vmul.f32 1.442695, %v288_v27  ;;  %v301_v38 = vmul.f32 1.442695, %v289_v34  ;;  %v303_v39 = vmul.f32 1.442695, %v290_v35  ;;  %v539_v26 = vunpack.c.h.bf16 %v537_v14 }
  0x19   : > { %605 = vpow2.f32 %v293_v28  ;;  %v305_v44 = vmul.f32 1.442695, %v291_v42  ;;  %v307_v45 = vmul.f32 1.442695, %v292_v43  ;;  %v589_v22 = vld [vmem:[%s718_s28 + $0x10] sm:$0xff]   ;;  %v542_v27 = vunpack.c.l.bf16 %v588_v20 }
  0x1a   : > { %607 = vpow2.f32 %v295_v29  ;;  %v543_v28 = vunpack.c.h.bf16 %v588_v20  ;;  %v546_v34 = vunpack.c.l.bf16 %v589_v22  ;;  %v547_v35 = vunpack.c.h.bf16 %v589_v22 }
  0x1b   : > { %609 = vpow2.f32 %v297_v32  ;;  %vm357_vm0 = vcmp.gt.f32.partialorder %v690_v16, 20.0  ;;  %vm358_vm1 = vcmp.gt.f32.partialorder %v692_v17, 20.0  ;;  %vm359_vm2 = vcmp.gt.f32.partialorder %v694_v18, 20.0 }
  0x1c   : > { %611 = vpow2.f32 %v299_v33  ;;  %vm360_vm3 = vcmp.gt.f32.partialorder %v696_v19, 20.0  ;;  %vm361_vm4 = vcmp.gt.f32.partialorder %v702_v30, 20.0  ;;  %vm362_vm5 = vcmp.gt.f32.partialorder %v704_v31, 20.0 }
  0x1d   : > { %613 = vpow2.f32 %v301_v38  ;;  %vm363_vm6 = vcmp.gt.f32.partialorder %v708_v40, 20.0  ;;  %vm364_vm7 = vcmp.gt.f32.partialorder %v710_v41, 20.0 }
  0x1e   : > { %615 = vpow2.f32 %v303_v39 }
  0x1f   : > { %617 = vpow2.f32 %v305_v44 }
  0x20   : > { %619 = vpow2.f32 %v307_v45 }
  0x26   : > { %v606_v46 = vpop.eup %605 }
  0x27   : > { %v608_v47 = vpop.eup %607  ;;  %v309_v48 = vadd.f32 1.0, %v606_v46 }
  0x28   : > { %v610_v49 = vpop.eup %609  ;;  %v310_v50 = vadd.f32 1.0, %v608_v47 }
  0x29   : > { %v612_v51 = vpop.eup %611  ;;  %v317_v52 = vmul.f32 %v309_v48, %v309_v48  ;;  %v311_v53 = vadd.f32 1.0, %v610_v49 }
  0x2a   : > { %v614_v54 = vpop.eup %613  ;;  %v318_v55 = vmul.f32 %v310_v50, %v310_v50  ;;  %v312_v56 = vadd.f32 1.0, %v612_v51 }
  0x2b   : > { %v616_v57 = vpop.eup %615  ;;  %v333_v58 = vadd.f32 1.0, %v317_v52  ;;  %v319_v59 = vmul.f32 %v311_v53, %v311_v53  ;;  %v313_v60 = vadd.f32 1.0, %v614_v54  ;;  %v510_v15 = vadd.f32 -1.0, %v317_v52 }
  0x2c   : > { %v334_v61 = vadd.f32 1.0, %v318_v55  ;;  %v320_v62 = vmul.f32 %v312_v56, %v312_v56  ;;  %v314_v63 = vadd.f32 1.0, %v616_v57  ;;  %v618_v4 = vpop.eup %617  ;;  %v511_v21 = vadd.f32 -1.0, %v318_v55 }
  0x2d   : > { %621 = vrcp.f32 %v333_v58  ;;  %v335_v0 = vadd.f32 1.0, %v319_v59  ;;  %v321_v1 = vmul.f32 %v313_v60, %v313_v60  ;;  %v620_v6 = vpop.eup %619  ;;  %v315_v8 = vadd.f32 1.0, %v618_v4 }
  0x2e   : > { %623 = vrcp.f32 %v334_v61  ;;  %v336_v2 = vadd.f32 1.0, %v320_v62  ;;  %v322_v3 = vmul.f32 %v314_v63, %v314_v63  ;;  %v316_v9 = vadd.f32 1.0, %v620_v6 }
  0x2f   : > { %625 = vrcp.f32 %v335_v0  ;;  %v337_v5 = vadd.f32 1.0, %v321_v1  ;;  %v323_v10 = vmul.f32 %v315_v8, %v315_v8  ;;  %v512_v24 = vadd.f32 -1.0, %v319_v59 }
  0x30   : > { %627 = vrcp.f32 %v336_v2  ;;  %v338_v7 = vadd.f32 1.0, %v322_v3  ;;  %v324_v11 = vmul.f32 %v316_v9, %v316_v9  ;;  %v513_v29 = vadd.f32 -1.0, %v320_v62 }
  0x31   : > { %629 = vrcp.f32 %v337_v5  ;;  %v339_v12 = vadd.f32 1.0, %v323_v10  ;;  %v514_v36 = vadd.f32 -1.0, %v321_v1  ;;  %v515_v39 = vadd.f32 -1.0, %v322_v3 }
  0x32   : > { %631 = vrcp.f32 %v338_v7  ;;  %v340_v13 = vadd.f32 1.0, %v324_v11  ;;  %v516_v52 = vadd.f32 -1.0, %v323_v10  ;;  %v517_v60 = vadd.f32 -1.0, %v324_v11 }
  0x33   : > { %633 = vrcp.f32 %v339_v12 }
  0x34   : > { %635 = vrcp.f32 %v340_v13 }
  0x3a   : > { %v622_v25 = vpop.eup %621 }
  0x3b   : > { %v624_v32 = vpop.eup %623  ;;  %v349_v33 = vmul.f32 %v622_v25, %v510_v15 }
  0x3c   : > { %v626_v37 = vpop.eup %625  ;;  %v350_v38 = vmul.f32 %v624_v32, %v511_v21 }
  0x3d   : > { %v628_v42 = vpop.eup %627  ;;  %v365_v43 = vmul.f32 %v349_v33, %v690_v16  ;;  %v351_v44 = vmul.f32 %v626_v37, %v512_v24 }
  0x3e   : > { %v630_v45 = vpop.eup %629  ;;  %v366_v46 = vmul.f32 %v350_v38, %v692_v17  ;;  %v352_v47 = vmul.f32 %v628_v42, %v513_v29 }
  0x3f   : > { %v632_v48 = vpop.eup %631  ;;  %v373_v49 = vsel %vm357_vm0, %v690_v16, %v365_v43  ;;  %v367_v50 = vmul.f32 %v351_v44, %v694_v18  ;;  %v353_v51 = vmul.f32 %v630_v45, %v514_v36  ;;  %v590_v16 = vld [vmem:[%s718_s28 + $0x18] sm:$0xff]  }
  0x40   : > { %v374_v53 = vsel %vm358_vm1, %v692_v17, %v366_v46  ;;  %v381_v54 = vadd.f32 %v538_v23, %v373_v49  ;;  %v368_v55 = vmul.f32 %v352_v47, %v696_v19  ;;  %v354_v56 = vmul.f32 %v632_v48, %v515_v39  ;;  %v634_v63 = vpop.eup %633 }
  0x41   : > { %v382_v57 = vadd.f32 %v539_v26, %v374_v53  ;;  %v375_v58 = vsel %vm359_vm2, %v694_v18, %v367_v50  ;;  %v369_v59 = vmul.f32 %v353_v51, %v702_v30  ;;  %v636_v2 = vpop.eup %635  ;;  %v550_v5 = vunpack.c.l.bf16 %v590_v16 }
  0x42   : > { %v376_v17 = vsel %vm360_vm3, %v696_v19, %v368_v55  ;;  %v383_v61 = vadd.f32 %v542_v27, %v375_v58  ;;  %v370_v62 = vmul.f32 %v354_v56, %v704_v31  ;;  %v355_v6 = vmul.f32 %v634_v63, %v516_v52 }
  0x43   : > { %v571_v0 = vpack.c.bf16 %v382_v57, %v381_v54  ;;  %v384_v1 = vadd.f32 %v543_v28, %v376_v17  ;;  %v377_v18 = vsel %vm361_vm4, %v702_v30, %v369_v59  ;;  %v356_v8 = vmul.f32 %v636_v2, %v517_v60 }
  0x44   : > { %v378_v3 = vsel %vm362_vm5, %v704_v31, %v370_v62  ;;  %v385_v4 = vadd.f32 %v546_v34, %v377_v18  ;;  %v551_v9 = vunpack.c.h.bf16 %v590_v16  ;;  %v371_v10 = vmul.f32 %v355_v6, %v708_v40 }
  0x45   : > { %572 = vst [vmem:[%s221_s5] sm:$0xff] %v571_v0   ;;  %v576_v19 = vpack.c.bf16 %v384_v1, %v383_v61  ;;  %v386_v7 = vadd.f32 %v547_v35, %v378_v3  ;;  %v372_v11 = vmul.f32 %v356_v8, %v710_v41 }
  0x46   : > { %v379_v31 = vsel %vm363_vm6, %v708_v40, %v371_v10 }
  0x47   : > { %594 = vst [vmem:[%s221_s5 + $0x8] sm:$0xff] %v576_v19   ;;  %v581_v30 = vpack.c.bf16 %v386_v7, %v385_v4  ;;  %v380_v12 = vsel %vm364_vm7, %v710_v41, %v372_v11  ;;  %v387_v13 = vadd.f32 %v550_v5, %v379_v31 }
  0x48   : > { %v388_v14 = vadd.f32 %v551_v9, %v380_v12 }
  0x49   : > { %595 = vst [vmem:[%s221_s5 + $0x10] sm:$0xff] %v581_v30  }
  0x4a   : > { %v586_v15 = vpack.c.bf16 %v388_v14, %v387_v13 }
  0x4c   : > { %596 = vst [vmem:[%s221_s5 + $0x18] sm:$0xff] %v586_v15  }
  0x4d PF: > { %s14_s15 = sadd.s32 1, %s643_s15  }
  0x4e   : > { %p11_p4 = scmp.ge.s32.totalorder %s14_s15, 4  }
  0x50   :  { %13 = sbr.rel (!%p11_p4) target bundleno = 1 (0x1), region = 69 }

// kernel: darknet_forward.22
= control target key start
LH: loop header
LB: loop body
LE: loop exit
PB: predicated region body
PF: predicated region fallthrough
CT: control target
= control target key end

     0   :  { %s573_s15 = smov 0   ;;  %s632_s0 = inlined_call_operand.vmem [shape: bf16[32,144], index: 0, kind: input, shape index: {}]   ;;  %s633_s1 = inlined_call_operand.vmem [shape: bf16[144,128], index: 1, kind: input, shape index: {}]   ;;  %s634_s2 = inlined_call_operand.vmem [shape: bf16[32,128], index: 2, kind: output, shape index: {0}]   ;;  %s635_s3 = inlined_call_operand.vmem [shape: f32[2,1,128], index: 3, kind: output, shape index: {1}]   ;;  %s636_s4 = inlined_call_operand.vmem [shape: f32[2,1,128], index: 4, kind: output, shape index: {2}]  }
   0x1 LB: > { %s579_s16 = sadd.s32 4294967295, %s545_s15   ;;  %p488_p0 = scmp.ge.s32.totalorder %s545_s15, 1  ;;  %s545_s15 = sphi %s573_s15, %s15_s15  }
   0x2   : > { %p169_p1 = scmp.lt.s32.totalorder %s545_s15, 3 }
   0x4   : > { %p170_p2 = pnand %p488_p0, %p169_p1 }
   0x5   : > { %s489_s19 = sshll.u32 (!%p170_p2), %s579_s16, 1  ;;  %p215_p4 = scmp.lt.s32.totalorder (!%p170_p2), %s579_s16, 1 }
   0x6   : > { %173 = sbr.rel (%p170_p2) target bundleno = 262 (0x106), region = 28  ;;  %p203_p3 = scmp.lt.s32.totalorder (!%p170_p2), %s489_s19, 3 }
   0xb   : > { %v527_v0 = vld [vmem:[%s633_s1 + $0x38] sm:$0xff]   ;;  %v547_v1 = vmov 0   ;;  %v528_v2 = vld [vmem:[%s633_s1 + $0x30] sm:$0xff]   ;;  %s638_s19 = smov (!%p203_p3, %s489_s19), 3  ;;  %v529_v3 = vld [vmem:[%s633_s1 + $0x28] sm:$0xff]   ;;  %vm305_vm0 = vcmask 130048  }
   0xc   : > { %309 = vmatprep.subr.bf16.mxu0 %v547_v1  ;;  %s510_s24 = sshll.u32 %s638_s19, 3  ;;  %v530_v4 = vld [vmem:[%s633_s1 + $0x20] sm:$0xff]   ;;  %v531_v6 = vld [vmem:[%s633_s1 + $0x18] sm:$0xff]   ;;  %v532_v7 = vld [vmem:[%s633_s1 + $0x10] sm:$0xff]   ;;  %s493_s14 = sshll.u32 %s638_s19, 2 }
   0xd   : > { %310 = vmatpush1.bf16.msra.mxu0 %v527_v0  ;;  %s207_s27 = scalar_lea.vmem %s632_s0, %s510_s24  ;;  %v533_v8 = vld [vmem:[%s633_s1 + $0x8] sm:$0xff]   ;;  %v534_v9 = vld [vmem:[%s633_s1] sm:$0xff]   ;;  %s213_s20 = scalar_lea.vmem %s634_s2, %s493_s14 }
   0xe   : > { %311 = vmatprep.subr.bf16.mxu0 %v547_v1  ;;  %v538_v5 = vld [vmem:[%s207_s27 + $0x4] ss:$8 sps:$4 sm:$0xff]   ;;  %v536_v11 = vld [vmem:[%s207_s27] ss:$8 sps:$4 sm:$0xff]   ;;  %s640_s16 = smov (!%p215_p4, %s579_s16), 1 }
   0xf   : > { %505 = vmatprep.mubr.msk.bf16.mxu0 %vm305_vm0, %v538_v5  ;;  %v535_v10 = vld [vmem:[%s633_s1 + $0x40] sm:$0xff]   ;;  %s217_s22 = scalar_lea.vmem %s635_s3, %s640_s16  ;;  %s220_s25 = scalar_lea.vmem %s636_s4, %s640_s16 }
  0x11   : > { %312 = vmatpush1.bf16.msra.mxu0 %v528_v2 }
  0x12   : > { %313 = vmatprep.subr.bf16.mxu0 %v547_v1 }
  0x15   : > { %314 = vmatpush1.bf16.msra.mxu0 %v529_v3 }
  0x16   : > { %315 = vmatprep.subr.bf16.mxu0 %v547_v1 }
  0x19   : > { %316 = vmatpush1.bf16.msra.mxu0 %v530_v4 }
  0x1a   : > { %317 = vmatprep.subr.bf16.mxu0 %v547_v1 }
  0x1d   : > { %318 = vmatpush1.bf16.msra.mxu0 %v531_v6 }
  0x1e   : > { %319 = vmatprep.subr.bf16.mxu0 %v547_v1 }
  0x21   : > { %320 = vmatpush1.bf16.msra.mxu0 %v532_v7 }
  0x22   : > { %321 = vmatprep.subr.bf16.mxu0 %v547_v1 }
  0x25   : > { %322 = vmatpush1.bf16.msra.mxu0 %v533_v8 }
  0x26   : > { %323 = vmatprep.subr.bf16.mxu0 %v547_v1 }
  0x29   : > { %324 = vmatpush1.bf16.msra.mxu0 %v534_v9 }
  0x2a   : > { %339 = vmatprep.subr.bf16.mxu0 %v547_v1 }
  0x2d   : > { %340 = vmatpush2.bf16.msra.mxu0 %v535_v10 }
  0x30   : > { %342 = vmatmul.mubr.bf16.vlgmr.msra.gmra.mxu0 %v536_v11 }
  0xf0   : > { %v343_v12 = vpop.f32.mrf.mxu0 }
  0xf1   : > { %v368_v15 = vmul.f32 %v343_v12, %v343_v12 }
  0xf2   : > { %v345_v13 = vpop.f32.mrf.mxu0 }
  0xf4   : > { %v346_v14 = vpop.f32.mrf.mxu0 }
  0xf5   : > { %v516_v16 = vpack.c.bf16 %v346_v14, %v343_v12  ;;  %v360_v17 = vadd.f32 %v346_v14, %v343_v12  ;;  %v369_v18 = vmul.f32 %v346_v14, %v346_v14 }
  0xf6   : > { %v348_v19 = vpop.f32.mrf.mxu0 }
  0xf7   : > { %517 = vst [vmem:[%s213_s20] sm:$0xff] %v516_v16   ;;  %v361_v20 = vrot.slane %v360_v17, 4  ;;  %v370_v21 = vadd.f32 %v369_v18, %v368_v15 }
  0xf9   : > { %v362_v22 = vadd.f32 %v361_v20, %v360_v17  ;;  %v371_v23 = vrot.slane %v370_v21, 4 }
  0xfb   : > { %v363_v24 = vrot.slane %v362_v22, 2  ;;  %v372_v25 = vadd.f32 %v371_v23, %v370_v21 }
  0xfd   : > { %v364_v26 = vadd.f32 %v363_v24, %v362_v22  ;;  %v373_v27 = vrot.slane %v372_v25, 2 }
  0xff   : > { %v365_v28 = vrot.slane %v364_v26, 1  ;;  %v374_v29 = vadd.f32 %v373_v27, %v372_v25 }
 0x101   : > { %v366_v30 = vadd.f32 %v365_v28, %v364_v26  ;;  %v375_v31 = vrot.slane %v374_v29, 1 }
 0x103   : > { %367 = vst [vmem:[%s217_s22] sm:$0x1] %v366_v30  ;;  %v376_v32 = vadd.f32 %v375_v31, %v374_v29 }
 0x105   : > { %377 = vst [vmem:[%s220_s25] sm:$0x1] %v376_v32 }
 0x106 PF: > { %s15_s15 = sadd.s32 1, %s545_s15  }
 0x107   : > { %p12_p5 = scmp.ge.s32.totalorder %s15_s15, 4  }
 0x109   :  { %14 = sbr.rel (!%p12_p5) target bundleno = 1 (0x1), region = 82 }

// kernel: darknet_forward.23
= control target key start
LH: loop header
LB: loop body
LE: loop exit
PB: predicated region body
PF: predicated region fallthrough
CT: control target
= control target key end

     0   :  { %s358_s12 = smov 0   ;;  %s388_s0 = inlined_call_operand.vmem [shape: bf16[32,128], index: 0, kind: input, shape index: {}]   ;;  %s389_s1 = inlined_call_operand.vmem [shape: f32[1,128], index: 1, kind: input, shape index: {}]   ;;  %s390_s2 = inlined_call_operand.vmem [shape: f32[1,128], index: 2, kind: input, shape index: {}]   ;;  %s391_s3 = inlined_call_operand.vmem [shape: bf16[32,128], index: 3, kind: output, shape index: {}]  }
   0x1 LB: > { %s286_s13 = sadd.s32 4294967295, %s336_s12   ;;  %p290_p0 = scmp.ge.s32.totalorder %s336_s12, 1  ;;  %s336_s12 = sphi %s358_s12, %s13_s12  }
   0x2   : > { %p138_p1 = scmp.lt.s32.totalorder %s336_s12, 3 }
   0x4   : > { %p139_p2 = pnand %p290_p0, %p138_p1 }
   0x5   : > { %s291_s14 = sshll.u32 (!%p139_p2), %s286_s13, 1 }
   0x6   : > { %142 = sbr.rel (%p139_p2) target bundleno = 68 (0x44), region = 32  ;;  %p163_p3 = scmp.lt.s32.totalorder (!%p139_p2), %s291_s14, 3 }
   0xb   : > { %s393_s14 = smov (!%p163_p3, %s291_s14), 3  ;;  %v295_v1 = vld [vmem:[%s389_s1] ss:$0 sm:$0xff] }
   0xc   : > { %s292_s15 = sshll.u32 %s393_s14, 2  ;;  %v296_v4 = vld [vmem:[%s390_s2] ss:$0 sm:$0xff] }
   0xd   : > { %s166_s18 = scalar_lea.vmem %s388_s0, %s292_s15  ;;  %s172_s25 = scalar_lea.vmem %s391_s3, %s292_s15 }
   0xe   : > { %v306_v0 = vld [vmem:[%s166_s18] sm:$0xff]  }
   0xf   : > { %v307_v2 = vunpack.c.l.bf16 %v306_v0  ;;  %v308_v3 = vunpack.c.h.bf16 %v306_v0 }
  0x11   : > { %v185_v5 = vmul.f32 %v307_v2, %v295_v1  ;;  %v186_v6 = vmul.f32 %v308_v3, %v295_v1 }
  0x13   : > { %v194_v7 = vadd.f32 %v296_v4, %v185_v5  ;;  %v195_v8 = vadd.f32 %v296_v4, %v186_v6 }
  0x15   : > { %v196_v9 = vmin.f32 %v194_v7, 20.0  ;;  %v197_v10 = vmin.f32 %v195_v8, 20.0  ;;  %vm214_vm0 = vcmp.gt.f32.partialorder %v194_v7, 20.0  ;;  %vm215_vm1 = vcmp.gt.f32.partialorder %v195_v8, 20.0 }
  0x17   : > { %v198_v11 = vmul.f32 1.442695, %v196_v9  ;;  %v200_v12 = vmul.f32 1.442695, %v197_v10 }
  0x19   : > { %322 = vpow2.f32 %v198_v11 }
  0x1a   : > { %324 = vpow2.f32 %v200_v12 }
  0x26   : > { %v323_v13 = vpop.eup %322 }
  0x27   : > { %v325_v14 = vpop.eup %324  ;;  %v202_v15 = vadd.f32 1.0, %v323_v13 }
  0x28   : > { %v203_v16 = vadd.f32 1.0, %v325_v14 }
  0x29   : > { %v204_v17 = vmul.f32 %v202_v15, %v202_v15 }
  0x2a   : > { %v205_v18 = vmul.f32 %v203_v16, %v203_v16 }
  0x2b   : > { %v208_v19 = vadd.f32 1.0, %v204_v17  ;;  %v297_v21 = vadd.f32 -1.0, %v204_v17 }
  0x2c   : > { %v209_v20 = vadd.f32 1.0, %v205_v18  ;;  %v298_v22 = vadd.f32 -1.0, %v205_v18 }
  0x2d   : > { %326 = vrcp.f32 %v208_v19 }
  0x2e   : > { %328 = vrcp.f32 %v209_v20 }
  0x3a   : > { %v327_v23 = vpop.eup %326 }
  0x3b   : > { %v329_v24 = vpop.eup %328  ;;  %v212_v25 = vmul.f32 %v327_v23, %v297_v21 }
  0x3c   : > { %v213_v26 = vmul.f32 %v329_v24, %v298_v22 }
  0x3d   : > { %v216_v27 = vmul.f32 %v212_v25, %v194_v7 }
  0x3e   : > { %v217_v28 = vmul.f32 %v213_v26, %v195_v8 }
  0x3f   : > { %v218_v29 = vsel %vm214_vm0, %v194_v7, %v216_v27 }
  0x40   : > { %v219_v30 = vsel %vm215_vm1, %v195_v8, %v217_v28 }
  0x41   : > { %v312_v31 = vpack.c.bf16 %v219_v30, %v218_v29 }
  0x43   : > { %313 = vst [vmem:[%s172_s25] sm:$0xff] %v312_v31  }
  0x44 PF: > { %s13_s12 = sadd.s32 1, %s336_s12  }
  0x45   : > { %p10_p4 = scmp.ge.s32.totalorder %s13_s12, 4  }
  0x47   :  { %12 = sbr.rel (!%p10_p4) target bundleno = 1 (0x1), region = 62 }

// kernel: darknet_forward.24
= control target key start
LH: loop header
LB: loop body
LE: loop exit
PB: predicated region body
PF: predicated region fallthrough
CT: control target
= control target key end

     0   :  { %s578_s15 = smov 0   ;;  %s630_s0 = inlined_call_operand.vmem [shape: bf16[32,128], index: 0, kind: input, shape index: {}]   ;;  %s631_s1 = inlined_call_operand.vmem [shape: bf16[128,128], index: 1, kind: input, shape index: {}]   ;;  %s632_s2 = inlined_call_operand.vmem [shape: bf16[32,128], index: 2, kind: output, shape index: {0}]   ;;  %s633_s3 = inlined_call_operand.vmem [shape: f32[2,1,128], index: 3, kind: output, shape index: {1}]   ;;  %s634_s4 = inlined_call_operand.vmem [shape: f32[2,1,128], index: 4, kind: output, shape index: {2}]  }
   0x1 LB: > { %s584_s16 = sadd.s32 4294967295, %s549_s15   ;;  %p470_p0 = scmp.ge.s32.totalorder %s549_s15, 1  ;;  %s549_s15 = sphi %s578_s15, %s15_s15  }
   0x2   : > { %p168_p1 = scmp.lt.s32.totalorder %s549_s15, 3 }
   0x4   : > { %p169_p2 = pnand %p470_p0, %p168_p1 }
   0x5   : > { %s471_s21 = sshll.u32 (!%p169_p2), %s584_s16, 1  ;;  %p212_p4 = scmp.lt.s32.totalorder (!%p169_p2), %s584_s16, 1 }
   0x6   : > { %172 = sbr.rel (%p169_p2) target bundleno = 258 (0x102), region = 28  ;;  %p201_p3 = scmp.lt.s32.totalorder (!%p169_p2), %s471_s21, 3 }
   0xb   : > { %v534_v0 = vld [vmem:[%s631_s1 + $0x38] sm:$0xff]   ;;  %v551_v1 = vmov 0.0   ;;  %v535_v2 = vld [vmem:[%s631_s1 + $0x30] sm:$0xff]   ;;  %vm552_vm0 = vmmov 0   ;;  %s636_s21 = smov (!%p201_p3, %s471_s21), 3  ;;  %v536_v3 = vld [vmem:[%s631_s1 + $0x28] sm:$0xff]  }
   0xc   : > { %504 = vmatprep.subr.bf16.mxu0 %v551_v1  ;;  %520 = vmatprep.mubr.msk.bf16.mxu0 %vm552_vm0, %v551_v1  ;;  %s472_s24 = sshll.u32 %s636_s21, 2  ;;  %v537_v4 = vld [vmem:[%s631_s1 + $0x20] sm:$0xff]   ;;  %v538_v5 = vld [vmem:[%s631_s1 + $0x18] sm:$0xff]   ;;  %v539_v6 = vld [vmem:[%s631_s1 + $0x10] sm:$0xff]   ;;  %s638_s16 = smov (!%p212_p4, %s584_s16), 1 }
   0xd   : > { %505 = vmatpush3.bf16.msra.mxu0 %v534_v0  ;;  %s204_s27 = scalar_lea.vmem %s630_s0, %s472_s24  ;;  %v540_v7 = vld [vmem:[%s631_s1 + $0x8] sm:$0xff]   ;;  %v541_v8 = vld [vmem:[%s631_s1] sm:$0xff]   ;;  %s210_s14 = scalar_lea.vmem %s632_s2, %s472_s24 }
   0xe   : > { %506 = vmatprep.subr.bf16.mxu0 %v551_v1  ;;  %v542_v9 = vld [vmem:[%s204_s27] sm:$0xff]   ;;  %s214_s19 = scalar_lea.vmem %s633_s3, %s638_s16  ;;  %s217_s22 = scalar_lea.vmem %s634_s4, %s638_s16 }
  0x11   : > { %507 = vmatpush3.bf16.msra.mxu0 %v535_v2 }
  0x12   : > { %508 = vmatprep.subr.bf16.mxu0 %v551_v1 }
  0x15   : > { %509 = vmatpush3.bf16.msra.mxu0 %v536_v3 }
  0x16   : > { %510 = vmatprep.subr.bf16.mxu0 %v551_v1 }
  0x19   : > { %511 = vmatpush3.bf16.msra.mxu0 %v537_v4 }
  0x1a   : > { %512 = vmatprep.subr.bf16.mxu0 %v551_v1 }
  0x1d   : > { %513 = vmatpush3.bf16.msra.mxu0 %v538_v5 }
  0x1e   : > { %514 = vmatprep.subr.bf16.mxu0 %v551_v1 }
  0x21   : > { %515 = vmatpush3.bf16.msra.mxu0 %v539_v6 }
  0x22   : > { %516 = vmatprep.subr.bf16.mxu0 %v551_v1 }
  0x25   : > { %517 = vmatpush3.bf16.msra.mxu0 %v540_v7 }
  0x26   : > { %518 = vmatprep.subr.bf16.mxu0 %v551_v1 }
  0x29   : > { %519 = vmatpush3.bf16.msra.mxu0 %v541_v8 }
  0x2c   : > { %521 = vmatmul.mubr.bf16.vlgmr.msra.gmra.mxu0 %v542_v9 }
  0xec   : > { %v325_v10 = vpop.f32.mrf.mxu0 }
  0xed   : > { %v350_v13 = vmul.f32 %v325_v10, %v325_v10 }
  0xee   : > { %v522_v11 = vpop.f32.mrf.mxu0 }
  0xf0   : > { %v328_v12 = vpop.f32.mrf.mxu0 }
  0xf1   : > { %v493_v14 = vpack.c.bf16 %v328_v12, %v325_v10  ;;  %v342_v15 = vadd.f32 %v328_v12, %v325_v10  ;;  %v351_v16 = vmul.f32 %v328_v12, %v328_v12 }
  0xf2   : > { %v523_v17 = vpop.f32.mrf.mxu0 }
  0xf3   : > { %494 = vst [vmem:[%s210_s14] sm:$0xff] %v493_v14   ;;  %v343_v18 = vrot.slane %v342_v15, 4  ;;  %v352_v19 = vadd.f32 %v351_v16, %v350_v13 }
  0xf5   : > { %v344_v20 = vadd.f32 %v343_v18, %v342_v15  ;;  %v353_v21 = vrot.slane %v352_v19, 4 }
  0xf7   : > { %v345_v22 = vrot.slane %v344_v20, 2  ;;  %v354_v23 = vadd.f32 %v353_v21, %v352_v19 }
  0xf9   : > { %v346_v24 = vadd.f32 %v345_v22, %v344_v20  ;;  %v355_v25 = vrot.slane %v354_v23, 2 }
  0xfb   : > { %v347_v26 = vrot.slane %v346_v24, 1  ;;  %v356_v27 = vadd.f32 %v355_v25, %v354_v23 }
  0xfd   : > { %v348_v28 = vadd.f32 %v347_v26, %v346_v24  ;;  %v357_v29 = vrot.slane %v356_v27, 1 }
  0xff   : > { %349 = vst [vmem:[%s214_s19] sm:$0x1] %v348_v28  ;;  %v358_v30 = vadd.f32 %v357_v29, %v356_v27 }
 0x101   : > { %359 = vst [vmem:[%s217_s22] sm:$0x1] %v358_v30 }
 0x102 PF: > { %s15_s15 = sadd.s32 1, %s549_s15  }
 0x103   : > { %p12_p5 = scmp.ge.s32.totalorder %s15_s15, 4  }
 0x105   :  { %14 = sbr.rel (!%p12_p5) target bundleno = 1 (0x1), region = 82 }

// kernel: darknet_forward.27
= control target key start
LH: loop header
LB: loop body
LE: loop exit
PB: predicated region body
PF: predicated region fallthrough
CT: control target
= control target key end

     0   :  { %s436_s15 = smov 0   ;;  %s467_s0 = inlined_call_operand.vmem [shape: bf16[32,128], index: 0, kind: input, shape index: {}]   ;;  %s468_s1 = inlined_call_operand.vmem [shape: f32[1,128], index: 1, kind: input, shape index: {}]   ;;  %s469_s2 = inlined_call_operand.vmem [shape: f32[1,128], index: 2, kind: input, shape index: {}]   ;;  %s470_s3 = inlined_call_operand.vmem [shape: bf16[32,128], index: 3, kind: input, shape index: {}]   ;;  %s471_s4 = inlined_call_operand.vmem [shape: bf16[32,128], index: 4, kind: output, shape index: {}]  }
   0x1 LB: > { %s353_s16 = sadd.s32 4294967295, %s409_s15   ;;  %p357_p0 = scmp.ge.s32.totalorder %s409_s15, 1  ;;  %s409_s15 = sphi %s436_s15, %s14_s15  }
   0x2   : > { %p174_p1 = scmp.lt.s32.totalorder %s409_s15, 3 }
   0x4   : > { %p175_p2 = pnand %p357_p0, %p174_p1 }
   0x5   : > { %s358_s17 = sshll.u32 (!%p175_p2), %s353_s16, 1 }
   0x6   : > { %178 = sbr.rel (%p175_p2) target bundleno = 70 (0x46), region = 36  ;;  %p206_p3 = scmp.lt.s32.totalorder (!%p175_p2), %s358_s17, 3 }
   0xb   : > { %s473_s17 = smov (!%p206_p3, %s358_s17), 3  ;;  %v364_v1 = vld [vmem:[%s468_s1] ss:$0 sm:$0xff] }
   0xc   : > { %s444_s18 = sshll.u32 %s473_s17, 2  ;;  %v365_v4 = vld [vmem:[%s469_s2] ss:$0 sm:$0xff] }
   0xd   : > { %s209_s21 = scalar_lea.vmem %s467_s0, %s444_s18  ;;  %s215_s28 = scalar_lea.vmem %s470_s3, %s444_s18 }
   0xe   : > { %v379_v0 = vld [vmem:[%s209_s21] sm:$0xff]   ;;  %s221_s5 = scalar_lea.vmem %s471_s4, %s444_s18 }
   0xf   : > { %v380_v2 = vunpack.c.l.bf16 %v379_v0  ;;  %v381_v3 = vunpack.c.h.bf16 %v379_v0  ;;  %v375_v23 = vld [vmem:[%s215_s28] sm:$0xff]  }
  0x10   : > { %v376_v27 = vunpack.c.l.bf16 %v375_v23  ;;  %v377_v29 = vunpack.c.h.bf16 %v375_v23 }
  0x11   : > { %v238_v5 = vmul.f32 %v380_v2, %v364_v1  ;;  %v239_v6 = vmul.f32 %v381_v3, %v364_v1 }
  0x13   : > { %v247_v7 = vadd.f32 %v365_v4, %v238_v5  ;;  %v248_v8 = vadd.f32 %v365_v4, %v239_v6 }
  0x15   : > { %v249_v9 = vmin.f32 %v247_v7, 20.0  ;;  %v250_v10 = vmin.f32 %v248_v8, 20.0  ;;  %vm267_vm0 = vcmp.gt.f32.partialorder %v247_v7, 20.0  ;;  %vm268_vm1 = vcmp.gt.f32.partialorder %v248_v8, 20.0 }
  0x17   : > { %v251_v11 = vmul.f32 1.442695, %v249_v9  ;;  %v253_v12 = vmul.f32 1.442695, %v250_v10 }
  0x19   : > { %395 = vpow2.f32 %v251_v11 }
  0x1a   : > { %397 = vpow2.f32 %v253_v12 }
  0x26   : > { %v396_v13 = vpop.eup %395 }
  0x27   : > { %v398_v14 = vpop.eup %397  ;;  %v255_v15 = vadd.f32 1.0, %v396_v13 }
  0x28   : > { %v256_v16 = vadd.f32 1.0, %v398_v14 }
  0x29   : > { %v257_v17 = vmul.f32 %v255_v15, %v255_v15 }
  0x2a   : > { %v258_v18 = vmul.f32 %v256_v16, %v256_v16 }
  0x2b   : > { %v261_v19 = vadd.f32 1.0, %v257_v17  ;;  %v366_v21 = vadd.f32 -1.0, %v257_v17 }
  0x2c   : > { %v262_v20 = vadd.f32 1.0, %v258_v18  ;;  %v367_v22 = vadd.f32 -1.0, %v258_v18 }
  0x2d   : > { %399 = vrcp.f32 %v261_v19 }
  0x2e   : > { %401 = vrcp.f32 %v262_v20 }
  0x3a   : > { %v400_v24 = vpop.eup %399 }
  0x3b   : > { %v402_v25 = vpop.eup %401  ;;  %v265_v26 = vmul.f32 %v400_v24, %v366_v21 }
  0x3c   : > { %v266_v28 = vmul.f32 %v402_v25, %v367_v22 }
  0x3d   : > { %v269_v30 = vmul.f32 %v265_v26, %v247_v7 }
  0x3e   : > { %v270_v31 = vmul.f32 %v266_v28, %v248_v8 }
  0x3f   : > { %v271_v32 = vsel %vm267_vm0, %v247_v7, %v269_v30 }
  0x40   : > { %v272_v33 = vsel %vm268_vm1, %v248_v8, %v270_v31  ;;  %v273_v34 = vadd.f32 %v376_v27, %v271_v32 }
  0x41   : > { %v274_v35 = vadd.f32 %v377_v29, %v272_v33 }
  0x43   : > { %v385_v36 = vpack.c.bf16 %v274_v35, %v273_v34 }
  0x45   : > { %386 = vst [vmem:[%s221_s5] sm:$0xff] %v385_v36  }
  0x46 PF: > { %s14_s15 = sadd.s32 1, %s409_s15  }
  0x47   : > { %p11_p4 = scmp.ge.s32.totalorder %s14_s15, 4  }
  0x49   :  { %13 = sbr.rel (!%p11_p4) target bundleno = 1 (0x1), region = 69 }

</bundles_post_ra>
